<compile_context>
chip_gen: v6e
topology: v6e:2x2x1
jax: 0.10.0
libtpu: 0.0.40
codegen_flags: <defaults>
</compile_context>

<pallas_src>
import functools

import jax
import jax.numpy as jnp
from jax import lax
from jax.experimental import pallas as pl
from jax.experimental.pallas import tpu as pltpu


# ----------------------------------------------------------------------------
# Config (small synthetic shapes consistent with the module's forward pass)
# ----------------------------------------------------------------------------
class Cfg:
    strides = [1, 2, 4]              # strides[-1] used by the BEV gatherer
    n_keypoints = 32
    radii = [4.0, 8.0]               # one radius per PointNet stage (simplified)
    mlps = [[1, 8, 16], [8, 16, 16]] # [Cin, hidden, out] per stage (simplified)
    voxel_size = (0.5, 0.5, 0.5)     # base_voxel_size of the (synthetic) CNN
    grid_bounds = (0.0, 0.0, 0.0, 32.0, 32.0, 4.0)


CFG = Cfg()
VOXEL_OFFSET = (0.0, 0.0, 0.0)       # xyz lower bound of the voxel grid

NKP_BLOCKS = 2                                        # parallel grid axis (v7x: 2 TCs)
_per_blk = (CFG.n_keypoints + NKP_BLOCKS - 1) // NKP_BLOCKS
KP_BLK = ((_per_blk + 7) // 8) * 8                    # keypoints per block (sublane mult)
KP_TOT = NKP_BLOCKS * KP_BLK
KP_LANE = 128                                         # lane-dense padded output width


# ----------------------------------------------------------------------------
# In-kernel helpers (traced inside the fused kernel body)
# ----------------------------------------------------------------------------
def _pointnet_stage(kp, pts, w1, b1, w2t, b2, radius):
    """Ball query + shared 2-layer MLP + masked max-pool for one stage.

    kp : (KP, 3)      f32   keypoints of this block
    pts: (N, 3+Cin)   f32   point xyz concatenated with features
    w1 : (3+Cin, H1)  bf16  merged first-layer weight [w1x; w1f]
    b1 : (H1, 1)      f32
    w2t: (H2, H1)     bf16  (second layer, pre-transposed)
    b2 : (H2, 1)      f32
    returns pooled (KP, H2) f32
    """
    KP = kp.shape[0]
    N = pts.shape[0]
    H2 = w2t.shape[0]
    H1 = w2t.shape[1]
    xyz = pts[:, :3]

    # --- ball query membership as ONE lane-dense (KP, N) matmul ---
    #     d2 = ||kp||^2 - 2 kp.xyz + ||xyz||^2
    kp_aug = jnp.concatenate([-2.0 * kp, jnp.ones((KP, 1), jnp.float32)], axis=1)
    xyz_aug = jnp.concatenate(
        [xyz, jnp.sum(xyz * xyz, axis=1, keepdims=True)], axis=1)
    d2 = (jnp.sum(kp * kp, axis=1, keepdims=True)
          + lax.dot_general(kp_aug, xyz_aug, (((1,), (1,)), ((), ())),
                            preferred_element_type=jnp.float32))          # (KP, N)
    r2 = jnp.float32(radius * radius)
    in_ball = d2 <= r2                                                    # (KP, N)
    # Empty ball -> ball_query falls back to point 0 (PointNet++ behaviour):
    # force column 0 into the mask instead of a separate fallback branch.
    empty = jnp.min(d2, axis=1, keepdims=True) > r2                       # (KP, 1)
    col0 = lax.broadcasted_iota(jnp.int32, (KP, N), 1) == 0
    mask = jnp.logical_or(in_ball, jnp.logical_and(col0, empty))          # (KP, N)

    # --- first MLP layer, keypoint-independent part hoisted ---
    #     concat([xyz - kp, feat]) @ W1 == pts @ W1 - kp @ W1[:3]
    pts_b = pts.astype(jnp.bfloat16)
    kp_b = kp.astype(jnp.bfloat16)
    baseT = lax.dot_general(w1, pts_b, (((0,), (1,)), ((), ())),
                            preferred_element_type=jnp.float32) + b1      # (H1, N)
    kp_ext = jnp.concatenate(
        [kp_b, jnp.zeros((KP, w1.shape[0] - 3), jnp.bfloat16)], axis=1)   # (KP, 3+Cin)
    kp_proj = jnp.dot(kp_ext, w1, preferred_element_type=jnp.float32)     # (KP, H1)

    # Lane-major hidden activations: N stays on the 128-lane axis.
    h1 = jnp.maximum(baseT[None, :, :] - kp_proj[:, :, None], 0.0)        # (KP, H1, N)

    # --- second MLP layer: batched MXU matmul (KP x [(H2,H1)@(H1,N)]) ---
    w2t_b = jnp.broadcast_to(w2t[None, :, :], (KP, H2, H1))
    h2 = lax.dot_general(w2t_b, h1.astype(jnp.bfloat16),
                         (((2,), (1,)), ((0,), (0,))),
                         preferred_element_type=jnp.float32)              # (KP, H2, N)
    h2 = jnp.maximum(h2 + b2[None, :, :], 0.0)

    # --- masked max-pool over the ball: single lane (XLU) reduction ---
    pooled = jnp.max(jnp.where(mask[:, None, :], h2, jnp.float32(-1e30)),
                     axis=2)                                              # (KP, H2)
    return pooled


def _bev_gather(kp_xy, vol2d, *, H, W, off_xy, bvs_xy, stride):
    """BEV bilinear gather as one lane-dense (C*D, H*W) x (H*W, KP) contraction."""
    KP = kp_xy.shape[0]
    # --- compute_bev_indices ---
    i0 = (kp_xy[:, 0:1] - off_xy[0]) / (bvs_xy[0] * stride)               # x component
    i1 = (kp_xy[:, 1:2] - off_xy[1]) / (bvs_xy[1] * stride)               # y component
    # --- normalize_grid_sample_indices (faithful to the torch module:
    #     component 0 clamped/normalized with H, component 1 with W; they
    #     coincide here because H == W.  Divides by H-2 / W-2.) ---
    i0 = jnp.clip(i0, 0.0, float(H - 1))
    i1 = jnp.clip(i1, 0.0, float(W - 1))
    g0 = 2.0 * (i0 / float(H - 2)) - 1.0
    g1 = 2.0 * (i1 / float(W - 2)) - 1.0
    # --- F.grid_sample: comp0 -> x (W axis), comp1 -> y (H axis); bilinear,
    #     padding_mode='zeros', align_corners=False ---
    px = ((g0 + 1.0) * float(W) - 1.0) * 0.5
    py = ((g1 + 1.0) * float(H) - 1.0) * 0.5
    x0f = jnp.floor(px)
    y0f = jnp.floor(py)
    wx1 = px - x0f
    wx0 = 1.0 - wx1
    wy1 = py - y0f
    wy0 = 1.0 - wy1
    x0 = x0f.astype(jnp.int32)
    x1 = x0 + 1
    y0 = y0f.astype(jnp.int32)
    y1 = y0 + 1

    # Combined bilinear one-hot weights built directly at (KP, H*W):
    # guarded corner matches give zero padding with no aliasing, no reshape,
    # no int div/mod.
    col = lax.broadcasted_iota(jnp.int32, (KP, H * W), 1)

    def corner(yi, xi, wgt):
        ok = (xi >= 0) & (xi < W) & (yi >= 0) & (yi < H)                  # (KP, 1)
        hit = jnp.logical_and(col == yi * W + xi, ok)                     # (KP, H*W)
        return jnp.where(hit, wgt, 0.0)

    Wxy = (corner(y0, x0, wy0 * wx0) + corner(y0, x1, wy0 * wx1)
           + corner(y1, x0, wy1 * wx0) + corner(y1, x1, wy1 * wx1))       # (KP, H*W)

    # Single MXU contraction over H*W, both operands lane-dense (bf16 operands
    # introduce ~1e-2 relative error vs torch's f32 grid_sample).
    return lax.dot_general(vol2d, Wxy.astype(vol2d.dtype),
                           (((1,), (1,)), ((), ())),
                           preferred_element_type=jnp.float32)            # (C*D, KP)


# ----------------------------------------------------------------------------
# Fused kernel: 2x PointnetSAModule (simplified) + BEV_FeatureGatherer
# ----------------------------------------------------------------------------
def pv_rcnn_fused_kernel(kp_ref,
                         pts0_ref, w10_ref, b10_ref, w2t0_ref, b20_ref,
                         pts1_ref, w11_ref, b11_ref, w2t1_ref, b21_ref,
                         vol_ref, out_ref, *, radii, H, W, off_xy, bvs_xy,
                         stride, kp_lane):
    kp = kp_ref[...]                                          # (KP_BLK, 3) f32
    stages = [(pts0_ref, w10_ref, b10_ref, w2t0_ref, b20_ref, radii[0]),
              (pts1_ref, w11_ref, b11_ref, w2t1_ref, b21_ref, radii[1])]

    segs = []
    for pts_ref, w1_ref, b1_ref, w2t_ref, b2_ref, radius in stages:
        pooled = _pointnet_stage(kp, pts_ref[...], w1_ref[...], b1_ref[...],
                                 w2t_ref[...], b2_ref[...], radius)
        segs.append(pooled.T)                                 # (H2, KP_BLK)
    segs.append(_bev_gather(kp[:, :2], vol_ref[...], H=H, W=W,
                            off_xy=off_xy, bvs_xy=bvs_xy, stride=stride))

    seg = jnp.concatenate(segs, axis=0)                       # (Ctot, KP_BLK)
    if kp_lane > seg.shape[1]:                                # pad lanes only here
        pad = jnp.zeros((seg.shape[0], kp_lane - seg.shape[1]), jnp.float32)
        seg = jnp.concatenate([seg, pad], axis=1)
    out_ref[...] = seg[None]                                  # lane-dense store


# ----------------------------------------------------------------------------
# PV_RCNN forward (glue + single pallas_call)
# ----------------------------------------------------------------------------
def pv_rcnn_forward(points, params):
    """points: (Np, 4) -> keypoint feature tensor (1, Ctot, K)."""
    K = CFG.n_keypoints
    # TODO(synk): furthest_point_sample has no clean Pallas equivalent; keypoints
    # are the first n_keypoints points (deterministic).
    keypoints = points[:K, :3].astype(jnp.float32)
    kp_all = jnp.pad(keypoints, ((0, KP_TOT - K), (0, 0)))

    # TODO(synk): spconv.utils.VoxelGenerator + VoxelFeatureExtractor + SparseCNN
    # have no Pallas equivalent; raw points act as the stride-1 stage and
    # deterministic synthetic voxel features / final dense volume stand in for
    # the CNN outputs.
    cnn_out = [(points[:, :3], points[:, 3:4]),
               (params["voxel_xyz"], params["voxel_feat"])]

    # TODO(synk): MSG multi-radius grouping, nsample cap and BatchNorm are not
    # reproduced; single-scale ball query + shared MLP + max-pool only.
    stage_args, h2s = [], []
    for (vxyz, vfeat), p in zip(cnn_out, params["pnets"]):
        pts = jnp.concatenate([vxyz, vfeat], axis=1).astype(jnp.float32)
        w1 = jnp.concatenate([p["w1x"], p["w1f"]], axis=0).astype(jnp.bfloat16)
        b1 = p["b1"].reshape(-1, 1).astype(jnp.float32)           # (H1, 1)
        w2t = p["w2"].T.astype(jnp.bfloat16)                      # (H2, H1)
        b2 = p["b2"].reshape(-1, 1).astype(jnp.float32)           # (H2, 1)
        stage_args.extend([pts, w1, b1, w2t, b2])
        h2s.append(p["w2"].shape[1])

    vol = params["final_volume"]
    _, C, D, H, W = vol.shape
    vol2d = vol.reshape(C * D, H * W).astype(jnp.bfloat16)        # lane-dense volume
    ctot = sum(h2s) + C * D
    assert ctot % 8 == 0, ctot

    in_specs = [pl.BlockSpec((KP_BLK, 3), lambda i: (i, 0))]
    in_specs += [pl.BlockSpec(a.shape, lambda i: (0, 0)) for a in stage_args]
    in_specs += [pl.BlockSpec(vol2d.shape, lambda i: (0, 0))]

    kernel = functools.partial(
        pv_rcnn_fused_kernel,
        radii=tuple(float(r) for r in CFG.radii), H=H, W=W,
        off_xy=(float(VOXEL_OFFSET[0]), float(VOXEL_OFFSET[1])),
        bvs_xy=(float(CFG.voxel_size[0]), float(CFG.voxel_size[1])),
        stride=float(CFG.strides[-1]), kp_lane=KP_LANE)

    out = pl.pallas_call(
        kernel,
        out_shape=jax.ShapeDtypeStruct((NKP_BLOCKS, ctot, KP_LANE), jnp.float32),
        grid=(NKP_BLOCKS,),
        in_specs=in_specs,
        out_specs=pl.BlockSpec((1, ctot, KP_LANE), lambda i: (i, 0, 0)),
        compiler_params=pltpu.CompilerParams(
            dimension_semantics=("parallel",)),
    )(kp_all, *stage_args, vol2d)                      # (NBLK, Ctot, KP_LANE)

    feats = out[:, :, :KP_BLK]                         # real keypoints per block
    feats = jnp.transpose(feats, (1, 0, 2)).reshape(ctot, KP_TOT)[:, :K]
    # TODO(synk): RoiGridPool over random Boxes3D proposals (rotated ROI grid
    # pooling) is omitted; keypoint features are returned instead.
    return feats[None]                                 # (1, Ctot, K)


# ----------------------------------------------------------------------------
# Deterministic parameter / input construction
# ----------------------------------------------------------------------------
def build_params(key):
    keys = jax.random.split(key, 12)
    params = {}
    # synthetic intermediate CNN voxel stage
    Nv = 128
    params["voxel_xyz"] = jnp.concatenate(
        [jax.random.uniform(keys[0], (Nv, 2), minval=0.0, maxval=32.0),
         jax.random.uniform(keys[1], (Nv, 1), minval=0.0, maxval=4.0)], axis=1)
    params["voxel_feat"] = 0.5 * jax.random.normal(keys[2], (Nv, CFG.mlps[1][0]))
    # synthetic final dense volume (N, C, D, H, W)
    C, D, H, W = 4, 4, 16, 16
    params["final_volume"] = jax.random.normal(keys[3], (1, C, D, H, W),
                                               dtype=jnp.float32)
    # PointNet MLP weights per stage
    pnets = []
    for s, (cin, h1, h2) in enumerate(CFG.mlps):
        kk = jax.random.split(keys[4 + s], 5)
        pnets.append({
            "w1x": 0.1 * jax.random.normal(kk[0], (3, h1), dtype=jnp.float32),
            "w1f": 0.1 * jax.random.normal(kk[1], (cin, h1), dtype=jnp.float32),
            "b1": 0.01 * jax.random.normal(kk[2], (1, h1), dtype=jnp.float32),
            "w2": 0.1 * jax.random.normal(kk[3], (h1, h2), dtype=jnp.float32),
            "b2": 0.01 * jax.random.normal(kk[4], (1, h2), dtype=jnp.float32),
        })
    params["pnets"] = pnets
    return params


if __name__ == "__main__":
    key = jax.random.PRNGKey(0)
    kp_key, kparams = jax.random.split(key)
    k1, k2, k3 = jax.random.split(kp_key, 3)

    Np = 128
    points = jnp.concatenate(
        [jax.random.uniform(k1, (Np, 2), minval=0.0, maxval=32.0),
         jax.random.uniform(k2, (Np, 1), minval=0.0, maxval=4.0),
         jax.random.uniform(k3, (Np, 1), minval=0.0, maxval=1.0)],
        axis=1).astype(jnp.float32)

    params = build_params(kparams)

    fwd = jax.jit(pv_rcnn_forward)
    out = jax.block_until_ready(fwd(points, params))

    expected_channels = CFG.mlps[0][-1] + CFG.mlps[1][-1] + 4 * 4  # pnets + C*D
    assert out.shape == (1, expected_channels, CFG.n_keypoints), out.shape
    assert bool(jnp.all(jnp.isfinite(out)))
    print("KERNEL_OK")
</pallas_src>

<mosaic_0001>
module attributes {stable_mosaic.version = 11 : i64} {
  func.func @pv_rcnn_fused_kernel(%arg0: i32, %arg1: memref<16x3xf32, #tpu.memory_space<vmem>>, %arg2: memref<128x4xf32, #tpu.memory_space<vmem>>, %arg3: memref<4x8xbf16, #tpu.memory_space<vmem>>, %arg4: memref<8x1xf32, #tpu.memory_space<vmem>>, %arg5: memref<16x8xbf16, #tpu.memory_space<vmem>>, %arg6: memref<16x1xf32, #tpu.memory_space<vmem>>, %arg7: memref<128x11xf32, #tpu.memory_space<vmem>>, %arg8: memref<11x16xbf16, #tpu.memory_space<vmem>>, %arg9: memref<16x1xf32, #tpu.memory_space<vmem>>, %arg10: memref<16x16xbf16, #tpu.memory_space<vmem>>, %arg11: memref<16x1xf32, #tpu.memory_space<vmem>>, %arg12: memref<16x256xbf16, #tpu.memory_space<vmem>>, %arg13: memref<1x48x128xf32, #tpu.memory_space<vmem>>) attributes {dimension_semantics = [#tpu.dimension_semantics<parallel>], iteration_bounds = array<i64: 2>, scalar_prefetch = 0 : i64, scratch_operands = 0 : i64, tpu.core_type = #tpu.core_type<tc>, window_params = [{transform_indices = @transform_0, window_bounds = array<i64: 16, 3>}, {pipeline_mode = #tpu.pipeline_mode<synchronous>, transform_indices = @transform_1, window_bounds = array<i64: 128, 4>}, {pipeline_mode = #tpu.pipeline_mode<synchronous>, transform_indices = @transform_2, window_bounds = array<i64: 4, 8>}, {pipeline_mode = #tpu.pipeline_mode<synchronous>, transform_indices = @transform_3, window_bounds = array<i64: 8, 1>}, {pipeline_mode = #tpu.pipeline_mode<synchronous>, transform_indices = @transform_4, window_bounds = array<i64: 16, 8>}, {pipeline_mode = #tpu.pipeline_mode<synchronous>, transform_indices = @transform_5, window_bounds = array<i64: 16, 1>}, {pipeline_mode = #tpu.pipeline_mode<synchronous>, transform_indices = @transform_6, window_bounds = array<i64: 128, 11>}, {pipeline_mode = #tpu.pipeline_mode<synchronous>, transform_indices = @transform_7, window_bounds = array<i64: 11, 16>}, {pipeline_mode = #tpu.pipeline_mode<synchronous>, transform_indices = @transform_8, window_bounds = array<i64: 16, 1>}, {pipeline_mode = #tpu.pipeline_mode<synchronous>, transform_indices = @transform_9, window_bounds = array<i64: 16, 16>}, {pipeline_mode = #tpu.pipeline_mode<synchronous>, transform_indices = @transform_10, window_bounds = array<i64: 16, 1>}, {pipeline_mode = #tpu.pipeline_mode<synchronous>, transform_indices = @transform_11, window_bounds = array<i64: 16, 256>}, {transform_indices = @transform_12, window_bounds = array<i64: 1, 48, 128>}]} {
    %c0 = arith.constant 0 : index
    %c0_0 = arith.constant 0 : index
    %0 = vector.load %arg1[%c0, %c0_0] : memref<16x3xf32, #tpu.memory_space<vmem>>, vector<16x3xf32>
    %c0_1 = arith.constant 0 : index
    %c0_2 = arith.constant 0 : index
    %1 = vector.load %arg2[%c0_1, %c0_2] : memref<128x4xf32, #tpu.memory_space<vmem>>, vector<128x4xf32>
    %c0_3 = arith.constant 0 : index
    %c0_4 = arith.constant 0 : index
    %2 = vector.load %arg3[%c0_3, %c0_4] : memref<4x8xbf16, #tpu.memory_space<vmem>>, vector<4x8xbf16>
    %c0_5 = arith.constant 0 : index
    %c0_6 = arith.constant 0 : index
    %3 = vector.load %arg4[%c0_5, %c0_6] : memref<8x1xf32, #tpu.memory_space<vmem>>, vector<8x1xf32>
    %c0_7 = arith.constant 0 : index
    %c0_8 = arith.constant 0 : index
    %4 = vector.load %arg5[%c0_7, %c0_8] : memref<16x8xbf16, #tpu.memory_space<vmem>>, vector<16x8xbf16>
    %c0_9 = arith.constant 0 : index
    %c0_10 = arith.constant 0 : index
    %5 = vector.load %arg6[%c0_9, %c0_10] : memref<16x1xf32, #tpu.memory_space<vmem>>, vector<16x1xf32>
    %6 = vector.extract_strided_slice %1 {offsets = [0, 0], sizes = [128, 3], strides = [1, 1]} : vector<128x4xf32> to vector<128x3xf32>
    %cst = arith.constant -2.000000e+00 : f32
    %7 = vector.broadcast %cst : f32 to vector<16x3xf32>
    %8 = arith.mulf %7, %0 : vector<16x3xf32>
    %cst_11 = arith.constant 1.000000e+00 : f32
    %9 = vector.broadcast %cst_11 : f32 to vector<16x1xf32>
    %10 = tpu.concatenate %8, %9 in 1 : vector<16x3xf32>, vector<16x1xf32> -> vector<16x4xf32>
    %11 = arith.mulf %6, %6 : vector<128x3xf32>
    %cst_12 = arith.constant dense<0.000000e+00> : vector<128xf32>
    %12 = vector.multi_reduction <add>, %11, %cst_12 [1] : vector<128x3xf32> to vector<128xf32>
    %13 = vector.shape_cast %12 : vector<128xf32> to vector<128x1xf32>
    %14 = tpu.concatenate %6, %13 in 1 : vector<128x3xf32>, vector<128x1xf32> -> vector<128x4xf32>
    %15 = arith.mulf %0, %0 : vector<16x3xf32>
    %cst_13 = arith.constant dense<0.000000e+00> : vector<16xf32>
    %16 = vector.multi_reduction <add>, %15, %cst_13 [1] : vector<16x3xf32> to vector<16xf32>
    %17 = vector.shape_cast %16 : vector<16xf32> to vector<16x1xf32>
    %cst_14 = arith.constant dense<0.000000e+00> : vector<16x128xf32>
    %18 = tpu.matmul %10, %14, %cst_14 {dimension_numbers = #tpu.dot_dimension_numbers<[1], [1], [0], [0], [0, 0, 1, 0], [], []>} : vector<16x4xf32>, vector<128x4xf32>, vector<16x128xf32> -> vector<16x128xf32>
    %19 = vector.broadcast %17 : vector<16x1xf32> to vector<16x128xf32>
    %20 = arith.addf %19, %18 : vector<16x128xf32>
    %cst_15 = arith.constant 1.600000e+01 : f32
    %21 = vector.broadcast %cst_15 : f32 to vector<16x128xf32>
    %22 = arith.cmpf ole, %20, %21 : vector<16x128xf32>
    %cst_16 = arith.constant dense<0x7F800000> : vector<16xf32>
    %23 = vector.multi_reduction <minimumf>, %20, %cst_16 [1] : vector<16x128xf32> to vector<16xf32>
    %24 = vector.shape_cast %23 : vector<16xf32> to vector<16x1xf32>
    %cst_17 = arith.constant 1.600000e+01 : f32
    %25 = vector.broadcast %cst_17 : f32 to vector<16x1xf32>
    %26 = arith.cmpf ogt, %24, %25 : vector<16x1xf32>
    %27 = tpu.iota {dimensions = array<i32: 1>} : vector<16x128xi32>
    %c0_i32 = arith.constant 0 : i32
    %28 = vector.broadcast %c0_i32 : i32 to vector<16x128xi32>
    %29 = arith.cmpi eq, %27, %28 : vector<16x128xi32>
    %30 = vector.broadcast %26 : vector<16x1xi1> to vector<16x128xi1>
    %31 = arith.andi %29, %30 : vector<16x128xi1>
    %32 = arith.ori %22, %31 : vector<16x128xi1>
    %33 = arith.truncf %1 : vector<128x4xf32> to vector<128x4xbf16>
    %34 = arith.truncf %0 : vector<16x3xf32> to vector<16x3xbf16>
    %cst_18 = arith.constant dense<0.000000e+00> : vector<8x128xf32>
    %35 = tpu.matmul %2, %33, %cst_18 {dimension_numbers = #tpu.dot_dimension_numbers<[0], [1], [1], [0], [0, 1, 1, 0], [], []>} : vector<4x8xbf16>, vector<128x4xbf16>, vector<8x128xf32> -> vector<8x128xf32>
    %36 = vector.broadcast %3 : vector<8x1xf32> to vector<8x128xf32>
    %37 = arith.addf %35, %36 : vector<8x128xf32>
    %cst_19 = arith.constant 0.000000e+00 : bf16
    %38 = vector.broadcast %cst_19 : bf16 to vector<16x1xbf16>
    %39 = tpu.concatenate %34, %38 in 1 : vector<16x3xbf16>, vector<16x1xbf16> -> vector<16x4xbf16>
    %cst_20 = arith.constant dense<0.000000e+00> : vector<16x8xf32>
    %40 = tpu.matmul %39, %2, %cst_20 {dimension_numbers = #tpu.dot_dimension_numbers<[1], [0], [0], [1], [0, 0, 1, 1], [], []>} : vector<16x4xbf16>, vector<4x8xbf16>, vector<16x8xf32> -> vector<16x8xf32>
    %41 = vector.shape_cast %37 : vector<8x128xf32> to vector<1x8x128xf32>
    %42 = vector.shape_cast %40 : vector<16x8xf32> to vector<16x8x1xf32>
    %43 = vector.broadcast %41 : vector<1x8x128xf32> to vector<16x8x128xf32>
    %44 = vector.broadcast %42 : vector<16x8x1xf32> to vector<16x8x128xf32>
    %45 = arith.subf %43, %44 : vector<16x8x128xf32>
    %cst_21 = arith.constant 0.000000e+00 : f32
    %46 = vector.broadcast %cst_21 : f32 to vector<16x8x128xf32>
    %47 = arith.maximumf %45, %46 : vector<16x8x128xf32>
    %48 = vector.shape_cast %4 : vector<16x8xbf16> to vector<1x16x8xbf16>
    %49 = vector.shape_cast %48 : vector<1x16x8xbf16> to vector<1x16x8xbf16>
    %50 = vector.broadcast %49 : vector<1x16x8xbf16> to vector<16x16x8xbf16>
    %51 = arith.truncf %47 : vector<16x8x128xf32> to vector<16x8x128xbf16>
    %cst_22 = arith.constant dense<0.000000e+00> : vector<16x16x128xf32>
    %52 = tpu.matmul %50, %51, %cst_22 {dimension_numbers = #tpu.dot_dimension_numbers<[2], [1], [1], [2], [0, 0, 0, 1, 1, 2], [0], [0]>} : vector<16x16x8xbf16>, vector<16x8x128xbf16>, vector<16x16x128xf32> -> vector<16x16x128xf32>
    %53 = vector.shape_cast %5 : vector<16x1xf32> to vector<1x16x1xf32>
    %54 = vector.broadcast %53 : vector<1x16x1xf32> to vector<16x16x128xf32>
    %55 = arith.addf %52, %54 : vector<16x16x128xf32>
    %cst_23 = arith.constant 0.000000e+00 : f32
    %56 = vector.broadcast %cst_23 : f32 to vector<16x16x128xf32>
    %57 = arith.maximumf %55, %56 : vector<16x16x128xf32>
    %58 = vector.shape_cast %32 : vector<16x128xi1> to vector<16x1x128xi1>
    %cst_24 = arith.constant -1.000000e+30 : f32
    %59 = vector.shape_cast %58 : vector<16x1x128xi1> to vector<16x1x128xi1>
    %60 = vector.broadcast %59 : vector<16x1x128xi1> to vector<16x16x128xi1>
    %61 = vector.broadcast %cst_24 : f32 to vector<16x16x128xf32>
    %62 = arith.select %60, %57, %61 : vector<16x16x128xi1>, vector<16x16x128xf32>
    %cst_25 = arith.constant dense<0xFF800000> : vector<16x16xf32>
    %63 = vector.multi_reduction <maximumf>, %62, %cst_25 [2] : vector<16x16x128xf32> to vector<16x16xf32>
    %64 = tpu.transpose %63, [1, 0] : vector<16x16xf32> -> vector<16x16xf32>
    %c0_26 = arith.constant 0 : index
    %c0_27 = arith.constant 0 : index
    %65 = vector.load %arg7[%c0_26, %c0_27] : memref<128x11xf32, #tpu.memory_space<vmem>>, vector<128x11xf32>
    %c0_28 = arith.constant 0 : index
    %c0_29 = arith.constant 0 : index
    %66 = vector.load %arg8[%c0_28, %c0_29] : memref<11x16xbf16, #tpu.memory_space<vmem>>, vector<11x16xbf16>
    %c0_30 = arith.constant 0 : index
    %c0_31 = arith.constant 0 : index
    %67 = vector.load %arg9[%c0_30, %c0_31] : memref<16x1xf32, #tpu.memory_space<vmem>>, vector<16x1xf32>
    %c0_32 = arith.constant 0 : index
    %c0_33 = arith.constant 0 : index
    %68 = vector.load %arg10[%c0_32, %c0_33] : memref<16x16xbf16, #tpu.memory_space<vmem>>, vector<16x16xbf16>
    %c0_34 = arith.constant 0 : index
    %c0_35 = arith.constant 0 : index
    %69 = vector.load %arg11[%c0_34, %c0_35] : memref<16x1xf32, #tpu.memory_space<vmem>>, vector<16x1xf32>
    %70 = vector.extract_strided_slice %65 {offsets = [0, 0], sizes = [128, 3], strides = [1, 1]} : vector<128x11xf32> to vector<128x3xf32>
    %cst_36 = arith.constant -2.000000e+00 : f32
    %71 = vector.broadcast %cst_36 : f32 to vector<16x3xf32>
    %72 = arith.mulf %71, %0 : vector<16x3xf32>
    %cst_37 = arith.constant 1.000000e+00 : f32
    %73 = vector.broadcast %cst_37 : f32 to vector<16x1xf32>
    %74 = tpu.concatenate %72, %73 in 1 : vector<16x3xf32>, vector<16x1xf32> -> vector<16x4xf32>
    %75 = arith.mulf %70, %70 : vector<128x3xf32>
    %cst_38 = arith.constant dense<0.000000e+00> : vector<128xf32>
    %76 = vector.multi_reduction <add>, %75, %cst_38 [1] : vector<128x3xf32> to vector<128xf32>
    %77 = vector.shape_cast %76 : vector<128xf32> to vector<128x1xf32>
    %78 = tpu.concatenate %70, %77 in 1 : vector<128x3xf32>, vector<128x1xf32> -> vector<128x4xf32>
    %79 = arith.mulf %0, %0 : vector<16x3xf32>
    %cst_39 = arith.constant dense<0.000000e+00> : vector<16xf32>
    %80 = vector.multi_reduction <add>, %79, %cst_39 [1] : vector<16x3xf32> to vector<16xf32>
    %81 = vector.shape_cast %80 : vector<16xf32> to vector<16x1xf32>
    %cst_40 = arith.constant dense<0.000000e+00> : vector<16x128xf32>
    %82 = tpu.matmul %74, %78, %cst_40 {dimension_numbers = #tpu.dot_dimension_numbers<[1], [1], [0], [0], [0, 0, 1, 0], [], []>} : vector<16x4xf32>, vector<128x4xf32>, vector<16x128xf32> -> vector<16x128xf32>
    %83 = vector.broadcast %81 : vector<16x1xf32> to vector<16x128xf32>
    %84 = arith.addf %83, %82 : vector<16x128xf32>
    %cst_41 = arith.constant 6.400000e+01 : f32
    %85 = vector.broadcast %cst_41 : f32 to vector<16x128xf32>
    %86 = arith.cmpf ole, %84, %85 : vector<16x128xf32>
    %cst_42 = arith.constant dense<0x7F800000> : vector<16xf32>
    %87 = vector.multi_reduction <minimumf>, %84, %cst_42 [1] : vector<16x128xf32> to vector<16xf32>
    %88 = vector.shape_cast %87 : vector<16xf32> to vector<16x1xf32>
    %cst_43 = arith.constant 6.400000e+01 : f32
    %89 = vector.broadcast %cst_43 : f32 to vector<16x1xf32>
    %90 = arith.cmpf ogt, %88, %89 : vector<16x1xf32>
    %91 = tpu.iota {dimensions = array<i32: 1>} : vector<16x128xi32>
    %c0_i32_44 = arith.constant 0 : i32
    %92 = vector.broadcast %c0_i32_44 : i32 to vector<16x128xi32>
    %93 = arith.cmpi eq, %91, %92 : vector<16x128xi32>
    %94 = vector.broadcast %90 : vector<16x1xi1> to vector<16x128xi1>
    %95 = arith.andi %93, %94 : vector<16x128xi1>
    %96 = arith.ori %86, %95 : vector<16x128xi1>
    %97 = arith.truncf %65 : vector<128x11xf32> to vector<128x11xbf16>
    %98 = arith.truncf %0 : vector<16x3xf32> to vector<16x3xbf16>
    %cst_45 = arith.constant dense<0.000000e+00> : vector<16x128xf32>
    %99 = tpu.matmul %66, %97, %cst_45 {dimension_numbers = #tpu.dot_dimension_numbers<[0], [1], [1], [0], [0, 1, 1, 0], [], []>} : vector<11x16xbf16>, vector<128x11xbf16>, vector<16x128xf32> -> vector<16x128xf32>
    %100 = vector.broadcast %67 : vector<16x1xf32> to vector<16x128xf32>
    %101 = arith.addf %99, %100 : vector<16x128xf32>
    %cst_46 = arith.constant 0.000000e+00 : bf16
    %102 = vector.broadcast %cst_46 : bf16 to vector<16x8xbf16>
    %103 = tpu.concatenate %98, %102 in 1 : vector<16x3xbf16>, vector<16x8xbf16> -> vector<16x11xbf16>
    %cst_47 = arith.constant dense<0.000000e+00> : vector<16x16xf32>
    %104 = tpu.matmul %103, %66, %cst_47 {dimension_numbers = #tpu.dot_dimension_numbers<[1], [0], [0], [1], [0, 0, 1, 1], [], []>} : vector<16x11xbf16>, vector<11x16xbf16>, vector<16x16xf32> -> vector<16x16xf32>
    %105 = vector.shape_cast %101 : vector<16x128xf32> to vector<1x16x128xf32>
    %106 = vector.shape_cast %104 : vector<16x16xf32> to vector<16x16x1xf32>
    %107 = vector.broadcast %105 : vector<1x16x128xf32> to vector<16x16x128xf32>
    %108 = vector.broadcast %106 : vector<16x16x1xf32> to vector<16x16x128xf32>
    %109 = arith.subf %107, %108 : vector<16x16x128xf32>
    %cst_48 = arith.constant 0.000000e+00 : f32
    %110 = vector.broadcast %cst_48 : f32 to vector<16x16x128xf32>
    %111 = arith.maximumf %109, %110 : vector<16x16x128xf32>
    %112 = vector.shape_cast %68 : vector<16x16xbf16> to vector<1x16x16xbf16>
    %113 = vector.shape_cast %112 : vector<1x16x16xbf16> to vector<1x16x16xbf16>
    %114 = vector.broadcast %113 : vector<1x16x16xbf16> to vector<16x16x16xbf16>
    %115 = arith.truncf %111 : vector<16x16x128xf32> to vector<16x16x128xbf16>
    %cst_49 = arith.constant dense<0.000000e+00> : vector<16x16x128xf32>
    %116 = tpu.matmul %114, %115, %cst_49 {dimension_numbers = #tpu.dot_dimension_numbers<[2], [1], [1], [2], [0, 0, 0, 1, 1, 2], [0], [0]>} : vector<16x16x16xbf16>, vector<16x16x128xbf16>, vector<16x16x128xf32> -> vector<16x16x128xf32>
    %117 = vector.shape_cast %69 : vector<16x1xf32> to vector<1x16x1xf32>
    %118 = vector.broadcast %117 : vector<1x16x1xf32> to vector<16x16x128xf32>
    %119 = arith.addf %116, %118 : vector<16x16x128xf32>
    %cst_50 = arith.constant 0.000000e+00 : f32
    %120 = vector.broadcast %cst_50 : f32 to vector<16x16x128xf32>
    %121 = arith.maximumf %119, %120 : vector<16x16x128xf32>
    %122 = vector.shape_cast %96 : vector<16x128xi1> to vector<16x1x128xi1>
    %cst_51 = arith.constant -1.000000e+30 : f32
    %123 = vector.shape_cast %122 : vector<16x1x128xi1> to vector<16x1x128xi1>
    %124 = vector.broadcast %123 : vector<16x1x128xi1> to vector<16x16x128xi1>
    %125 = vector.broadcast %cst_51 : f32 to vector<16x16x128xf32>
    %126 = arith.select %124, %121, %125 : vector<16x16x128xi1>, vector<16x16x128xf32>
    %cst_52 = arith.constant dense<0xFF800000> : vector<16x16xf32>
    %127 = vector.multi_reduction <maximumf>, %126, %cst_52 [2] : vector<16x16x128xf32> to vector<16x16xf32>
    %128 = tpu.transpose %127, [1, 0] : vector<16x16xf32> -> vector<16x16xf32>
    %129 = vector.extract_strided_slice %0 {offsets = [0, 0], sizes = [16, 2], strides = [1, 1]} : vector<16x3xf32> to vector<16x2xf32>
    %c0_53 = arith.constant 0 : index
    %c0_54 = arith.constant 0 : index
    %130 = vector.load %arg12[%c0_53, %c0_54] : memref<16x256xbf16, #tpu.memory_space<vmem>>, vector<16x256xbf16>
    %131 = vector.extract_strided_slice %129 {offsets = [0, 0], sizes = [16, 1], strides = [1, 1]} : vector<16x2xf32> to vector<16x1xf32>
    %cst_55 = arith.constant 0.000000e+00 : f32
    %132 = vector.broadcast %cst_55 : f32 to vector<16x1xf32>
    %133 = arith.subf %131, %132 : vector<16x1xf32>
    %cst_56 = arith.constant 2.000000e+00 : f32
    %134 = vector.broadcast %cst_56 : f32 to vector<16x1xf32>
    %135 = arith.divf %133, %134 : vector<16x1xf32>
    %136 = vector.extract_strided_slice %129 {offsets = [0, 1], sizes = [16, 1], strides = [1, 1]} : vector<16x2xf32> to vector<16x1xf32>
    %cst_57 = arith.constant 0.000000e+00 : f32
    %137 = vector.broadcast %cst_57 : f32 to vector<16x1xf32>
    %138 = arith.subf %136, %137 : vector<16x1xf32>
    %cst_58 = arith.constant 2.000000e+00 : f32
    %139 = vector.broadcast %cst_58 : f32 to vector<16x1xf32>
    %140 = arith.divf %138, %139 : vector<16x1xf32>
    %cst_59 = arith.constant 0.000000e+00 : f32
    %cst_60 = arith.constant 1.500000e+01 : f32
    %141 = vector.broadcast %cst_59 : f32 to vector<16x1xf32>
    %142 = arith.maximumf %141, %135 : vector<16x1xf32>
    %143 = vector.broadcast %cst_60 : f32 to vector<16x1xf32>
    %144 = arith.minimumf %143, %142 : vector<16x1xf32>
    %cst_61 = arith.constant 0.000000e+00 : f32
    %cst_62 = arith.constant 1.500000e+01 : f32
    %145 = vector.broadcast %cst_61 : f32 to vector<16x1xf32>
    %146 = arith.maximumf %145, %140 : vector<16x1xf32>
    %147 = vector.broadcast %cst_62 : f32 to vector<16x1xf32>
    %148 = arith.minimumf %147, %146 : vector<16x1xf32>
    %cst_63 = arith.constant 1.400000e+01 : f32
    %149 = vector.broadcast %cst_63 : f32 to vector<16x1xf32>
    %150 = arith.divf %144, %149 : vector<16x1xf32>
    %cst_64 = arith.constant 2.000000e+00 : f32
    %151 = vector.broadcast %cst_64 : f32 to vector<16x1xf32>
    %152 = arith.mulf %151, %150 : vector<16x1xf32>
    %cst_65 = arith.constant 1.000000e+00 : f32
    %153 = vector.broadcast %cst_65 : f32 to vector<16x1xf32>
    %154 = arith.subf %152, %153 : vector<16x1xf32>
    %cst_66 = arith.constant 1.400000e+01 : f32
    %155 = vector.broadcast %cst_66 : f32 to vector<16x1xf32>
    %156 = arith.divf %148, %155 : vector<16x1xf32>
    %cst_67 = arith.constant 2.000000e+00 : f32
    %157 = vector.broadcast %cst_67 : f32 to vector<16x1xf32>
    %158 = arith.mulf %157, %156 : vector<16x1xf32>
    %cst_68 = arith.constant 1.000000e+00 : f32
    %159 = vector.broadcast %cst_68 : f32 to vector<16x1xf32>
    %160 = arith.subf %158, %159 : vector<16x1xf32>
    %cst_69 = arith.constant 1.000000e+00 : f32
    %161 = vector.broadcast %cst_69 : f32 to vector<16x1xf32>
    %162 = arith.addf %154, %161 : vector<16x1xf32>
    %cst_70 = arith.constant 1.600000e+01 : f32
    %163 = vector.broadcast %cst_70 : f32 to vector<16x1xf32>
    %164 = arith.mulf %162, %163 : vector<16x1xf32>
    %cst_71 = arith.constant 1.000000e+00 : f32
    %165 = vector.broadcast %cst_71 : f32 to vector<16x1xf32>
    %166 = arith.subf %164, %165 : vector<16x1xf32>
    %cst_72 = arith.constant 5.000000e-01 : f32
    %167 = vector.broadcast %cst_72 : f32 to vector<16x1xf32>
    %168 = arith.mulf %166, %167 : vector<16x1xf32>
    %cst_73 = arith.constant 1.000000e+00 : f32
    %169 = vector.broadcast %cst_73 : f32 to vector<16x1xf32>
    %170 = arith.addf %160, %169 : vector<16x1xf32>
    %cst_74 = arith.constant 1.600000e+01 : f32
    %171 = vector.broadcast %cst_74 : f32 to vector<16x1xf32>
    %172 = arith.mulf %170, %171 : vector<16x1xf32>
    %cst_75 = arith.constant 1.000000e+00 : f32
    %173 = vector.broadcast %cst_75 : f32 to vector<16x1xf32>
    %174 = arith.subf %172, %173 : vector<16x1xf32>
    %cst_76 = arith.constant 5.000000e-01 : f32
    %175 = vector.broadcast %cst_76 : f32 to vector<16x1xf32>
    %176 = arith.mulf %174, %175 : vector<16x1xf32>
    %177 = math.floor %168 : vector<16x1xf32>
    %178 = math.floor %176 : vector<16x1xf32>
    %179 = arith.subf %168, %177 : vector<16x1xf32>
    %cst_77 = arith.constant 1.000000e+00 : f32
    %180 = vector.broadcast %cst_77 : f32 to vector<16x1xf32>
    %181 = arith.subf %180, %179 : vector<16x1xf32>
    %182 = arith.subf %176, %178 : vector<16x1xf32>
    %cst_78 = arith.constant 1.000000e+00 : f32
    %183 = vector.broadcast %cst_78 : f32 to vector<16x1xf32>
    %184 = arith.subf %183, %182 : vector<16x1xf32>
    %185 = arith.fptosi %177 : vector<16x1xf32> to vector<16x1xi32>
    %c1_i32 = arith.constant 1 : i32
    %186 = vector.broadcast %c1_i32 : i32 to vector<16x1xi32>
    %187 = arith.addi %185, %186 : vector<16x1xi32>
    %188 = arith.fptosi %178 : vector<16x1xf32> to vector<16x1xi32>
    %c1_i32_79 = arith.constant 1 : i32
    %189 = vector.broadcast %c1_i32_79 : i32 to vector<16x1xi32>
    %190 = arith.addi %188, %189 : vector<16x1xi32>
    %191 = tpu.iota {dimensions = array<i32: 1>} : vector<16x256xi32>
    %192 = arith.mulf %184, %181 : vector<16x1xf32>
    %c0_i32_80 = arith.constant 0 : i32
    %193 = vector.broadcast %c0_i32_80 : i32 to vector<16x1xi32>
    %194 = arith.cmpi sge, %185, %193 : vector<16x1xi32>
    %c16_i32 = arith.constant 16 : i32
    %195 = vector.broadcast %c16_i32 : i32 to vector<16x1xi32>
    %196 = arith.cmpi slt, %185, %195 : vector<16x1xi32>
    %197 = arith.andi %194, %196 : vector<16x1xi1>
    %c0_i32_81 = arith.constant 0 : i32
    %198 = vector.broadcast %c0_i32_81 : i32 to vector<16x1xi32>
    %199 = arith.cmpi sge, %188, %198 : vector<16x1xi32>
    %200 = arith.andi %197, %199 : vector<16x1xi1>
    %c16_i32_82 = arith.constant 16 : i32
    %201 = vector.broadcast %c16_i32_82 : i32 to vector<16x1xi32>
    %202 = arith.cmpi slt, %188, %201 : vector<16x1xi32>
    %203 = arith.andi %200, %202 : vector<16x1xi1>
    %c16_i32_83 = arith.constant 16 : i32
    %204 = vector.broadcast %c16_i32_83 : i32 to vector<16x1xi32>
    %205 = arith.muli %188, %204 : vector<16x1xi32>
    %206 = arith.addi %205, %185 : vector<16x1xi32>
    %207 = vector.broadcast %206 : vector<16x1xi32> to vector<16x256xi32>
    %208 = arith.cmpi eq, %191, %207 : vector<16x256xi32>
    %209 = vector.broadcast %203 : vector<16x1xi1> to vector<16x256xi1>
    %210 = arith.andi %208, %209 : vector<16x256xi1>
    %cst_84 = arith.constant 0.000000e+00 : f32
    %211 = vector.shape_cast %192 : vector<16x1xf32> to vector<16x1xf32>
    %212 = vector.broadcast %211 : vector<16x1xf32> to vector<16x256xf32>
    %213 = vector.broadcast %cst_84 : f32 to vector<16x256xf32>
    %214 = arith.select %210, %212, %213 : vector<16x256xi1>, vector<16x256xf32>
    %215 = arith.mulf %184, %179 : vector<16x1xf32>
    %c0_i32_85 = arith.constant 0 : i32
    %216 = vector.broadcast %c0_i32_85 : i32 to vector<16x1xi32>
    %217 = arith.cmpi sge, %187, %216 : vector<16x1xi32>
    %c16_i32_86 = arith.constant 16 : i32
    %218 = vector.broadcast %c16_i32_86 : i32 to vector<16x1xi32>
    %219 = arith.cmpi slt, %187, %218 : vector<16x1xi32>
    %220 = arith.andi %217, %219 : vector<16x1xi1>
    %c0_i32_87 = arith.constant 0 : i32
    %221 = vector.broadcast %c0_i32_87 : i32 to vector<16x1xi32>
    %222 = arith.cmpi sge, %188, %221 : vector<16x1xi32>
    %223 = arith.andi %220, %222 : vector<16x1xi1>
    %c16_i32_88 = arith.constant 16 : i32
    %224 = vector.broadcast %c16_i32_88 : i32 to vector<16x1xi32>
    %225 = arith.cmpi slt, %188, %224 : vector<16x1xi32>
    %226 = arith.andi %223, %225 : vector<16x1xi1>
    %c16_i32_89 = arith.constant 16 : i32
    %227 = vector.broadcast %c16_i32_89 : i32 to vector<16x1xi32>
    %228 = arith.muli %188, %227 : vector<16x1xi32>
    %229 = arith.addi %228, %187 : vector<16x1xi32>
    %230 = vector.broadcast %229 : vector<16x1xi32> to vector<16x256xi32>
    %231 = arith.cmpi eq, %191, %230 : vector<16x256xi32>
    %232 = vector.broadcast %226 : vector<16x1xi1> to vector<16x256xi1>
    %233 = arith.andi %231, %232 : vector<16x256xi1>
    %cst_90 = arith.constant 0.000000e+00 : f32
    %234 = vector.shape_cast %215 : vector<16x1xf32> to vector<16x1xf32>
    %235 = vector.broadcast %234 : vector<16x1xf32> to vector<16x256xf32>
    %236 = vector.broadcast %cst_90 : f32 to vector<16x256xf32>
    %237 = arith.select %233, %235, %236 : vector<16x256xi1>, vector<16x256xf32>
    %238 = arith.addf %214, %237 : vector<16x256xf32>
    %239 = arith.mulf %182, %181 : vector<16x1xf32>
    %c0_i32_91 = arith.constant 0 : i32
    %240 = vector.broadcast %c0_i32_91 : i32 to vector<16x1xi32>
    %241 = arith.cmpi sge, %185, %240 : vector<16x1xi32>
    %c16_i32_92 = arith.constant 16 : i32
    %242 = vector.broadcast %c16_i32_92 : i32 to vector<16x1xi32>
    %243 = arith.cmpi slt, %185, %242 : vector<16x1xi32>
    %244 = arith.andi %241, %243 : vector<16x1xi1>
    %c0_i32_93 = arith.constant 0 : i32
    %245 = vector.broadcast %c0_i32_93 : i32 to vector<16x1xi32>
    %246 = arith.cmpi sge, %190, %245 : vector<16x1xi32>
    %247 = arith.andi %244, %246 : vector<16x1xi1>
    %c16_i32_94 = arith.constant 16 : i32
    %248 = vector.broadcast %c16_i32_94 : i32 to vector<16x1xi32>
    %249 = arith.cmpi slt, %190, %248 : vector<16x1xi32>
    %250 = arith.andi %247, %249 : vector<16x1xi1>
    %c16_i32_95 = arith.constant 16 : i32
    %251 = vector.broadcast %c16_i32_95 : i32 to vector<16x1xi32>
    %252 = arith.muli %190, %251 : vector<16x1xi32>
    %253 = arith.addi %252, %185 : vector<16x1xi32>
    %254 = vector.broadcast %253 : vector<16x1xi32> to vector<16x256xi32>
    %255 = arith.cmpi eq, %191, %254 : vector<16x256xi32>
    %256 = vector.broadcast %250 : vector<16x1xi1> to vector<16x256xi1>
    %257 = arith.andi %255, %256 : vector<16x256xi1>
    %cst_96 = arith.constant 0.000000e+00 : f32
    %258 = vector.shape_cast %239 : vector<16x1xf32> to vector<16x1xf32>
    %259 = vector.broadcast %258 : vector<16x1xf32> to vector<16x256xf32>
    %260 = vector.broadcast %cst_96 : f32 to vector<16x256xf32>
    %261 = arith.select %257, %259, %260 : vector<16x256xi1>, vector<16x256xf32>
    %262 = arith.addf %238, %261 : vector<16x256xf32>
    %263 = arith.mulf %182, %179 : vector<16x1xf32>
    %c0_i32_97 = arith.constant 0 : i32
    %264 = vector.broadcast %c0_i32_97 : i32 to vector<16x1xi32>
    %265 = arith.cmpi sge, %187, %264 : vector<16x1xi32>
    %c16_i32_98 = arith.constant 16 : i32
    %266 = vector.broadcast %c16_i32_98 : i32 to vector<16x1xi32>
    %267 = arith.cmpi slt, %187, %266 : vector<16x1xi32>
    %268 = arith.andi %265, %267 : vector<16x1xi1>
    %c0_i32_99 = arith.constant 0 : i32
    %269 = vector.broadcast %c0_i32_99 : i32 to vector<16x1xi32>
    %270 = arith.cmpi sge, %190, %269 : vector<16x1xi32>
    %271 = arith.andi %268, %270 : vector<16x1xi1>
    %c16_i32_100 = arith.constant 16 : i32
    %272 = vector.broadcast %c16_i32_100 : i32 to vector<16x1xi32>
    %273 = arith.cmpi slt, %190, %272 : vector<16x1xi32>
    %274 = arith.andi %271, %273 : vector<16x1xi1>
    %c16_i32_101 = arith.constant 16 : i32
    %275 = vector.broadcast %c16_i32_101 : i32 to vector<16x1xi32>
    %276 = arith.muli %190, %275 : vector<16x1xi32>
    %277 = arith.addi %276, %187 : vector<16x1xi32>
    %278 = vector.broadcast %277 : vector<16x1xi32> to vector<16x256xi32>
    %279 = arith.cmpi eq, %191, %278 : vector<16x256xi32>
    %280 = vector.broadcast %274 : vector<16x1xi1> to vector<16x256xi1>
    %281 = arith.andi %279, %280 : vector<16x256xi1>
    %cst_102 = arith.constant 0.000000e+00 : f32
    %282 = vector.shape_cast %263 : vector<16x1xf32> to vector<16x1xf32>
    %283 = vector.broadcast %282 : vector<16x1xf32> to vector<16x256xf32>
    %284 = vector.broadcast %cst_102 : f32 to vector<16x256xf32>
    %285 = arith.select %281, %283, %284 : vector<16x256xi1>, vector<16x256xf32>
    %286 = arith.addf %262, %285 : vector<16x256xf32>
    %287 = arith.truncf %286 : vector<16x256xf32> to vector<16x256xbf16>
    %cst_103 = arith.constant dense<0.000000e+00> : vector<16x16xf32>
    %288 = tpu.matmul %130, %287, %cst_103 {dimension_numbers = #tpu.dot_dimension_numbers<[1], [1], [0], [0], [0, 0, 1, 0], [], []>} : vector<16x256xbf16>, vector<16x256xbf16>, vector<16x16xf32> -> vector<16x16xf32>
    %289 = tpu.concatenate %64, %128, %288 in 0 : vector<16x16xf32>, vector<16x16xf32>, vector<16x16xf32> -> vector<48x16xf32>
    %cst_104 = arith.constant 0.000000e+00 : f32
    %290 = vector.broadcast %cst_104 : f32 to vector<48x112xf32>
    %291 = tpu.concatenate %289, %290 in 1 : vector<48x16xf32>, vector<48x112xf32> -> vector<48x128xf32>
    %292 = vector.shape_cast %291 : vector<48x128xf32> to vector<1x48x128xf32>
    %c0_105 = arith.constant 0 : index
    %c0_106 = arith.constant 0 : index
    %c0_107 = arith.constant 0 : index
    %293 = vector.load %arg13[%c0_105, %c0_106, %c0_107] : memref<1x48x128xf32, #tpu.memory_space<vmem>>, vector<1x48x128xf32>
    tpu.vector_store %arg13[%c0_105, %c0_106, %c0_107], %292 {strides = array<i32>} : memref<1x48x128xf32, #tpu.memory_space<vmem>>, vector<1x48x128xf32>,
    return
  }
  func.func @transform_0(%arg0: i32) -> (i32, i32) {
    %c0_i32 = arith.constant 0 : i32
    %c0_i32_0 = arith.constant 0 : i32
    return %arg0, %c0_i32 : i32, i32
  }
  func.func @transform_1(%arg0: i32) -> (i32, i32) {
    %c0_i32 = arith.constant 0 : i32
    %c0_i32_0 = arith.constant 0 : i32
    %c0_i32_1 = arith.constant 0 : i32
    return %c0_i32, %c0_i32_0 : i32, i32
  }
  func.func @transform_2(%arg0: i32) -> (i32, i32) {
    %c0_i32 = arith.constant 0 : i32
    %c0_i32_0 = arith.constant 0 : i32
    %c0_i32_1 = arith.constant 0 : i32
    return %c0_i32, %c0_i32_0 : i32, i32
  }
  func.func @transform_3(%arg0: i32) -> (i32, i32) {
    %c0_i32 = arith.constant 0 : i32
    %c0_i32_0 = arith.constant 0 : i32
    %c0_i32_1 = arith.constant 0 : i32
    return %c0_i32, %c0_i32_0 : i32, i32
  }
  func.func @transform_4(%arg0: i32) -> (i32, i32) {
    %c0_i32 = arith.constant 0 : i32
    %c0_i32_0 = arith.constant 0 : i32
    %c0_i32_1 = arith.constant 0 : i32
    return %c0_i32, %c0_i32_0 : i32, i32
  }
  func.func @transform_5(%arg0: i32) -> (i32, i32) {
    %c0_i32 = arith.constant 0 : i32
    %c0_i32_0 = arith.constant 0 : i32
    %c0_i32_1 = arith.constant 0 : i32
    return %c0_i32, %c0_i32_0 : i32, i32
  }
  func.func @transform_6(%arg0: i32) -> (i32, i32) {
    %c0_i32 = arith.constant 0 : i32
    %c0_i32_0 = arith.constant 0 : i32
    %c0_i32_1 = arith.constant 0 : i32
    return %c0_i32, %c0_i32_0 : i32, i32
  }
  func.func @transform_7(%arg0: i32) -> (i32, i32) {
    %c0_i32 = arith.constant 0 : i32
    %c0_i32_0 = arith.constant 0 : i32
    %c0_i32_1 = arith.constant 0 : i32
    return %c0_i32, %c0_i32_0 : i32, i32
  }
  func.func @transform_8(%arg0: i32) -> (i32, i32) {
    %c0_i32 = arith.constant 0 : i32
    %c0_i32_0 = arith.constant 0 : i32
    %c0_i32_1 = arith.constant 0 : i32
    return %c0_i32, %c0_i32_0 : i32, i32
  }
  func.func @transform_9(%arg0: i32) -> (i32, i32) {
    %c0_i32 = arith.constant 0 : i32
    %c0_i32_0 = arith.constant 0 : i32
    %c0_i32_1 = arith.constant 0 : i32
    return %c0_i32, %c0_i32_0 : i32, i32
  }
  func.func @transform_10(%arg0: i32) -> (i32, i32) {
    %c0_i32 = arith.constant 0 : i32
    %c0_i32_0 = arith.constant 0 : i32
    %c0_i32_1 = arith.constant 0 : i32
    return %c0_i32, %c0_i32_0 : i32, i32
  }
  func.func @transform_11(%arg0: i32) -> (i32, i32) {
    %c0_i32 = arith.constant 0 : i32
    %c0_i32_0 = arith.constant 0 : i32
    %c0_i32_1 = arith.constant 0 : i32
    return %c0_i32, %c0_i32_0 : i32, i32
  }
  func.func @transform_12(%arg0: i32) -> (i32, i32, i32) {
    %c0_i32 = arith.constant 0 : i32
    %c0_i32_0 = arith.constant 0 : i32
    %c0_i32_1 = arith.constant 0 : i32
    return %arg0, %c0_i32, %c0_i32_0 : i32, i32, i32
  }
}

</mosaic_0001>

<bundles_post_ra>
// kernel: pv_rcnn_forward.1
= control target key start
LH: loop header
LB: loop body
LE: loop exit
PB: predicated region body
PF: predicated region fallthrough
CT: control target
= control target key end

     0   :  { %s5267_s21 = smov 0   ;;  %s7646_s0 = inlined_call_operand.vmem [shape: f32[32,3], index: 0, kind: input, shape index: {}]   ;;  %s7647_s1 = inlined_call_operand.vmem [shape: f32[128,4], index: 1, kind: input, shape index: {}]   ;;  %s7648_s2 = inlined_call_operand.vmem [shape: bf16[4,8], index: 2, kind: input, shape index: {}]   ;;  %s7649_s3 = inlined_call_operand.vmem [shape: f32[8,1], index: 3, kind: input, shape index: {}]   ;;  %s7650_s4 = inlined_call_operand.vmem [shape: bf16[16,8], index: 4, kind: input, shape index: {}]   ;;  %s7651_s5 = inlined_call_operand.vmem [shape: f32[16,1], index: 5, kind: input, shape index: {}]   ;;  %s7652_s6 = inlined_call_operand.vmem [shape: f32[128,11], index: 6, kind: input, shape index: {}]   ;;  %s7653_s7 = inlined_call_operand.vmem [shape: bf16[11,16], index: 7, kind: input, shape index: {}]   ;;  %s7654_s8 = inlined_call_operand.vmem [shape: f32[16,1], index: 8, kind: input, shape index: {}]   ;;  %s7655_s9 = inlined_call_operand.vmem [shape: bf16[16,16], index: 9, kind: input, shape index: {}]   ;;  %s7656_s10 = inlined_call_operand.vmem [shape: f32[16,1], index: 10, kind: input, shape index: {}]   ;;  %s7657_s11 = inlined_call_operand.vmem [shape: bf16[16,256], index: 11, kind: input, shape index: {}]   ;;  %s7658_s12 = inlined_call_operand.vmem [shape: f32[2,48,128], index: 12, kind: output, shape index: {}]  }
   0x1 LB: > { %s5273_s22 = sadd.s32 4294967295, %s5192_s21   ;;  %p4615_p0 = scmp.ge.s32.totalorder %s5192_s21, 1  ;;  %s5192_s21 = sphi %s5267_s21, %s22_s21  }
   0x2   : > { %p363_p1 = scmp.lt.s32.totalorder %s5192_s21, 3 }
   0x4   : > { %p364_p2 = pnand %p4615_p0, %p363_p1 }
   0x6   : > { %367 = sbr.rel (%p364_p2) target bundleno = 1696 (0x6a0), region = 68 }
   0xb   : > { %v5280_v0 = vld [vmem:[%s7647_s1 + $0x78] sm:$0xff]  ;;  %vm7667_vm0 = vcmask 23552   ;;  %v5285_v1 = vld [vmem:[%s7647_s1 + $0x70] sm:$0xff]  ;;  %v5290_v2 = vld [vmem:[%s7647_s1 + $0x68] sm:$0xff]  ;;  %s4616_s23 = sshll.u32 %s5273_s22, 1  ;;  %vm534_vm1 = vcmask 31744  }
   0xc   : > { %v461_v3 = vmul.f32 %v5280_v0, %v5280_v0  ;;  %v460_v4 = vmul.f32 %v5285_v1, %v5285_v1  ;;  %v459_v5 = vmul.f32 %v5290_v2, %v5290_v2  ;;  %v5301_v6 = vld [vmem:[%s7647_s1 + $0x60] sm:$0xff]  ;;  %v5308_v8 = vld [vmem:[%s7647_s1 + $0x58] sm:$0xff]  ;;  %v5313_v9 = vld [vmem:[%s7647_s1 + $0x50] sm:$0xff]  ;;  %p406_p3 = scmp.lt.s32.totalorder %s4616_s23, 3  ;;  %v7660_v52 = vmov 0.0   ;;  %s5197_s18 = smov 127  }
   0xd   : > { %v458_v7 = vmul.f32 %v5301_v6, %v5301_v6  ;;  %v5320_v12 = vld [vmem:[%s7647_s1 + $0x48] sm:$0xff]  ;;  %v5325_v13 = vld [vmem:[%s7647_s1 + $0x40] sm:$0xff]  ;;  %v457_v16 = vmul.f32 %v5308_v8, %v5308_v8  ;;  %v456_v17 = vmul.f32 %v5313_v9, %v5313_v9  ;;  %v5342_v22 = vld [vmem:[%s7647_s1 + $0x38] sm:$0xff]  ;;  %4859 = vmatprep.subr.bf16.mxu1 %v7660_v52  ;;  %vm7668_vm2 = vmmov 0   ;;  %p411_p4 = scmp.lt.s32.totalorder %s5273_s22, 1 }
   0xe   : > { %v507_v10 = vsel %vm7667_vm0, %v461_v3, 0.0  ;;  %v501_v11 = vsel %vm7667_vm0, %v459_v5, 0.0  ;;  %v504_v14 = vsel %vm7667_vm0, %v460_v4, 0.0  ;;  %v455_v20 = vmul.f32 %v5320_v12, %v5320_v12  ;;  %v5347_v23 = vld [vmem:[%s7647_s1 + $0x30] sm:$0xff]  ;;  %v5358_v28 = vld [vmem:[%s7647_s1 + $0x28] sm:$0xff]  ;;  %v5363_v29 = vld [vmem:[%s7647_s1 + $0x20] sm:$0xff]  ;;  %4875 = vmatprep.mubr.msk.bf16.mxu1 %vm7668_vm2, %v7660_v52 }
   0xf   : > { %508 = vadd.xlane.f32.xlu0 %v507_v10  ;;  %502 = vadd.xlane.f32.xlu1 %v501_v11  ;;  %v498_v15 = vsel %vm7667_vm0, %v458_v7, 0.0  ;;  %v495_v18 = vsel %vm7667_vm0, %v457_v16, 0.0  ;;  %v492_v19 = vsel %vm7667_vm0, %v456_v17, 0.0  ;;  %v454_v21 = vmul.f32 %v5325_v13, %v5325_v13  ;;  %v5374_v34 = vld [vmem:[%s7647_s1 + $0x18] sm:$0xff]  ;;  %v5379_v35 = vld [vmem:[%s7647_s1 + $0x10] sm:$0xff]  ;;  %v5390_v40 = vld [vmem:[%s7647_s1 + $0x8] sm:$0xff] }
  0x10   : > { %v489_v24 = vsel %vm7667_vm0, %v455_v20, 0.0  ;;  %v453_v26 = vmul.f32 %v5342_v22, %v5342_v22  ;;  %v452_v27 = vmul.f32 %v5347_v23, %v5347_v23  ;;  %v451_v32 = vmul.f32 %v5358_v28, %v5358_v28  ;;  %v5395_v41 = vld [vmem:[%s7647_s1] sm:$0xff]  ;;  %s7887_s23 = smov (!%p406_p3, %s4616_s23), 3  ;;  %v5434_v54 = vld [vmem:[%s7652_s6 + $0x70] sm:$0xff]  ;;  %v5440_v56 = vld [vmem:[%s7652_s6 + $0x78] sm:$0xff]  ;;  %s7889_s22 = smov (!%p411_p4, %s5273_s22), 1 }
  0x11   : > { %v486_v25 = vsel %vm7667_vm0, %v454_v21, 0.0  ;;  %v450_v33 = vmul.f32 %v5363_v29, %v5363_v29  ;;  %v449_v38 = vmul.f32 %v5374_v34, %v5374_v34  ;;  %v448_v39 = vmul.f32 %v5379_v35, %v5379_v35  ;;  %s4617_s24 = sshll.u32 %s7887_s23, 3  ;;  %v5423_v51 = vld [vmem:[%s7648_s2] sm:$0x3]  ;;  %v5450_v58 = vld [vmem:[%s7652_s6 + $0x68] sm:$0xff]  ;;  %v5464_v63 = vld [vmem:[%s7652_s6 + $0x58] sm:$0xff] }
  0x12   : > { %v483_v30 = vsel %vm7667_vm0, %v453_v26, 0.0  ;;  %v480_v31 = vsel %vm7667_vm0, %v452_v27, 0.0  ;;  %v477_v36 = vsel %vm7667_vm0, %v451_v32, 0.0  ;;  %v447_v44 = vmul.f32 %v5390_v40, %v5390_v40  ;;  %s5409_s27 = scalar_lea.vmem %s7646_s0, %s4617_s24  ;;  %v5445_v57 = vld [vmem:[%s7652_s6 + $0x60] sm:$0xff]  ;;  %v5473_v7 = vld [vmem:[%s7652_s6 + $0x50] sm:$0xff]  ;;  %s5198_s23 = smov 1  }
  0x13   : > { %505 = vadd.xlane.f32.xlu0 %v504_v14  ;;  %499 = vadd.xlane.f32.xlu1 %v498_v15  ;;  %v474_v37 = vsel %vm7667_vm0, %v450_v33, 0.0  ;;  %v471_v42 = vsel %vm7667_vm0, %v449_v38, 0.0  ;;  %v468_v43 = vsel %vm7667_vm0, %v448_v39, 0.0  ;;  %v446_v45 = vmul.f32 %v5395_v41, %v5395_v41  ;;  %v5412_v48 = vld [vmem:[%s5409_s27] sm:$0xff]  ;;  %v5528_v39 = vld [vmem:[%s7652_s6 + $0x28] sm:$0xff] }
  0x14   : > { %v465_v46 = vsel %vm7667_vm0, %v447_v44, 0.0  ;;  %v441_v49 = vmul.f32 -2.0, %v5412_v48  ;;  %v692_v53 = vpack.c.bf16 %v5280_v0, %v5285_v1  ;;  %v691_v59 = vpack.c.bf16 %v5290_v2, %v5301_v6  ;;  %v5482_v15 = vld [vmem:[%s7652_s6 + $0x40] sm:$0xff] }
  0x15   : > { %v462_v47 = vsel %vm7667_vm0, %v446_v45, 0.0  ;;  %v2327_v60 = vmul.f32 %v5434_v54, %v5434_v54  ;;  %v2328_v61 = vmul.f32 %v5440_v56, %v5440_v56  ;;  %v2325_v62 = vmul.f32 %v5445_v57, %v5445_v57 }
  0x16   : > { %v5416_v50 = vsel %vm7667_vm0, %v441_v49, 1.0  ;;  %v740_v55 = vsel %vm534_vm1, %v692_v53, 0  ;;  %v2326_v4 = vmul.f32 %v5450_v58, %v5450_v58  ;;  %v737_v10 = vsel %vm534_vm1, %v691_v59, 0 }
  0x17   : > { %496 = vadd.xlane.f32.xlu0 %v495_v18  ;;  %493 = vadd.xlane.f32.xlu1 %v492_v19  ;;  %v2371_v3 = vsel %vm7667_vm0, %v2327_v60, 0.0  ;;  %v2374_v5 = vsel %vm7667_vm0, %v2328_v61, 0.0  ;;  %v2365_v11 = vsel %vm7667_vm0, %v2325_v62, 0.0  ;;  %v2324_v14 = vmul.f32 %v5464_v63, %v5464_v63  ;;  %v5490_v18 = vld [vmem:[%s7652_s6 + $0x48] sm:$0xff]  ;;  %v436_v62 = vld [vmem:[%s7649_s3] sm:$0xff] }
  0x18   : > { %4856 = vmatprep.mubr.msk.f32.mxu0 %vm534_vm1, %v5416_v50  ;;  %4860 = vmatpush3.bf16.xpose.msra.mxu1 %v740_v55  ;;  %v2368_v16 = vsel %vm7667_vm0, %v2326_v4, 0.0  ;;  %v2323_v17 = vmul.f32 %v5473_v7, %v5473_v7  ;;  %v690_v19 = vpack.c.bf16 %v5308_v8, %v5313_v9  ;;  %v2321_v21 = vmul.f32 %v5482_v15, %v5482_v15 }
  0x19   : > { %4861 = vmatprep.subr.bf16.mxu1 %v7660_v52  ;;  %v2362_v20 = vsel %vm7667_vm0, %v2324_v14, 0.0  ;;  %v2322_v27 = vmul.f32 %v5490_v18, %v5490_v18  ;;  %v688_v55 = vpack.c.bf16 %v5342_v22, %v5347_v23  ;;  %v687_v60 = vpack.c.bf16 %v5358_v28, %v5363_v29 }
  0x1a   : > { %v2359_v26 = vsel %vm7667_vm0, %v2323_v17, 0.0  ;;  %v2353_v32 = vsel %vm7667_vm0, %v2321_v21, 0.0  ;;  %vm787_vm3 = vcmask 1041408   ;;  %vm1011_vm5 = vcmask 1043456  }
  0x1b   : > { %490 = vadd.xlane.f32.xlu0 %v489_v24  ;;  %487 = vadd.xlane.f32.xlu1 %v486_v25  ;;  %v5501_v24 = vld [vmem:[%s7652_s6 + $0x38] sm:$0xff]  ;;  %v7664_v25 = vmov 0   ;;  %v728_v59 = vsel %vm534_vm1, %v688_v55, 0  ;;  %v725_v61 = vsel %vm534_vm1, %v687_v60, 0  ;;  %v789_v55 = vsel %vm787_vm3, %v5423_v51, 0 }
  0x1c   : > { %5159 = vset.pattern.permute.xlu1 %v7664_v25  ;;  %v2320_v33 = vmul.f32 %v5501_v24, %v5501_v24  ;;  %vm1007_vm7 = vcmask 64512   ;;  %vm2645_vm15 = vcmask 1044480   ;;  %vm2646_vm3 = vcmask 1045504  }
  0x1f   : > { %484 = vadd.xlane.f32.xlu0 %v483_v30  ;;  %481 = vadd.xlane.f32.xlu1 %v480_v31  ;;  %v5511_v30 = vld [vmem:[%s7652_s6 + $0x30] sm:$0xff]  ;;  %v734_v31 = vsel %vm534_vm1, %v690_v19, 0 }
  0x20   : > { %4862 = vmatpush3.bf16.xpose.msra.mxu1 %v737_v10  ;;  %v2319_v38 = vmul.f32 %v5511_v30, %v5511_v30 }
  0x21   : > { %4863 = vmatprep.subr.bf16.mxu1 %v7660_v52 }
  0x22   : > { %v2347_v45 = vsel %vm7667_vm0, %v2319_v38, 0.0 }
  0x23   : > { %478 = vadd.xlane.f32.xlu0 %v477_v36  ;;  %475 = vadd.xlane.f32.xlu1 %v474_v37  ;;  %v5520_v36 = vld [vmem:[%s7652_s6 + $0x20] sm:$0xff]  ;;  %v2356_v37 = vsel %vm7667_vm0, %v2322_v27, 0.0 }
  0x24   : > { %v2317_v44 = vmul.f32 %v5520_v36, %v5520_v36 }
  0x26   : > { %v2341_v49 = vsel %vm7667_vm0, %v2317_v44, 0.0 }
  0x27   : > { %472 = vadd.xlane.f32.xlu0 %v471_v42  ;;  %469 = vadd.xlane.f32.xlu1 %v468_v43  ;;  %v689_v42 = vpack.c.bf16 %v5320_v12, %v5325_v13  ;;  %v2350_v43 = vsel %vm7667_vm0, %v2320_v33, 0.0 }
  0x28   : > { %4864 = vmatpush3.bf16.xpose.msra.mxu1 %v734_v31 }
  0x29   : > { %4865 = vmatprep.subr.bf16.mxu1 %v7660_v52 }
  0x2b   : > { %466 = vadd.xlane.f32.xlu0 %v465_v46  ;;  %463 = vadd.xlane.f32.xlu1 %v462_v47  ;;  %v2318_v46 = vmul.f32 %v5528_v39, %v5528_v39  ;;  %v731_v47 = vsel %vm534_vm1, %v689_v42, 0 }
  0x2d   : > { %v2344_v53 = vsel %vm7667_vm0, %v2318_v46, 0.0 }
  0x2f   : > { %2372 = vadd.xlane.f32.xlu1 %v2371_v3  ;;  %v686_v3 = vpack.c.bf16 %v5374_v34, %v5379_v35 }
  0x30   : > { %4866 = vmatpush3.bf16.xpose.msra.mxu1 %v731_v47 }
  0x31   : > { %4867 = vmatprep.subr.bf16.mxu1 %v7660_v52  ;;  %v722_v4 = vsel %vm534_vm1, %v686_v3, 0 }
  0x33   : > { %2366 = vadd.xlane.f32.xlu1 %v2365_v11 }
  0x37   : > { %2363 = vadd.xlane.f32.xlu1 %v2362_v20 }
  0x38   : > { %4868 = vmatpush3.bf16.xpose.msra.mxu1 %v728_v59 }
  0x39   : > { %4869 = vmatprep.subr.bf16.mxu1 %v7660_v52 }
  0x3b   : > { %2354 = vadd.xlane.f32.xlu1 %v2353_v32 }
  0x3f   : > { %2351 = vadd.xlane.f32.xlu1 %v2350_v43 }
  0x40   : > { %4870 = vmatpush3.bf16.xpose.msra.mxu1 %v725_v61 }
  0x41   : > { %4871 = vmatprep.subr.bf16.mxu1 %v7660_v52 }
  0x43   : > { %2342 = vadd.xlane.f32.xlu1 %v2341_v49 }
  0x48   : > { %4872 = vmatpush3.bf16.xpose.msra.mxu1 %v722_v4 }
  0x49   : > { %4873 = vmatprep.subr.bf16.mxu1 %v7660_v52 }
  0x54   : > { %696 = vperm.xlu1 %5159, %v436_v62   ;;  %v7659_v62 = vlaneseq }
  0x56   : > { %v5655_v3 = vshrl.u32 %v7659_v62, 7 }
  0x58   : > { %699 = vxpose.xlu0.c.b16.start.end [1/1] (short) (narrow) %v5423_v51, 16  ;;  %7679 = vst [vmem:[#allocation2_spill] sm:$0xff] %v5655_v3 }
  0x61   : > { %5160 = vset.pattern.permute.xlu0 %v7664_v25 }
  0x65   : > { %2375 = vadd.xlane.f32.xlu0 %v2374_v5  ;;  %v685_v5 = vpack.c.bf16 %v5390_v40, %v5395_v41 }
  0x67   : > { %v719_v10 = vsel %vm534_vm1, %v685_v5, 0  ;;  %v5660_v5 = vsub.s32 0, %v5655_v3 }
  0x68   : > { %4874 = vmatpush3.bf16.xpose.msra.mxu1 %v719_v10  ;;  %v5663_v10 = vsub.s32 1, %v5655_v3 }
  0x69   : > { %2369 = vadd.xlane.f32.xlu0 %v2368_v16  ;;  %4885 = vmatprep.subr.bf16.mxu1 %v7660_v52 }
  0x6d   : > { %2360 = vadd.xlane.f32.xlu0 %v2359_v26 }
  0x71   : > { %2357 = vadd.xlane.f32.xlu0 %v2356_v37 }
  0x75   : > { %2348 = vadd.xlane.f32.xlu0 %v2347_v45 }
  0x79   : > { %2345 = vadd.xlane.f32.xlu0 %v2344_v53 }
  0x98   : > { %v509_v11 = vpop.xlane.xlu0 %508  ;;  %v503_v14 = vpop.xlane.xlu1 %502 }
  0x99   : > { %v525_v16 = vsel %vm7667_vm0, %v5280_v0, %v509_v11  ;;  %v523_v20 = vsel %vm7667_vm0, %v5290_v2, %v503_v14 }
  0x9a   : > { %4824 = vmatprep.subr.msk.mxu0 %vm534_vm1, %v525_v16 }
  0x9b   : > { %4825 = vmatpush3.xpose.msk.msra.mxu0 %vm534_vm1, %v525_v16 }
  0x9c   : > { %v506_v17 = vpop.xlane.xlu0 %505  ;;  %v500_v21 = vpop.xlane.xlu1 %499 }
  0x9d   : > { %v524_v19 = vsel %vm7667_vm0, %v5285_v1, %v506_v17  ;;  %v522_v0 = vsel %vm7667_vm0, %v5301_v6, %v500_v21 }
  0x9e   : > { %4826 = vmatprep.subr.msk.mxu0 %vm534_vm1, %v524_v19 }
  0x9f   : > { %4827 = vmatpush3.xpose.msk.msra.mxu0 %vm534_vm1, %v524_v19  ;;  %v5670_v19 = vsub.s32 5, %v5655_v3 }
  0xa0   : > { %4828 = vmatprep.subr.msk.mxu0 %vm534_vm1, %v523_v20  ;;  %v497_v26 = vpop.xlane.xlu0 %496  ;;  %v494_v27 = vpop.xlane.xlu1 %493 }
  0xa1   : > { %v521_v1 = vsel %vm7667_vm0, %v5308_v8, %v497_v26  ;;  %v520_v31 = vsel %vm7667_vm0, %v5313_v9, %v494_v27  ;;  %v5680_v27 = vsub.s32 4, %v5655_v3 }
  0xa3   : > { %4829 = vmatpush3.xpose.msk.msra.mxu0 %vm534_vm1, %v523_v20  ;;  %v5673_v20 = vsub.s32 2, %v5655_v3 }
  0xa4   : > { %4830 = vmatprep.subr.msk.mxu0 %vm534_vm1, %v522_v0  ;;  %v491_v2 = vpop.xlane.xlu0 %490  ;;  %v488_v33 = vpop.xlane.xlu1 %487 }
  0xa5   : > { %v519_v32 = vsel %vm7667_vm0, %v5320_v12, %v491_v2  ;;  %v518_v37 = vsel %vm7667_vm0, %v5325_v13, %v488_v33  ;;  %v5688_v33 = vsub.s32 3, %v5655_v3 }
  0xa7   : > { %4831 = vmatpush3.xpose.msk.msra.mxu0 %vm534_vm1, %v522_v0 }
  0xa8   : > { %4832 = vmatprep.subr.msk.mxu0 %vm534_vm1, %v521_v1  ;;  %v485_v6 = vpop.xlane.xlu0 %484  ;;  %v482_v42 = vpop.xlane.xlu1 %481 }
  0xa9   : > { %v517_v38 = vsel %vm7667_vm0, %v5342_v22, %v485_v6  ;;  %v516_v43 = vsel %vm7667_vm0, %v5347_v23, %v482_v42  ;;  %v5684_v6 = vsub.s32 6, %v5655_v3  ;;  %v5700_v42 = vld [vmem:[%s7652_s6 + $0x10] sm:$0xff] }
  0xab   : > { %4833 = vmatpush3.xpose.msk.msra.mxu0 %vm534_vm1, %v521_v1 }
  0xac   : > { %4834 = vmatprep.subr.msk.mxu0 %vm534_vm1, %v520_v31  ;;  %v479_v8 = vpop.xlane.xlu0 %478  ;;  %v476_v22 = vpop.xlane.xlu1 %475 }
  0xad   : > { %v515_v44 = vsel %vm7667_vm0, %v5358_v28, %v479_v8  ;;  %v514_v23 = vsel %vm7667_vm0, %v5363_v29, %v476_v22 }
  0xaf   : > { %4835 = vmatpush3.xpose.msk.msra.mxu0 %vm534_vm1, %v520_v31 }
  0xb0   : > { %4836 = vmatprep.subr.msk.mxu0 %vm534_vm1, %v519_v32  ;;  %v473_v9 = vpop.xlane.xlu0 %472  ;;  %v470_v45 = vpop.xlane.xlu1 %469 }
  0xb1   : > { %v513_v28 = vsel %vm7667_vm0, %v5374_v34, %v473_v9  ;;  %v512_v46 = vsel %vm7667_vm0, %v5379_v35, %v470_v45  ;;  %v5625_v34 = vld [vmem:[%s5409_s27 + $0x8] sm:$0xff] }
  0xb2   : > { %v442_v35 = vmul.f32 -2.0, %v5625_v34  ;;  %v693_v53 = vpack.c.bf16 %v5625_v34, %v5412_v48  ;;  %v4192_v45 = vmul.f32 0.5, %v5625_v34 }
  0xb3   : > { %4837 = vmatpush3.xpose.msk.msra.mxu0 %vm534_vm1, %v519_v32 }
  0xb4   : > { %4838 = vmatprep.subr.msk.mxu0 %vm534_vm1, %v518_v37  ;;  %v467_v12 = vpop.xlane.xlu0 %466  ;;  %v464_v47 = vpop.xlane.xlu1 %463 }
  0xb5   : > { %v511_v29 = vsel %vm7667_vm0, %v5390_v40, %v467_v12  ;;  %v510_v49 = vsel %vm7667_vm0, %v5395_v41, %v464_v47  ;;  %v5634_v40 = vsel %vm7667_vm0, %v442_v35, 1.0  ;;  %v5645_v41 = vsel %vm7667_vm0, %v693_v53, 0 }
  0xb7   : > { %4839 = vmatpush3.xpose.msk.msra.mxu0 %vm534_vm1, %v518_v37  ;;  %v5692_v37 = vsub.s32 7, %v5655_v3 }
  0xb8   : > { %4840 = vmatprep.subr.msk.mxu0 %vm534_vm1, %v517_v38 }
  0xba   : > { %v707_v13 = vpop.trf.xlu0 }
  0xbb   : > { %4841 = vmatpush3.xpose.msk.msra.mxu0 %vm534_vm1, %v517_v38  ;;  %4876 = vmatmul.mubr.msk.bf16.vlgmr.msra.gmra.mxu1 %vm534_vm1, %v707_v13 }
  0xbc   : > { %4842 = vmatprep.subr.msk.mxu0 %vm534_vm1, %v516_v43  ;;  %4887 = vmatprep.mubr.msk.bf16.mxu1 %vm7668_vm2, %v7660_v52 }
  0xbf   : > { %4843 = vmatpush3.xpose.msk.msra.mxu0 %vm534_vm1, %v516_v43  ;;  %v2315_v43 = vmul.f32 %v5700_v42, %v5700_v42 }
  0xc0   : > { %4844 = vmatprep.subr.msk.mxu0 %vm534_vm1, %v515_v44 }
  0xc3   : > { %4845 = vmatpush3.xpose.msk.msra.mxu0 %vm534_vm1, %v515_v44  ;;  %v2335_v44 = vsel %vm7667_vm0, %v2315_v43, 0.0 }
  0xc4   : > { %4846 = vmatprep.subr.msk.mxu0 %vm534_vm1, %v514_v23 }
  0xc7   : > { %4847 = vmatpush3.xpose.msk.msra.mxu0 %vm534_vm1, %v514_v23 }
  0xc8   : > { %4848 = vmatprep.subr.msk.mxu0 %vm534_vm1, %v513_v28 }
  0xcb   : > { %4849 = vmatpush3.xpose.msk.msra.mxu0 %vm534_vm1, %v513_v28 }
  0xcc   : > { %4850 = vmatprep.subr.msk.mxu0 %vm534_vm1, %v512_v46 }
  0xcf   : > { %4851 = vmatpush3.xpose.msk.msra.mxu0 %vm534_vm1, %v512_v46  ;;  %v5719_v46 = vld [vmem:[%s7652_s6 + $0x18] sm:$0xff] }
  0xd0   : > { %4852 = vmatprep.subr.msk.mxu0 %vm534_vm1, %v511_v29  ;;  %v2316_v47 = vmul.f32 %v5719_v46, %v5719_v46 }
  0xd2   : > { %v2338_v35 = vsel %vm7667_vm0, %v2316_v47, 0.0 }
  0xd3   : > { %4853 = vmatpush3.xpose.msk.msra.mxu0 %vm534_vm1, %v511_v29  ;;  %v4194_v29 = vmax.f32 %v4192_v45, 0.0 }
  0xd4   : > { %4854 = vmatprep.subr.msk.mxu0 %vm534_vm1, %v510_v49 }
  0xd7   : > { %4855 = vmatpush3.xpose.msk.msra.mxu0 %vm534_vm1, %v510_v49  ;;  %v4196_v49 = vmin.f32 %v4194_v29, 15.0 }
  0xd8   : > { %4879 = vmatprep.subr.bf16.mxu0 %v7660_v52 }
  0xd9   : > { %v4199_v53 = vmul.f32 0.071428575, %v4196_v49  ;;  %v2307_v49 = vld [vmem:[%s7654_s8] sm:$0xff] }
  0xda   : > { %4857 = vmatmul.mubr.msk.f32.vlgmr.msra.gmra.mxu0 %vm534_vm1, %v5634_v40 }
  0xdb   : > { %4880 = vmatpush3.bf16.msra.mxu0 %v789_v55  ;;  %4881 = vmatprep.mubr.msk.bf16.mxu0 %vm7668_vm2, %v7660_v52  ;;  %v5724_v55 = vpop.xlane.xlu1 %2372 }
  0xdc   : > { %4891 = vmatprep.subr.bf16.mxu0 %v7660_v52 }
  0xde   : > { %4882 = vmatmul.mubr.msk.bf16.vlgmr.msra.gmra.mxu0 %vm534_vm1, %v5645_v41 }
  0xdf   : > { %4893 = vmatprep.mubr.msk.bf16.mxu0 %vm7668_vm2, %v7660_v52  ;;  %v5728_v34 = vpop.xlane.xlu1 %2366 }
 0x17b   : > { %v5652_v59 = vpop.f32.mrf.mxu1 }
 0x17d   : > { %v4877_v51 = vpop.f32.mrf.mxu1 }
 0x17e   : > { %v4201_v51 = vmul.f32 2.0, %v4199_v53 }
 0x17f   : > { %v779_v60 = vpop.f32.mrf.mxu1 }
 0x180   : > { %v5726_v60 = vpop.xlane.xlu0 %2375 }
 0x181   : > { %v4878_v61 = vpop.f32.mrf.mxu1 }
 0x182   : > { %v4695_v61 = vadd.f32 -1.0, %v4201_v51 }
 0x19a   : > { %v5657_v4 = vpop.f32.mrf.mxu0 }
 0x19c   : > { %v5665_v11 = vpop.f32.mrf.mxu0 }
 0x19e   : > { %v825_v14 = vpop.f32.mrf.mxu0 }
 0x19f   : > { %v842_v16 = vrot.slane %v825_v14, %v5663_v10  ;;  %v835_v17 = vrot.slane %v825_v14, %v5660_v5  ;;  %v870_v26 = vrot.slane %v825_v14, %v5670_v19  ;;  %v849_v1 = vrot.slane %v825_v14, %v5673_v20 }
 0x1a0   : > { %v4883_v21 = vpop.f32.mrf.mxu0  ;;  %v863_v31 = vrot.slane %v825_v14, %v5680_v27  ;;  %v877_v32 = vrot.slane %v825_v14, %v5684_v6  ;;  %v856_v8 = vrot.slane %v825_v14, %v5688_v33  ;;  %v884_v9 = vrot.slane %v825_v14, %v5692_v37  ;;  %v5733_v14 = vld [vmem:[%s7652_s6 + $0x8] sm:$0xff] }
 0x1a1   : > { %844 = vbcast.lane.b32.xlu0 %v842_v16, 256  ;;  %837 = vbcast.lane.b32.xlu1 %v835_v17, 256  ;;  %v4205_v16 = vadd.f32 1.0, %v4695_v61  ;;  %v5735_v17 = vpop.xlane.xlu0 %2369  ;;  %v5737_v21 = vpop.xlane.xlu1 %2363 }
 0x1a2   : > { %v5675_v0 = vpop.f32.mrf.mxu0 }
 0x1a3   : > { %v891_v38 = vrot.slane %v5675_v0, %v5660_v5  ;;  %v905_v12 = vrot.slane %v5675_v0, %v5673_v20  ;;  %v919_v13 = vrot.slane %v5675_v0, %v5680_v27  ;;  %v933_v22 = vrot.slane %v5675_v0, %v5684_v6 }
 0x1a4   : > { %v4884_v2 = vpop.f32.mrf.mxu0  ;;  %v898_v23 = vrot.slane %v5675_v0, %v5663_v10  ;;  %v926_v28 = vrot.slane %v5675_v0, %v5670_v19 }
 0x1a5   : > { %872 = vbcast.lane.b32.xlu0 %v870_v26, 256  ;;  %851 = vbcast.lane.b32.xlu1 %v849_v1, 256  ;;  %v2314_v26 = vmul.f32 %v5733_v14, %v5733_v14  ;;  %v912_v1 = vrot.slane %v5675_v0, %v5688_v33  ;;  %v4207_v2 = vmul.f32 16.0, %v4205_v16  ;;  %v5777_v16 = vld [vmem:[%s7652_s6] sm:$0xff] }
 0x1a9   : > { %865 = vbcast.lane.b32.xlu1 %v863_v31, 256  ;;  %v2332_v31 = vsel %vm7667_vm0, %v2314_v26, 0.0 }
 0x1ad   : > { %879 = vbcast.lane.b32.xlu1 %v877_v32, 256  ;;  %v5744_v32 = vpop.xlane.xlu0 %2360 }
 0x1b1   : > { %858 = vbcast.lane.b32.xlu1 %v856_v8, 256  ;;  %v5746_v8 = vpop.xlane.xlu1 %2354 }
 0x1b5   : > { %886 = vbcast.lane.b32.xlu1 %v884_v9, 256  ;;  %v4697_v9 = vadd.f32 -1.0, %v4207_v2  ;;  %v5752_v43 = vpop.xlane.xlu1 %2351 }
 0x1b9   : > { %893 = vbcast.lane.b32.xlu1 %v891_v38, 256  ;;  %v5748_v38 = vmul.f32 0.5, %v4697_v9 }
 0x1bd   : > { %907 = vbcast.lane.b32.xlu1 %v905_v12, 256  ;;  %v5750_v12 = vpop.xlane.xlu0 %2357 }
 0x1c1   : > { %921 = vbcast.lane.b32.xlu1 %v919_v13, 256  ;;  %v4213_v13 = vfloor.f32 %v5748_v38 }
 0x1c4   : > { %2336 = vadd.xlane.f32.xlu0 %v2335_v44  ;;  %v5755_v44 = vpop.xlane.xlu0 %2348 }
 0x1c5   : > { %935 = vbcast.lane.b32.xlu1 %v933_v22, 256  ;;  %v5757_v22 = vpop.xlane.xlu1 %2342 }
 0x1c9   : > { %v697_v45 = vpop.permute.xlu1 %696 }
 0x1ca   : > { %v5766_v47 = vadd.f32 %v5652_v59, %v697_v45 }
 0x1da   : > { %900 = vbcast.lane.b32.xlu0 %v898_v23, 256  ;;  %v5141_v23 = vtrunc.f32 %v4213_v13 }
 0x1dc   : > { %v5763_v29 = vcvt.f32.s32 %v5141_v23 }
 0x1de   : > { %928 = vbcast.lane.b32.xlu0 %v926_v28, 256  ;;  %v5761_v28 = vpop.xlane.xlu0 %2345  ;;  %vm4234_vm4 = vcmp.ge.s32.totalorder %v5763_v29, 0  ;;  %vm4236_vm6 = vcmp.lt.s32.totalorder %v5763_v29, 16 }
 0x1df   : > { %v4240_v59 = vsel %vm4234_vm4, 1, %v7664_v25 }
 0x1e9   : > { %2339 = vadd.xlane.f32.xlu1 %v2338_v35 }
 0x1fa   : > { %914 = vbcast.lane.b32.xlu1 %v912_v1, 256 }
 0x1fd   : > { %2333 = vadd.xlane.f32.xlu0 %v2332_v31  ;;  %v2313_v31 = vmul.f32 %v5777_v16, %v5777_v16 }
 0x213   : > { %v845_v35 = vpop.permute.xlu0 %844  ;;  %v838_v53 = vpop.permute.xlu1 %837  ;;  %2544 = vperm.xlu0 %5160, %v2307_v49  }
 0x214   : > { %v945_v51 = vsub.f32 %v5766_v47, %v845_v35  ;;  %v944_v61 = vsub.f32 %v5766_v47, %v838_v53 }
 0x216   : > { %v961_v26 = vmax.f32 %v945_v51, 0.0  ;;  %v960_v1 = vmax.f32 %v944_v61, 0.0  ;;  %v5792_v51 = vld [vmem:[%s7650_s4] sm:$0xff]   ;;  %v4250_v61 = vsel %vm4236_vm6, 1, %v7664_v25 }
 0x217   : > { %v852_v2 = vpop.permute.xlu1 %851  ;;  %4243 = vrot.lane.b32.xlu0 %v4240_v59, %s5197_s18 }
 0x218   : > { %v977_v9 = vpack.c.bf16 %v961_v26, %v961_v26  ;;  %v976_v23 = vpack.c.bf16 %v960_v1, %v960_v1  ;;  %v946_v45 = vsub.f32 %v5766_v47, %v852_v2  ;;  %v2329_v26 = vsel %vm7667_vm0, %v2313_v31, 0.0 }
 0x21a   : > { %v962_v49 = vmax.f32 %v946_v45, 0.0  ;;  %v1013_v35 = vsel %vm1011_vm5, %v976_v23, 0  ;;  %v1057_v53 = vsel %vm1011_vm5, %v977_v9, 0  ;;  %v4191_v9 = vmul.f32 0.5, %v5412_v48 }
 0x21b   : > { %4886 = vmatpush3.bf16.msra.mxu1 %v1013_v35  ;;  %4892 = vmatpush3.bf16.msra.mxu0 %v1057_v53  ;;  %v866_v59 = vpop.permute.xlu1 %865  ;;  %v873_v35 = vpop.permute.xlu0 %872  ;;  %v5812_v48 = vadd.s32 1, %v5763_v29 }
 0x21c   : > { %v978_v1 = vpack.c.bf16 %v962_v49, %v962_v49  ;;  %v948_v2 = vsub.f32 %v5766_v47, %v866_v59  ;;  %4897 = vmatprep.subr.bf16.mxu1 %v7660_v52  ;;  %4903 = vmatprep.subr.bf16.mxu0 %v7660_v52  ;;  %v4193_v49 = vmax.f32 %v4191_v9, 0.0  ;;  %v949_v53 = vsub.f32 %v5766_v47, %v873_v35 }
 0x21d   : > { %4253 = vrot.lane.b32.xlu0 %v4250_v61, %s5197_s18  ;;  %vm4316_vm8 = vcmp.ge.s32.totalorder %v5812_v48, 0  ;;  %vm4318_vm9 = vcmp.lt.s32.totalorder %v5812_v48, 16 }
 0x21e   : > { %v964_v23 = vmax.f32 %v948_v2, 0.0  ;;  %4888 = vmatmul.mubr.msk.bf16.vlgmr.msra.gmra.mxu1 %vm1007_vm7, %v5792_v51  ;;  %2330 = vadd.xlane.f32.xlu1 %v2329_v26  ;;  %v1101_v45 = vsel %vm1011_vm5, %v978_v1, 0  ;;  %v4195_v2 = vmin.f32 %v4193_v49, 15.0  ;;  %v4376_v9 = vsel %vm4316_vm8, 1, %v7664_v25 }
 0x21f   : > { %4898 = vmatpush3.bf16.msra.mxu1 %v1101_v45  ;;  %v880_v31 = vpop.permute.xlu1 %879  ;;  %4899 = vmatprep.mubr.msk.bf16.mxu1 %vm7668_vm2, %v7660_v52  ;;  %v965_v45 = vmax.f32 %v949_v53, 0.0  ;;  %v4386_v53 = vsel %vm4318_vm9, 1, %v7664_v25  ;;  %v940_v25 = vrot.slane %v5675_v0, %v5692_v37 }
 0x220   : > { %4909 = vmatprep.subr.bf16.mxu1 %v7660_v52  ;;  %4894 = vmatmul.mubr.msk.bf16.vlgmr.msra.gmra.mxu0 %vm1007_vm7, %v5792_v51  ;;  %v980_v61 = vpack.c.bf16 %v964_v23, %v964_v23  ;;  %v950_v59 = vsub.f32 %v5766_v47, %v880_v31  ;;  %v4198_v62 = vmul.f32 0.071428575, %v4195_v2 }
 0x221   : > { %4905 = vmatprep.mubr.msk.bf16.mxu0 %vm7668_vm2, %v7660_v52  ;;  %4263 = vrot.lane.b32.xlu0 %v5763_v29, %s5198_s23 }
 0x222   : > { %v966_v35 = vmax.f32 %v950_v59, 0.0  ;;  %v1189_v31 = vsel %vm1011_vm5, %v980_v61, 0  ;;  %v5841_v59 = vsub.f32 %v5748_v38, %v4213_v13  ;;  %v981_v61 = vpack.c.bf16 %v965_v45, %v965_v45 }
 0x223   : > { %v859_v26 = vpop.permute.xlu1 %858  ;;  %v4200_v3 = vmul.f32 2.0, %v4198_v62 }
 0x224   : > { %v947_v1 = vsub.f32 %v5766_v47, %v859_v26  ;;  %v5851_v38 = vsub.f32 1.0, %v5841_v59  ;;  %v1233_v62 = vsel %vm1011_vm5, %v981_v61, 0 }
 0x225   : > { %4327 = vrot.lane.b32.xlu0 %v5812_v48, %s5198_s23 }
 0x226   : > { %v963_v23 = vmax.f32 %v947_v1, 0.0  ;;  %4900 = vmatmul.mubr.msk.bf16.vlgmr.msra.gmra.mxu1 %vm1007_vm7, %v5792_v51  ;;  %v982_v1 = vpack.c.bf16 %v966_v35, %v966_v35  ;;  %v4694_v35 = vadd.f32 -1.0, %v4200_v3 }
 0x227   : > { %4910 = vmatpush3.bf16.msra.mxu1 %v1189_v31  ;;  %v887_v26 = vpop.permute.xlu1 %886  ;;  %4911 = vmatprep.mubr.msk.bf16.mxu1 %vm7668_vm2, %v7660_v52 }
 0x228   : > { %v979_v49 = vpack.c.bf16 %v963_v23, %v963_v23  ;;  %4921 = vmatprep.subr.bf16.mxu1 %v7660_v52  ;;  %v951_v31 = vsub.f32 %v5766_v47, %v887_v26  ;;  %v4204_v61 = vadd.f32 1.0, %v4694_v35 }
 0x229   : > { %4379 = vrot.lane.b32.xlu0 %v4376_v9, %s5197_s18  ;;  %v7680_v9 = vmov 0.0  }
 0x22a   : > { %v1145_v23 = vsel %vm1011_vm5, %v979_v49, 0  ;;  %v967_v13 = vmax.f32 %v951_v31, 0.0 }
 0x22b   : > { %4904 = vmatpush3.bf16.msra.mxu0 %v1145_v23  ;;  %v894_v52 = vpop.permute.xlu1 %893  ;;  %v4206_v23 = vmul.f32 16.0, %v4204_v61 }
 0x22c   : > { %v952_v2 = vsub.f32 %v5766_v47, %v894_v52  ;;  %4915 = vmatprep.subr.bf16.mxu0 %v7680_v9  ;;  %v1277_v52 = vsel %vm1011_vm5, %v982_v1, 0  ;;  %v983_v26 = vpack.c.bf16 %v967_v13, %v967_v13 }
 0x22d   : > { %4389 = vrot.lane.b32.xlu0 %v4386_v53, %s5197_s18 }
 0x22e   : > { %v968_v45 = vmax.f32 %v952_v2, 0.0  ;;  %4906 = vmatmul.mubr.msk.bf16.vlgmr.msra.gmra.mxu0 %vm1007_vm7, %v5792_v51  ;;  %4912 = vmatmul.mubr.msk.bf16.vlgmr.msra.gmra.mxu1 %vm1007_vm7, %v5792_v51  ;;  %v1321_v1 = vsel %vm1011_vm5, %v983_v26, 0 }
 0x22f   : > { %4922 = vmatpush3.bf16.msra.mxu1 %v1277_v52  ;;  %4916 = vmatpush3.bf16.msra.mxu0 %v1233_v62  ;;  %v908_v0 = vpop.permute.xlu1 %907 }
 0x230   : > { %942 = vbcast.lane.b32.xlu1 %v940_v25, 256  ;;  %4917 = vmatprep.mubr.msk.bf16.mxu0 %vm7668_vm2, %v7680_v9  ;;  %v984_v49 = vpack.c.bf16 %v968_v45, %v968_v45  ;;  %v954_v53 = vsub.f32 %v5766_v47, %v908_v0  ;;  %v4696_v45 = vadd.f32 -1.0, %v4206_v23 }
 0x231   : > { %4923 = vmatprep.mubr.msk.bf16.mxu1 %vm7668_vm2, %v7680_v9  ;;  %4927 = vmatprep.subr.bf16.mxu0 %v7680_v9 }
 0x232   : > { %4933 = vmatprep.subr.bf16.mxu1 %v7680_v9  ;;  %4227 = vrot.lane.b32.xlu0 %v5851_v38, %s5198_s23  ;;  %v970_v25 = vmax.f32 %v954_v53, 0.0  ;;  %v1365_v3 = vsel %vm1011_vm5, %v984_v49, 0  ;;  %v5893_v35 = vmul.f32 0.5, %v4696_v45  ;;  %v5918_v45 = vld [vmem:[%s7653_s7] sm:$0x3f]  }
 0x233   : > { %v922_v31 = vpop.permute.xlu1 %921 }
 0x234   : > { %v986_v2 = vpack.c.bf16 %v970_v25, %v970_v25  ;;  %v956_v13 = vsub.f32 %v5766_v47, %v922_v31  ;;  %v4212_v53 = vfloor.f32 %v5893_v35 }
 0x236   : > { %4918 = vmatmul.mubr.msk.bf16.vlgmr.msra.gmra.mxu0 %vm1007_vm7, %v5792_v51  ;;  %4924 = vmatmul.mubr.msk.bf16.vlgmr.msra.gmra.mxu1 %vm1007_vm7, %v5792_v51  ;;  %v972_v52 = vmax.f32 %v956_v13, 0.0  ;;  %v1453_v62 = vsel %vm1011_vm5, %v986_v2, 0  ;;  %v2392_v13 = vsel %vm7667_vm0, %v5440_v56, %v5726_v60  ;;  %v2311_v56 = vld [vmem:[%s7656_s10] sm:$0xff] }
 0x237   : > { %4928 = vmatpush3.bf16.msra.mxu0 %v1321_v1  ;;  %4934 = vmatpush3.bf16.msra.mxu1 %v1365_v3  ;;  %v936_v0 = vpop.permute.xlu1 %935  ;;  %v5139_v3 = vtrunc.f32 %v4212_v53 }
 0x238   : > { %4935 = vmatprep.mubr.msk.bf16.mxu1 %vm7668_vm2, %v7680_v9  ;;  %4945 = vmatprep.subr.bf16.mxu1 %v7680_v9  ;;  %v988_v26 = vpack.c.bf16 %v972_v52, %v972_v52  ;;  %v958_v49 = vsub.f32 %v5766_v47, %v936_v0 }
 0x239   : > { %4929 = vmatprep.mubr.msk.bf16.mxu0 %vm7668_vm2, %v7680_v9  ;;  %4939 = vmatprep.subr.bf16.mxu0 %v7680_v9  ;;  %v5910_v2 = vcvt.f32.s32 %v5139_v3 }
 0x23a   : > { %4309 = vrot.lane.b32.xlu0 %v5841_v59, %s5198_s23  ;;  %v974_v61 = vmax.f32 %v958_v49, 0.0  ;;  %v1541_v25 = vsel %vm1011_vm5, %v988_v26, 0  ;;  %v2308_v26 = vld [vmem:[%s7654_s8 + $0x8] sm:$0xff] }
 0x23b   : > { %v5924_v52 = vadd.s32 1, %v5910_v2  ;;  %vm7666_vm13 = vcmp.ge.s32.totalorder %v5910_v2, 0  ;;  %vm4235_vm14 = vcmp.lt.s32.totalorder %v5910_v2, 16 }
 0x23c   : > { %v990_v1 = vpack.c.bf16 %v974_v61, %v974_v61  ;;  %v2391_v61 = vsel %vm7667_vm0, %v5434_v54, %v5724_v55  ;;  %v2390_v54 = vsel %vm7667_vm0, %v5450_v58, %v5735_v17  ;;  %v7672_v58 = vmov 1  }
 0x23d   : > { %vm4315_vm10 = vcmp.ge.s32.totalorder %v5924_v52, 0  ;;  %vm4317_vm11 = vcmp.lt.s32.totalorder %v5924_v52, 16  ;;  %5161 = vset.pattern.permute.xlu0 %v7672_v58  ;;  %v2388_v17 = vsel %vm7667_vm0, %v5464_v63, %v5737_v21 }
 0x23e   : > { %4936 = vmatmul.mubr.msk.bf16.vlgmr.msra.gmra.mxu1 %vm1007_vm7, %v5792_v51  ;;  %4930 = vmatmul.mubr.msk.bf16.vlgmr.msra.gmra.mxu0 %vm1007_vm7, %v5792_v51  ;;  %v1629_v23 = vsel %vm1011_vm5, %v990_v1, 0  ;;  %vm5934_vm12 = vmand %vm4315_vm10, %vm4317_vm11  ;;  %v7683_v1 = vmov 0  }
 0x23f   : > { %4946 = vmatpush3.bf16.msra.mxu1 %v1453_v62  ;;  %4947 = vmatprep.mubr.msk.bf16.mxu1 %vm7668_vm2, %v7680_v9  ;;  %v4239_v3 = vsel %vm7666_vm13, 1, %v7683_v1  ;;  %v4249_v55 = vsel %vm4235_vm14, 1, %v7683_v1  ;;  %v4375_v63 = vsel %vm4315_vm10, 1, %v7683_v1  ;;  %v4385_v21 = vsel %vm4317_vm11, 1, %v7683_v1  ;;  %vm6089_vm10 = vmand %vm4316_vm8, %vm4318_vm9 }
 0x240   : > { %4957 = vmatprep.subr.bf16.mxu1 %v7680_v9  ;;  %4941 = vmatprep.mubr.msk.bf16.mxu0 %vm7668_vm2, %v7680_v9  ;;  %vm2574_vm9 = vcmask 89088  }
 0x246   : > { %4948 = vmatmul.mubr.msk.bf16.vlgmr.msra.gmra.mxu1 %vm1007_vm7, %v5792_v51 }
 0x247   : > { %4958 = vmatpush3.bf16.msra.mxu1 %v1541_v25  ;;  %4959 = vmatprep.mubr.msk.bf16.mxu1 %vm7668_vm2, %v7680_v9 }
 0x248   : > { %4969 = vmatprep.subr.bf16.mxu1 %v7680_v9 }
 0x24d   : > { %v5905_v31 = vpop.xlane.xlu0 %2336 }
 0x24e   : > { %4960 = vmatmul.mubr.msk.bf16.vlgmr.msra.gmra.mxu1 %vm1007_vm7, %v5792_v51 }
 0x24f   : > { %4970 = vmatpush3.bf16.msra.mxu1 %v1629_v23  ;;  %4971 = vmatprep.mubr.msk.bf16.mxu1 %vm7668_vm2, %v7680_v9  ;;  %v2383_v23 = vsel %vm7667_vm0, %v5511_v30, %v5755_v44 }
 0x250   : > { %4981 = vmatprep.subr.msk.mxu1 %vm534_vm1, %v2392_v13 }
 0x251   : > { %v901_v62 = vpop.permute.xlu0 %900 }
 0x252   : > { %v953_v0 = vsub.f32 %v5766_v47, %v901_v62  ;;  %v2382_v62 = vsel %vm7667_vm0, %v5528_v39, %v5761_v28 }
 0x253   : > { %2558 = vxpose.xlu1.c.b16.start.end [1/1] (short) (narrow) %v5918_v45, 16 }
 0x254   : > { %v969_v60 = vmax.f32 %v953_v0, 0.0 }
 0x256   : > { %v985_v49 = vpack.c.bf16 %v969_v60, %v969_v60  ;;  %4972 = vmatmul.mubr.msk.bf16.vlgmr.msra.gmra.mxu1 %vm1007_vm7, %v5792_v51  ;;  %v2381_v60 = vsel %vm7667_vm0, %v5520_v36, %v5757_v22  ;;  %v2379_v22 = vsel %vm7667_vm0, %v5700_v42, %v5905_v31 }
 0x257   : > { %2549 = vperm.xlu1 %5159, %v2308_v26   ;;  %4982 = vmatpush3.xpose.msk.msra.mxu1 %vm534_vm1, %v2392_v13 }
 0x258   : > { %4983 = vmatprep.subr.msk.mxu1 %vm534_vm1, %v2391_v61  ;;  %v1409_v25 = vsel %vm1011_vm5, %v985_v49, 0  ;;  %5013 = vmatprep.mubr.msk.f32.mxu1 %vm534_vm1, %v5416_v50  ;;  %v2389_v50 = vsel %vm7667_vm0, %v5445_v57, %v5728_v34  ;;  %v2387_v57 = vsel %vm7667_vm0, %v5473_v7, %v5744_v32  ;;  %v2386_v34 = vsel %vm7667_vm0, %v5490_v18, %v5750_v12  ;;  %v929_v12 = vpop.permute.xlu0 %928 }
 0x259   : > { %4940 = vmatpush3.bf16.msra.mxu0 %v1409_v25  ;;  %v6002_v7 = vsub.f32 %v5893_v35, %v4212_v53  ;;  %v2385_v32 = vsel %vm7667_vm0, %v5482_v15, %v5746_v8  ;;  %v2384_v53 = vsel %vm7667_vm0, %v5501_v24, %v5752_v43  ;;  %v957_v15 = vsub.f32 %v5766_v47, %v929_v12 }
 0x25a   : > { %4951 = vmatprep.subr.bf16.mxu0 %v7680_v9  ;;  %v7673_v25 = vmul.u32 16, %v5763_v29 }
 0x25b   : > { %4984 = vmatpush3.xpose.msk.msra.mxu1 %vm534_vm1, %v2391_v61  ;;  %4241 = vrot.lane.b32.xlu1 %v4239_v3, %s5197_s18  ;;  %v6014_v18 = vsub.f32 1.0, %v6002_v7  ;;  %v973_v24 = vmax.f32 %v957_v15, 0.0 }
 0x25c   : > { %4985 = vmatprep.subr.msk.mxu1 %vm534_vm1, %v2390_v54  ;;  %4942 = vmatmul.mubr.msk.bf16.vlgmr.msra.gmra.mxu0 %vm1007_vm7, %v5792_v51 }
 0x25d   : > { %4953 = vmatprep.mubr.msk.bf16.mxu0 %vm7668_vm2, %v7680_v9  ;;  %v989_v30 = vpack.c.bf16 %v973_v24, %v973_v24 }
 0x25f   : > { %4986 = vmatpush3.xpose.msk.msra.mxu1 %vm534_vm1, %v2390_v54  ;;  %4251 = vrot.lane.b32.xlu1 %v4249_v55, %s5197_s18  ;;  %v1585_v39 = vsel %vm1011_vm5, %v989_v30, 0 }
 0x260   : > { %4987 = vmatprep.subr.msk.mxu1 %vm534_vm1, %v2389_v50 }
 0x263   : > { %4988 = vmatpush3.xpose.msk.msra.mxu1 %vm534_vm1, %v2389_v50  ;;  %4261 = vrot.lane.b32.xlu1 %v5910_v2, %s5198_s23 }
 0x264   : > { %4989 = vmatprep.subr.msk.mxu1 %vm534_vm1, %v2388_v17 }
 0x267   : > { %4990 = vmatpush3.xpose.msk.msra.mxu1 %vm534_vm1, %v2388_v17  ;;  %4325 = vrot.lane.b32.xlu1 %v5924_v52, %s5198_s23  ;;  %v5200_v17 = vmov 65535  }
 0x268   : > { %4991 = vmatprep.subr.msk.mxu1 %vm534_vm1, %v2387_v57 }
 0x26b   : > { %4992 = vmatpush3.xpose.msk.msra.mxu1 %vm534_vm1, %v2387_v57  ;;  %4377 = vrot.lane.b32.xlu1 %v4375_v63, %s5197_s18  ;;  %v2647_v57 = vsel %vm2645_vm15, 4294967295, %v5200_v17  ;;  %v5180_v17 = vld [vmem:[%s7652_s6 + $0x38] sm:$0xff] }
 0x26c   : > { %4993 = vmatprep.subr.msk.mxu1 %vm534_vm1, %v2386_v34 }
 0x26f   : > { %4994 = vmatpush3.xpose.msk.msra.mxu1 %vm534_vm1, %v2386_v34  ;;  %4387 = vrot.lane.b32.xlu1 %v4385_v21, %s5197_s18  ;;  %v2648_v21 = vsel %vm2646_vm3, %v2647_v57, 0  ;;  %v5181_v57 = vld [vmem:[%s7652_s6 + $0x30] sm:$0xff]  ;;  %s5138_s18 = smul.u32 48, %s7889_s22 }
 0x270   : > { %4995 = vmatprep.subr.msk.mxu1 %vm534_vm1, %v2385_v32 }
 0x272   : > { %v2340_v35 = vpop.xlane.xlu1 %2339 }
 0x273   : > { %4996 = vmatpush3.xpose.msk.msra.mxu1 %vm534_vm1, %v2385_v32  ;;  %4225 = vrot.lane.b32.xlu1 %v6014_v18, %s5198_s23  ;;  %v2380_v28 = vsel %vm7667_vm0, %v5719_v46, %v2340_v35  ;;  %v7686_v35 = vmov 0 }
 0x274   : > { %4997 = vmatprep.subr.msk.mxu1 %vm534_vm1, %v2384_v53 }
 0x276   : > { %v915_v8 = vpop.permute.xlu1 %914 }
 0x277   : > { %4998 = vmatpush3.xpose.msk.msra.mxu1 %vm534_vm1, %v2384_v53  ;;  %v955_v13 = vsub.f32 %v5766_v47, %v915_v8  ;;  %4307 = vrot.lane.b32.xlu1 %v6002_v7, %s5198_s23  ;;  %v2650_v53 = vand.u32 %v5918_v45, %v2648_v21  ;;  %v5172_v45 = vld [vmem:[%s7652_s6 + $0x70] sm:$0xff]  ;;  %v2537_v21 = vpack.c.bf16 %v5180_v17, %v5181_v57 }
 0x278   : > { %4999 = vmatprep.subr.msk.mxu1 %vm534_vm1, %v2383_v23 }
 0x279   : > { %v971_v43 = vmax.f32 %v955_v13, 0.0 }
 0x27b   : > { %v987_v0 = vpack.c.bf16 %v971_v43, %v971_v43  ;;  %5000 = vmatpush3.xpose.msk.msra.mxu1 %vm534_vm1, %v2383_v23 }
 0x27c   : > { %5001 = vmatprep.subr.msk.mxu1 %vm534_vm1, %v2382_v62 }
 0x27d   : > { %v1497_v44 = vsel %vm1011_vm5, %v987_v0, 0 }
 0x27e   : > { %4952 = vmatpush3.bf16.msra.mxu0 %v1497_v44  ;;  %v5177_v44 = vld [vmem:[%s7652_s6 + $0x50] sm:$0xff] }
 0x27f   : > { %5002 = vmatpush3.xpose.msk.msra.mxu1 %vm534_vm1, %v2382_v62  ;;  %4963 = vmatprep.subr.bf16.mxu0 %v7680_v9  ;;  %v5175_v62 = vld [vmem:[%s7652_s6 + $0x68] sm:$0xff] }
 0x280   : > { %5003 = vmatprep.subr.msk.mxu1 %vm534_vm1, %v2381_v60 }
 0x281   : > { %4954 = vmatmul.mubr.msk.bf16.vlgmr.msra.gmra.mxu0 %vm1007_vm7, %v5792_v51 }
 0x282   : > { %4964 = vmatpush3.bf16.msra.mxu0 %v1585_v39  ;;  %4965 = vmatprep.mubr.msk.bf16.mxu0 %vm7668_vm2, %v7680_v9 }
 0x283   : > { %5004 = vmatpush3.xpose.msk.msra.mxu1 %vm534_vm1, %v2381_v60  ;;  %4975 = vmatprep.subr.bf16.mxu0 %v7680_v9 }
 0x284   : > { %5005 = vmatprep.subr.msk.mxu1 %vm534_vm1, %v2380_v28 }
 0x286   : > { %v2334_v36 = vpop.xlane.xlu0 %2333 }
 0x287   : > { %5006 = vmatpush3.xpose.msk.msra.mxu1 %vm534_vm1, %v2380_v28  ;;  %v2378_v26 = vsel %vm7667_vm0, %v5733_v14, %v2334_v36  ;;  %v5178_v28 = vld [vmem:[%s7652_s6 + $0x40] sm:$0xff]  ;;  %v5179_v36 = vld [vmem:[%s7652_s6 + $0x48] sm:$0xff] }
 0x288   : > { %5007 = vmatprep.subr.msk.mxu1 %vm534_vm1, %v2379_v22 }
 0x289   : > { %4966 = vmatmul.mubr.msk.bf16.vlgmr.msra.gmra.mxu0 %vm1007_vm7, %v5792_v51 }
 0x28a   : > { %4977 = vmatprep.mubr.msk.bf16.mxu0 %vm7668_vm2, %v7680_v9 }
 0x28b   : > { %5008 = vmatpush3.xpose.msk.msra.mxu1 %vm534_vm1, %v2379_v22  ;;  %v2538_v22 = vpack.c.bf16 %v5179_v36, %v5178_v28  ;;  %v7675_v28 = vmul.u32 16, %v5924_v52 }
 0x28c   : > { %5009 = vmatprep.subr.msk.mxu1 %vm534_vm1, %v2378_v26 }
 0x28e   : > { %v6068_v49 = vpop.permute.xlu0 %2544 }
 0x28f   : > { %5010 = vmatpush3.xpose.msk.msra.mxu1 %vm534_vm1, %v2378_v26 }
 0x292   : > { %v6071_v31 = vpop.permute.xlu0 %4243 }
 0x296   : > { %v6073_v61 = vpop.permute.xlu0 %4253 }
 0x29a   : > { %v6076_v3 = vpop.permute.xlu0 %4263 }
 0x29b   : > { %v4266_v54 = vadd.s32 %v6076_v3, %v7673_v25 }
 0x29d   : > { %4271 = vperm.xlu0 %5161, %v4266_v54   ;;  %v2591_v54 = vsel %vm2574_vm9, %v2538_v22, 0 }
 0x29e   : > { %v6081_v55 = vpop.permute.xlu0 %4327 }
 0x2a2   : > { %v6083_v50 = vpop.permute.xlu0 %4379 }
 0x2a3   : > { %vm7671_vm11 = vcmp.ne.s32.totalorder %v6083_v50, 0 }
 0x2a4   : > { %vm4444_vm13 = vmand %vm6089_vm10, %vm7671_vm11 }
 0x2a6   : > { %v6098_v34 = vpop.permute.xlu0 %4389 }
 0x2a7   : > { %v2331_v32 = vpop.xlane.xlu1 %2330  ;;  %vm7670_vm15 = vcmp.ne.s32.totalorder %v6098_v34, 0 }
 0x2a8   : > { %v2377_v12 = vsel %vm7667_vm0, %v5777_v16, %v2331_v32  ;;  %vm6105_vm8 = vmand %vm4444_vm13, %vm7670_vm15 }
 0x2a9   : > { %v7687_v35 = vsel %vm6105_vm8, 4294967295, %v7686_v35  ;;  %5011 = vmatprep.subr.msk.mxu1 %vm534_vm1, %v2377_v12 }
 0x2aa   : > { %5012 = vmatpush3.xpose.msk.msra.mxu1 %vm534_vm1, %v2377_v12  ;;  %v2588_v12 = vsel %vm2574_vm9, %v2537_v21, 0  ;;  %v6226_v63 = vpop.permute.xlu0 %4227 }
 0x2ab   : > { %v943_v15 = vpop.permute.xlu1 %942  ;;  %5036 = vmatprep.subr.bf16.mxu1 %v7680_v9 }
 0x2ac   : > { %v959_v8 = vsub.f32 %v5766_v47, %v943_v15  ;;  %v5173_v47 = vld [vmem:[%s7652_s6 + $0x78] sm:$0xff] }
 0x2ad   : > { %5014 = vmatmul.mubr.msk.f32.vlgmr.msra.gmra.mxu1 %vm534_vm1, %v5634_v40  ;;  %v2541_v24 = vpack.c.bf16 %v5173_v47, %v5172_v45  ;;  %vm6176_vm1 = vmand %vm4234_vm4, %vm4236_vm6  ;;  %vm4256_vm6 = vcmp.ne.s32.totalorder %v6073_v61, 0 }
 0x2ae   : > { %v975_v23 = vmax.f32 %v959_v8, 0.0  ;;  %5037 = vmatpush3.bf16.msra.mxu1 %v2650_v53  ;;  %5038 = vmatprep.mubr.msk.bf16.mxu1 %vm7668_vm2, %v7680_v9 }
 0x2af   : > { %5048 = vmatprep.subr.bf16.mxu1 %v7680_v9  ;;  %v2600_v43 = vsel %vm2574_vm9, %v2541_v24, 0  ;;  %v439_v24 = vld [vmem:[%s7651_s5] sm:$0xff] }
 0x2b0   : > { %v991_v13 = vpack.c.bf16 %v975_v23, %v975_v23  ;;  %v5182_v23 = vld [vmem:[%s7652_s6 + $0x20] sm:$0xff] }
 0x2b1   : > { %5039 = vmatmul.mubr.msk.bf16.vlgmr.msra.gmra.mxu1 %vm2574_vm9, %v5645_v41  ;;  %v5174_v41 = vld [vmem:[%s7652_s6 + $0x60] sm:$0xff] }
 0x2b2   : > { %v1673_v40 = vsel %vm1011_vm5, %v991_v13, 0  ;;  %5050 = vmatprep.mubr.msk.bf16.mxu1 %vm7668_vm2, %v7680_v9  ;;  %v2540_v0 = vpack.c.bf16 %v5175_v62, %v5174_v41  ;;  %vm4246_vm5 = vcmp.ne.s32.totalorder %v6071_v31, 0  ;;  %v5183_v13 = vld [vmem:[%s7652_s6 + $0x28] sm:$0xff]  ;;  %v2535_v31 = vpack.c.bf16 %v5719_v46, %v5700_v42 }
 0x2b3   : > { %4976 = vmatpush3.bf16.msra.mxu0 %v1673_v40  ;;  %vm4248_vm4 = vmand %vm6176_vm1, %vm4246_vm5  ;;  %v2536_v45 = vpack.c.bf16 %v5183_v13, %v5182_v23 }
 0x2b4   : > { %5016 = vmatprep.subr.bf16.mxu0 %v7680_v9  ;;  %v2597_v30 = vsel %vm2574_vm9, %v2540_v0, 0  ;;  %vm4322_vm8 = vmand %vm6089_vm10, %vm4246_vm5  ;;  %v7674_v0 = vmul.u32 16, %v5910_v2  ;;  %vm7695_vm10 = vcmp.ne.s32.totalorder %v6083_v50, 0  ;;  %v4232_v50 = vmul.f32 %v6226_v63, %v5851_v38 }
 0x2b5   : > { %v6159_v26 = vpop.trf.xlu1  ;;  %v2585_v40 = vsel %vm2574_vm9, %v2536_v45, 0 }
 0x2b6   : > { %4978 = vmatmul.mubr.msk.bf16.vlgmr.msra.gmra.mxu0 %vm1007_vm7, %v5792_v51  ;;  %v5176_v51 = vld [vmem:[%s7652_s6 + $0x58] sm:$0xff]  ;;  %vm7690_vm7 = vcmp.ge.s32.totalorder %v5910_v2, 0 }
 0x2b7   : > { %5017 = vmatpush3.bf16.xpose.msra.mxu0 %v2600_v43  ;;  %5032 = vmatprep.mubr.msk.bf16.mxu0 %vm7668_vm2, %v7680_v9  ;;  %v2539_v60 = vpack.c.bf16 %v5176_v51, %v5177_v44  ;;  %vm6185_vm13 = vmand %vm7690_vm7, %vm4235_vm14 }
 0x2b8   : > { %5018 = vmatprep.subr.bf16.mxu0 %v7680_v9  ;;  %vm4258_vm2 = vmand %vm4248_vm4, %vm4256_vm6 }
 0x2b9   : > { %v2594_v39 = vsel %vm2574_vm9, %v2539_v60, 0 }
 0x2bf   : > { %5019 = vmatpush3.bf16.xpose.msra.mxu0 %v2597_v30  ;;  %v4278_v30 = vsel %vm4258_vm2, 1, %v7683_v1  ;;  %vm7696_vm2 = vcmp.ne.s32.totalorder %v6098_v34, 0 }
 0x2c0   : > { %5020 = vmatprep.subr.bf16.mxu0 %v7680_v9 }
 0x2c7   : > { %5021 = vmatpush3.bf16.xpose.msra.mxu0 %v2594_v39  ;;  %v2582_v39 = vsel %vm2574_vm9, %v2535_v31, 0 }
 0x2c8   : > { %5022 = vmatprep.subr.bf16.mxu0 %v7680_v9 }
 0x2cf   : > { %5023 = vmatpush3.bf16.xpose.msra.mxu0 %v2591_v54  ;;  %v2534_v54 = vpack.c.bf16 %v5733_v14, %v5777_v16 }
 0x2d0   : > { %5024 = vmatprep.subr.bf16.mxu0 %v7680_v9 }
 0x2d1   : > { %v2579_v34 = vsel %vm2574_vm9, %v2534_v54, 0 }
 0x2d2   : > { %v6169_v32 = vpop.permute.xlu1 %2549 }
 0x2d6   : > { %v4242_v15 = vpop.permute.xlu1 %4241 }
 0x2d7   : > { %vm4245_vm3 = vcmp.ne.s32.totalorder %v4242_v15, 0  ;;  %5025 = vmatpush3.bf16.xpose.msra.mxu0 %v2588_v12 }
 0x2d8   : > { %5026 = vmatprep.subr.bf16.mxu0 %v7680_v9  ;;  %vm4321_vm14 = vmand %vm5934_vm12, %vm4245_vm3 }
 0x2d9   : > { %vm4247_vm7 = vmand %vm6185_vm13, %vm4245_vm3  ;;  %vm7677_vm3 = vcmask 130048  }
 0x2da   : > { %v4252_v47 = vpop.permute.xlu1 %4251 }
 0x2db   : > { %vm4255_vm0 = vcmp.ne.s32.totalorder %v4252_v47, 0 }
 0x2dc   : > { %vm6207_vm15 = vmand %vm4321_vm14, %vm4255_vm0 }
 0x2dd   : > { %vm4257_vm11 = vmand %vm4247_vm7, %vm4255_vm0 }
 0x2de   : > { %v4277_v43 = vsel %vm4257_vm11, 1, %v7683_v1  ;;  %v6217_v41 = vpop.permute.xlu1 %4261  ;;  %v6219_v62 = vpop.f32.mrf.mxu1  ;;  %vm4324_vm0 = vmand %vm4322_vm8, %vm4256_vm6 }
 0x2df   : > { %4280 = vperm.xlu1 %5159, %v4277_v43   ;;  %5027 = vmatpush3.bf16.xpose.msra.mxu0 %v2585_v40  ;;  %vm4384_vm11 = vmand %vm6176_vm1, %vm7695_vm10  ;;  %v4342_v46 = vsel %vm4324_vm0, 1, %v7683_v1  ;;  %v4397_v57 = vadd.s32 %v7675_v28, %v6217_v41  ;;  %vm7699_vm1 = vmmov 0  }
 0x2e0   : > { %5028 = vmatprep.subr.bf16.mxu0 %v7680_v9  ;;  %v4889_v51 = vpop.f32.mrf.mxu1  ;;  %vm4394_vm8 = vmand %vm4384_vm11, %vm7696_vm2  ;;  %v6266_v23 = vpop.f32.mrf.mxu0 }
 0x2e1   : > { %v4410_v22 = vsel %vm4394_vm8, 1, %v7683_v1 }
 0x2e2   : > { %v6234_v44 = vpop.permute.xlu1 %4325  ;;  %v6236_v60 = vpop.f32.mrf.mxu1 }
 0x2e3   : > { %4283 = vperm.xlu1 %5159, %v4278_v30   ;;  %v4329_v42 = vadd.s32 %v6234_v44, %v7674_v0  ;;  %v4895_v45 = vpop.f32.mrf.mxu0 }
 0x2e4   : > { %v4890_v61 = vpop.f32.mrf.mxu1 }
 0x2e5   : > { %4332 = vperm.xlu0 %5161, %v4329_v42   ;;  %v6274_v40 = vpop.f32.mrf.mxu0 }
 0x2e6   : > { %v6248_v36 = vpop.f32.mrf.mxu1 }
 0x2e7   : > { %4347 = vperm.xlu1 %5159, %v4342_v46   ;;  %5029 = vmatpush3.bf16.xpose.msra.mxu0 %v2582_v39  ;;  %v4896_v30 = vpop.f32.mrf.mxu0 }
 0x2e8   : > { %5030 = vmatprep.subr.bf16.mxu0 %v7680_v9  ;;  %v4901_v17 = vpop.f32.mrf.mxu1 }
 0x2e9   : > { %4298 = vperm.xlu0 %5161, %v4232_v50  }
 0x2ea   : > { %v6257_v21 = vpop.f32.mrf.mxu1 }
 0x2eb   : > { %4415 = vperm.xlu1 %5159, %v4410_v22  }
 0x2ec   : > { %v4902_v12 = vpop.f32.mrf.mxu1 }
 0x2ed   : > { %4400 = vperm.xlu0 %5161, %v4397_v57  }
 0x2ee   : > { %v6260_v53 = vpop.f32.mrf.mxu1  ;;  %v6278_v51 = vpop.f32.mrf.mxu0 }
 0x2ef   : > { %7697 = vst [vmem:[#allocation3_spill] sm:$0xff] %v6260_v53  ;;  %5031 = vmatpush3.bf16.xpose.msra.mxu0 %v2579_v34  ;;  %5162 = vset.pattern.permute.xlu1 %v7672_v58 }
 0x2f0   : > { %v4913_v15 = vpop.f32.mrf.mxu1  ;;  %5042 = vmatprep.subr.bf16.mxu0 %v7680_v9  ;;  %v4907_v46 = vpop.f32.mrf.mxu0 }
 0x2f2   : > { %v6264_v14 = vpop.f32.mrf.mxu1 }
 0x2f4   : > { %v4914_v16 = vpop.f32.mrf.mxu1 }
 0x2f6   : > { %5033 = vmatmul.mubr.msk.bf16.vlgmr.msra.gmra.mxu0 %vm2574_vm9, %v6159_v26  ;;  %v6270_v13 = vpop.f32.mrf.mxu1  ;;  %v6282_v26 = vpop.f32.mrf.mxu0  ;;  %vm7717_vm9 = vcmask 23552  }
 0x2f7   : > { %7698 = vst [vmem:[#allocation4_spill] sm:$0xff] %v6270_v13  ;;  %5044 = vmatprep.mubr.msk.bf16.mxu0 %vm7699_vm1, %v7680_v9  ;;  %vm7718_vm5 = vmmov %vm7717_vm9 }
 0x2f8   : > { %v4925_v47 = vpop.f32.mrf.mxu1  ;;  %v4908_v50 = vpop.f32.mrf.mxu0 }
 0x2fa   : > { %v6276_v43 = vpop.f32.mrf.mxu1  ;;  %v6286_v54 = vpop.f32.mrf.mxu0 }
 0x2fb   : > { %7700 = vst [vmem:[#allocation5_spill] sm:$0xff] %v6276_v43  ;;  %7702 = vst [vmem:[#allocation7_spill] sm:$0xff] %v6286_v54 }
 0x2fc   : > { %v4926_v31 = vpop.f32.mrf.mxu1  ;;  %v4919_v57 = vpop.f32.mrf.mxu0 }
 0x2fe   : > { %v6280_v42 = vpop.f32.mrf.mxu1  ;;  %v6290_v12 = vpop.f32.mrf.mxu0 }
 0x2ff   : > { %7701 = vst [vmem:[#allocation6_spill] sm:$0xff] %v6280_v42 }
 0x300   : > { %v4937_v39 = vpop.f32.mrf.mxu1  ;;  %v4920_v16 = vpop.f32.mrf.mxu0 }
 0x302   : > { %v6284_v61 = vpop.f32.mrf.mxu1  ;;  %v6294_v47 = vpop.f32.mrf.mxu0 }
 0x303   : > { %7704 = vst [vmem:[#allocation9_spill] sm:$0xff] %v6294_v47 }
 0x304   : > { %v4938_v22 = vpop.f32.mrf.mxu1  ;;  %v4931_v31 = vpop.f32.mrf.mxu0 }
 0x306   : > { %v6288_v17 = vpop.f32.mrf.mxu1  ;;  %v6298_v39 = vpop.f32.mrf.mxu0 }
 0x307   : > { %7703 = vst [vmem:[#allocation8_spill] sm:$0xff] %v6288_v17  ;;  %7706 = vst [vmem:[#allocation11_spill] sm:$0xff] %v6298_v39 }
 0x308   : > { %v4949_v34 = vpop.f32.mrf.mxu1  ;;  %v4932_v22 = vpop.f32.mrf.mxu0 }
 0x30a   : > { %v6292_v15 = vpop.f32.mrf.mxu1 }
 0x30c   : > { %v4950_v45 = vpop.f32.mrf.mxu1 }
 0x30e   : > { %v6296_v30 = vpop.f32.mrf.mxu1 }
 0x30f   : > { %7705 = vst [vmem:[#allocation10_spill] sm:$0xff] %v6296_v30 }
 0x310   : > { %v4961_v46 = vpop.f32.mrf.mxu1 }
 0x312   : > { %v6300_v50 = vpop.f32.mrf.mxu1 }
 0x313   : > { %7707 = vst [vmem:[#allocation12_spill] sm:$0xff] %v6300_v50  ;;  %v7720_v50 = vmul.u32 16, %v5763_v29  ;;  %v6401_v29 = vld [vmem:[%s7655_s9] sm:$0xff]  }
 0x314   : > { %v4962_v58 = vpop.f32.mrf.mxu1 }
 0x315   : > { %v4330_v42 = vadd.s32 %v6081_v55, %v7720_v50 }
 0x316   : > { %v6302_v57 = vpop.f32.mrf.mxu1 }
 0x317   : > { %7708 = vst [vmem:[#allocation13_spill] sm:$0xff] %v6302_v57 }
 0x318   : > { %v4973_v34 = vpop.f32.mrf.mxu1 }
 0x31a   : > { %v6304_v25 = vpop.f32.mrf.mxu1 }
 0x31b   : > { %7709 = vst [vmem:[#allocation14_spill] sm:$0xff] %v6304_v25 }
 0x31c   : > { %v4974_v0 = vpop.f32.mrf.mxu1  ;;  %v6306_v16 = vpop.f32.mrf.mxu0 }
 0x31d   : > { %7710 = vst [vmem:[#allocation15_spill] sm:$0xff] %v6306_v16 }
 0x31e   : > { %v4943_v45 = vpop.f32.mrf.mxu0 }
 0x320   : > { %v6308_v28 = vpop.f32.mrf.mxu0 }
 0x322   : > { %v4944_v47 = vpop.f32.mrf.mxu0 }
 0x341   : > { %v6310_v31 = vpop.f32.mrf.mxu0 }
 0x342   : > { %7711 = vst [vmem:[#allocation16_spill] sm:$0xff] %v6310_v31 }
 0x343   : > { %v4955_v46 = vpop.f32.mrf.mxu0 }
 0x345   : > { %v6312_v30 = vpop.f32.mrf.mxu0 }
 0x347   : > { %v4956_v13 = vpop.f32.mrf.mxu0 }
 0x349   : > { %v6314_v22 = vpop.f32.mrf.mxu0 }
 0x34a   : > { %7712 = vst [vmem:[#allocation17_spill] sm:$0xff] %v6314_v22 }
 0x34b   : > { %v4967_v58 = vpop.f32.mrf.mxu0 }
 0x34d   : > { %v6316_v57 = vpop.f32.mrf.mxu0 }
 0x34e   : > { %7713 = vst [vmem:[#allocation18_spill] sm:$0xff] %v6316_v57 }
 0x34f   : > { %v4968_v34 = vpop.f32.mrf.mxu0 }
 0x36d   : > { %v6318_v54 = vpop.f32.mrf.mxu1 }
 0x36f   : > { %v6320_v0 = vpop.f32.mrf.mxu1 }
 0x371   : > { %v2686_v45 = vpop.f32.mrf.mxu1 }
 0x372   : > { %v2696_v25 = vrot.slane %v2686_v45, %v5660_v5  ;;  %v2707_v47 = vrot.slane %v2686_v45, %v5663_v10  ;;  %v2718_v13 = vrot.slane %v2686_v45, %v5673_v20  ;;  %v2729_v17 = vrot.slane %v2686_v45, %v5688_v33 }
 0x373   : > { %v5040_v31 = vpop.f32.mrf.mxu1  ;;  %v2751_v39 = vrot.slane %v2686_v45, %v5670_v19 }
 0x374   : > { %2698 = vbcast.lane.b32.xlu1 %v2696_v25, 256  ;;  %2713 = vbcast.lane.b32.xlu0 %v2707_v47, 264  ;;  %v2740_v31 = vrot.slane %v2686_v45, %v5680_v27 }
 0x375   : > { %v2689_v46 = vpop.f32.mrf.mxu1 }
 0x376   : > { %v6325_v22 = vpop.f32.mrf.mxu0 }
 0x377   : > { %7714 = vst [vmem:[#allocation19_spill] sm:$0xff] %v6325_v22  ;;  %v5041_v58 = vpop.f32.mrf.mxu1 }
 0x378   : > { %2702 = vbcast.lane.b32.xlu1 %v2696_v25, 264  ;;  %2724 = vbcast.lane.b32.xlu0 %v2718_v13, 264  ;;  %v4979_v34 = vpop.f32.mrf.mxu0  ;;  %v2762_v58 = vrot.slane %v2686_v45, %v5684_v6  ;;  %v2773_v25 = vrot.slane %v2686_v45, %v5692_v37 }
 0x379   : > { %v6338_v34 = vpop.permute.xlu1 %4377 }
 0x37a   : > { %v6328_v57 = vpop.f32.mrf.mxu0  ;;  %vm4381_vm4 = vcmp.ne.s32.totalorder %v6338_v34, 0  ;;  %v2312_v34 = vld [vmem:[%s7656_s10 + $0x8] sm:$0xff] }
 0x37b   : > { %7715 = vst [vmem:[#allocation20_spill] sm:$0xff] %v6328_v57  ;;  %vm4383_vm6 = vmand %vm6185_vm13, %vm4381_vm4  ;;  %vm7722_vm13 = vnez %v7687_v35 }
 0x37c   : > { %2709 = vbcast.lane.b32.xlu1 %v2707_v47, 256  ;;  %2735 = vbcast.lane.b32.xlu0 %v2729_v17, 264  ;;  %v4980_v53 = vpop.f32.mrf.mxu0  ;;  %v2784_v47 = vrot.slane %v2689_v46, %v5660_v5  ;;  %vm4443_vm0 = vmand %vm5934_vm12, %vm4381_vm4  ;;  %v4460_v8 = vsel %vm7722_vm13, 1, %v7683_v1 }
 0x37d   : > { %v2795_v53 = vrot.slane %v2689_v46, %v5663_v10  ;;  %v6341_v45 = vpop.permute.xlu1 %4387  ;;  %v2839_v10 = vrot.slane %v2689_v46, %v5670_v19 }
 0x37e   : > { %vm4391_vm14 = vcmp.ne.s32.totalorder %v6341_v45, 0 }
 0x37f   : > { %vm4393_vm7 = vmand %vm4383_vm6, %vm4391_vm14 }
 0x380   : > { %2720 = vbcast.lane.b32.xlu1 %v2718_v13, 256  ;;  %2746 = vbcast.lane.b32.xlu0 %v2740_v31, 264  ;;  %v2806_v13 = vrot.slane %v2689_v46, %v5673_v20  ;;  %v2850_v20 = vrot.slane %v2689_v46, %v5684_v6  ;;  %vm4445_vm10 = vmand %vm4443_vm0, %vm4391_vm14 }
 0x384   : > { %2731 = vbcast.lane.b32.xlu1 %v2729_v17, 256  ;;  %2757 = vbcast.lane.b32.xlu0 %v2751_v39, 264  ;;  %v2817_v17 = vrot.slane %v2689_v46, %v5688_v33  ;;  %v7716_v33 = vmul.u32 16, %v5924_v52 }
 0x386   : > { %v4447_v19 = vadd.s32 %v7716_v33, %v6234_v44 }
 0x388   : > { %2742 = vbcast.lane.b32.xlu1 %v2740_v31, 256  ;;  %2768 = vbcast.lane.b32.xlu0 %v2762_v58, 264  ;;  %v4226_v31 = vpop.permute.xlu1 %4225 }
 0x38c   : > { %2753 = vbcast.lane.b32.xlu1 %v2751_v39, 256  ;;  %2779 = vbcast.lane.b32.xlu0 %v2773_v25, 264  ;;  %v2828_v39 = vrot.slane %v2689_v46, %v5680_v27  ;;  %v4374_v27 = vmul.f32 %v6226_v63, %v5841_v59  ;;  %v6357_v52 = vpop.permute.xlu1 %4307 }
 0x390   : > { %2764 = vbcast.lane.b32.xlu1 %v2762_v58, 256  ;;  %2790 = vbcast.lane.b32.xlu0 %v2784_v47, 264  ;;  %v4373_v58 = vmul.f32 %v4226_v31, %v6002_v7  ;;  %v6361_v44 = vpop.permute.xlu1 %4280 }
 0x394   : > { %2775 = vbcast.lane.b32.xlu1 %v2773_v25, 256  ;;  %2801 = vbcast.lane.b32.xlu0 %v2795_v53, 264  ;;  %v2861_v25 = vrot.slane %v2689_v46, %v5692_v37  ;;  %v6359_v37 = vpop.permute.xlu0 %4309  ;;  %v5184_v46 = vld [vmem:[%s5409_s27] sm:$0xff]  ;;  %v6368_v33 = vpop.permute.xlu1 %4283 }
 0x398   : > { %2786 = vbcast.lane.b32.xlu1 %v2784_v47, 256  ;;  %2812 = vbcast.lane.b32.xlu0 %v2806_v13, 264  ;;  %v7676_v47 = vmul.u32 16, %v5812_v48 }
 0x39a   : > { %v4448_v63 = vadd.s32 %v7676_v47, %v6081_v55 }
 0x39c   : > { %2797 = vbcast.lane.b32.xlu1 %v2795_v53, 256  ;;  %2823 = vbcast.lane.b32.xlu0 %v2817_v17, 264 }
 0x3a0   : > { %2808 = vbcast.lane.b32.xlu1 %v2806_v13, 256  ;;  %2834 = vbcast.lane.b32.xlu0 %v2828_v39, 264 }
 0x3a4   : > { %2819 = vbcast.lane.b32.xlu1 %v2817_v17, 256  ;;  %2845 = vbcast.lane.b32.xlu0 %v2839_v10, 264 }
 0x3a8   : > { %2830 = vbcast.lane.b32.xlu1 %v2828_v39, 256  ;;  %2856 = vbcast.lane.b32.xlu0 %v2850_v20, 264  ;;  %v526_v39 = vmul.f32 %v5184_v46, %v5184_v46 }
 0x3ac   : > { %2841 = vbcast.lane.b32.xlu1 %v2839_v10, 256  ;;  %4425 = vperm.xlu0 %5161, %v4373_v58   ;;  %v6364_v10 = vpop.permute.xlu0 %4271 }
 0x3b0   : > { %2852 = vbcast.lane.b32.xlu1 %v2850_v20, 256  ;;  %4430 = vperm.xlu0 %5161, %v4374_v27   ;;  %v5185_v20 = vld [vmem:[%s5409_s27 + $0x8] sm:$0xff]  ;;  %v528_v27 = vsel %vm7717_vm9, %v526_v39, 0.0  ;;  %v7719_v39 = vmul.u32 16, %v5910_v2  ;;  %s7611_s27 = scalar_lea.vmem %s7658_s12, %s5138_s18 }
 0x3b1   : > { %v527_v58 = vmul.f32 %v5185_v20, %v5185_v20 }
 0x3b2   : > { %v4265_v22 = vadd.s32 %v6217_v41, %v7719_v39 }
 0x3b4   : > { %2863 = vbcast.lane.b32.xlu1 %v2861_v25, 256  ;;  %4450 = vperm.xlu0 %5161, %v4447_v19   ;;  %v6370_v19 = vpop.permute.xlu0 %4332 }
 0x3b6   : > { %v2636_v6 = vpop.f32.mrf.mxu0 }
 0x3b7   : > { %v6385_v57 = vadd.f32 %v2636_v6, %v6068_v49 }
 0x3b8   : > { %2867 = vbcast.lane.b32.xlu0 %v2861_v25, 264  ;;  %v5034_v53 = vpop.f32.mrf.mxu0  ;;  %v531_v25 = vsel %vm7718_vm5, %v527_v58, 0.0 }
 0x3b9   : > { %v6373_v53 = vpop.permute.xlu1 %4347 }
 0x3ba   : > { %v2639_v13 = vpop.f32.mrf.mxu0  ;;  %vm4350_vm13 = vcmp.eq.s32.totalorder %v6373_v53, 1 }
 0x3bb   : > { %v6388_v58 = vadd.f32 %v2639_v13, %v6169_v32  ;;  %v4231_v32 = vmul.f32 %v4226_v31, %v6014_v18  ;;  %v4313_v31 = vmul.f32 %v6357_v52, %v6014_v18  ;;  %v4314_v18 = vmul.f32 %v6359_v37, %v5851_v38 }
 0x3bc   : > { %4453 = vperm.xlu0 %5161, %v4448_v63   ;;  %v5035_v17 = vpop.f32.mrf.mxu0  ;;  %v6375_v63 = vpop.permute.xlu0 %4298  ;;  %v7721_v38 = vmul.u32 16, %v5812_v48  ;;  %v4441_v48 = vmul.f32 %v6357_v52, %v6002_v7  ;;  %v4442_v7 = vmul.f32 %v6359_v37, %v5841_v59 }
 0x3bd   : > { %v6377_v17 = vpop.permute.xlu1 %4415 }
 0x3c0   : > { %5163 = vset.pattern.permute.xlu0 %v7683_v1  ;;  %v6379_v46 = vpop.permute.xlu0 %4400 }
 0x3d8   : > { %529 = vadd.xlane.f32.xlu1 %v528_v27 }
 0x3db   : > { %532 = vadd.xlane.f32.xlu0 %v531_v25 }
 0x3e6   : > { %v2714_v47 = vpop.permute.xlu0 %2713  ;;  %v2699_v20 = vpop.permute.xlu1 %2698 }
 0x3e7   : > { %v2869_v27 = vsub.f32 %v6385_v57, %v2699_v20  ;;  %v2872_v2 = vsub.f32 %v6388_v58, %v2714_v47 }
 0x3e9   : > { %4268 = vperm.xlu1 %5162, %v4265_v22   ;;  %v2901_v41 = vmax.f32 %v2869_v27, 0.0  ;;  %v2904_v55 = vmax.f32 %v2872_v2, 0.0 }
 0x3ea   : > { %v2725_v25 = vpop.permute.xlu0 %2724  ;;  %v2703_v16 = vpop.permute.xlu1 %2702 }
 0x3eb   : > { %v2870_v43 = vsub.f32 %v6388_v58, %v2703_v16  ;;  %v2874_v50 = vsub.f32 %v6388_v58, %v2725_v25 }
 0x3ed   : > { %v2902_v39 = vmax.f32 %v2870_v43, 0.0  ;;  %4335 = vperm.xlu1 %5162, %v4330_v42   ;;  %v2906_v27 = vmax.f32 %v2874_v50, 0.0 }
 0x3ee   : > { %v2736_v49 = vpop.permute.xlu0 %2735  ;;  %v2710_v6 = vpop.permute.xlu1 %2709 }
 0x3ef   : > { %v2933_v13 = vpack.c.bf16 %v2902_v39, %v2901_v41  ;;  %v2871_v22 = vsub.f32 %v6385_v57, %v2710_v6  ;;  %v2876_v25 = vsub.f32 %v6388_v58, %v2736_v49 }
 0x3f1   : > { %v2903_v16 = vmax.f32 %v2871_v22, 0.0  ;;  %4293 = vperm.xlu1 %5162, %v4231_v32   ;;  %5043 = vmatpush3.bf16.msra.mxu0 %v2933_v13  ;;  %v2908_v49 = vmax.f32 %v2876_v25, 0.0 }
 0x3f2   : > { %v2747_v43 = vpop.permute.xlu0 %2746  ;;  %v2721_v42 = vpop.permute.xlu1 %2720  ;;  %5054 = vmatprep.subr.bf16.mxu0 %v7680_v9 }
 0x3f3   : > { %v2934_v47 = vpack.c.bf16 %v2904_v55, %v2903_v16  ;;  %v2873_v20 = vsub.f32 %v6385_v57, %v2721_v42  ;;  %v2878_v13 = vsub.f32 %v6388_v58, %v2747_v43  ;;  %v4398_v16 = vadd.s32 %v7721_v38, %v6076_v3 }
 0x3f4   : > { %5045 = vmatmul.mubr.msk.bf16.vlgmr.msra.gmra.mxu0 %vm7677_vm3, %v6401_v29 }
 0x3f5   : > { %v2905_v2 = vmax.f32 %v2873_v20, 0.0  ;;  %4357 = vperm.xlu1 %5162, %v4313_v31   ;;  %5049 = vmatpush3.bf16.msra.mxu1 %v2934_v47  ;;  %v2910_v43 = vmax.f32 %v2878_v13, 0.0 }
 0x3f6   : > { %v2758_v41 = vpop.permute.xlu0 %2757  ;;  %v2732_v39 = vpop.permute.xlu1 %2731  ;;  %5060 = vmatprep.subr.bf16.mxu1 %v7680_v9  ;;  %5056 = vmatprep.mubr.msk.bf16.mxu0 %vm7699_vm1, %v7680_v9 }
 0x3f7   : > { %v2935_v6 = vpack.c.bf16 %v2906_v27, %v2905_v2  ;;  %v2875_v32 = vsub.f32 %v6385_v57, %v2732_v39  ;;  %v2880_v47 = vsub.f32 %v6388_v58, %v2758_v41 }
 0x3f8   : > { %5051 = vmatmul.mubr.msk.bf16.vlgmr.msra.gmra.mxu1 %vm7677_vm3, %v6401_v29 }
 0x3f9   : > { %v2907_v22 = vmax.f32 %v2875_v32, 0.0  ;;  %4362 = vperm.xlu1 %5162, %v4314_v18   ;;  %5055 = vmatpush3.bf16.msra.mxu0 %v2935_v6  ;;  %v2912_v41 = vmax.f32 %v2880_v47, 0.0 }
 0x3fa   : > { %v2769_v55 = vpop.permute.xlu0 %2768  ;;  %v2743_v50 = vpop.permute.xlu1 %2742  ;;  %5066 = vmatprep.subr.bf16.mxu0 %v7680_v9  ;;  %5062 = vmatprep.mubr.msk.bf16.mxu1 %vm7699_vm1, %v7680_v9 }
 0x3fb   : > { %v2936_v42 = vpack.c.bf16 %v2908_v49, %v2907_v22  ;;  %v2877_v31 = vsub.f32 %v6385_v57, %v2743_v50  ;;  %v2882_v39 = vsub.f32 %v6388_v58, %v2769_v55 }
 0x3fc   : > { %5057 = vmatmul.mubr.msk.bf16.vlgmr.msra.gmra.mxu0 %vm7677_vm3, %v6401_v29 }
 0x3fd   : > { %v2909_v20 = vmax.f32 %v2877_v31, 0.0  ;;  %4403 = vperm.xlu1 %5162, %v4398_v16   ;;  %5061 = vmatpush3.bf16.msra.mxu1 %v2936_v42  ;;  %v2914_v13 = vmax.f32 %v2882_v39, 0.0 }
 0x3fe   : > { %v2780_v27 = vpop.permute.xlu0 %2779  ;;  %v2754_v25 = vpop.permute.xlu1 %2753  ;;  %5072 = vmatprep.subr.bf16.mxu1 %v7680_v9  ;;  %5068 = vmatprep.mubr.msk.bf16.mxu0 %vm7699_vm1, %v7680_v9 }
 0x3ff   : > { %v2937_v3 = vpack.c.bf16 %v2910_v43, %v2909_v20  ;;  %v2879_v2 = vsub.f32 %v6385_v57, %v2754_v25  ;;  %v2884_v22 = vsub.f32 %v6388_v58, %v2780_v27 }
 0x400   : > { %5063 = vmatmul.mubr.msk.bf16.vlgmr.msra.gmra.mxu1 %vm7677_vm3, %v6401_v29 }
 0x401   : > { %v2911_v18 = vmax.f32 %v2879_v2, 0.0  ;;  %4475 = vperm.xlu1 %5162, %v4441_v48   ;;  %5067 = vmatpush3.bf16.msra.mxu0 %v2937_v3  ;;  %v2916_v16 = vmax.f32 %v2884_v22, 0.0 }
 0x402   : > { %v2791_v6 = vpop.permute.xlu0 %2790  ;;  %v2765_v32 = vpop.permute.xlu1 %2764  ;;  %5078 = vmatprep.subr.bf16.mxu0 %v7680_v9  ;;  %5074 = vmatprep.mubr.msk.bf16.mxu1 %vm7699_vm1, %v7680_v9 }
 0x403   : > { %v2938_v52 = vpack.c.bf16 %v2912_v41, %v2911_v18  ;;  %v2881_v49 = vsub.f32 %v6385_v57, %v2765_v32  ;;  %v2886_v42 = vsub.f32 %v6388_v58, %v2791_v6 }
 0x404   : > { %5069 = vmatmul.mubr.msk.bf16.vlgmr.msra.gmra.mxu0 %vm7677_vm3, %v6401_v29 }
 0x405   : > { %v2913_v55 = vmax.f32 %v2881_v49, 0.0  ;;  %4480 = vperm.xlu1 %5162, %v4442_v7   ;;  %5073 = vmatpush3.bf16.msra.mxu1 %v2938_v52  ;;  %v2918_v25 = vmax.f32 %v2886_v42, 0.0 }
 0x406   : > { %v2802_v50 = vpop.permute.xlu0 %2801  ;;  %v2776_v38 = vpop.permute.xlu1 %2775  ;;  %5084 = vmatprep.subr.bf16.mxu1 %v7680_v9  ;;  %5080 = vmatprep.mubr.msk.bf16.mxu0 %vm7699_vm1, %v7680_v9 }
 0x407   : > { %v2939_v59 = vpack.c.bf16 %v2914_v13, %v2913_v55  ;;  %v2883_v37 = vsub.f32 %v6385_v57, %v2776_v38  ;;  %v2888_v48 = vsub.f32 %v6388_v58, %v2802_v50 }
 0x408   : > { %5075 = vmatmul.mubr.msk.bf16.vlgmr.msra.gmra.mxu1 %vm7677_vm3, %v6401_v29 }
 0x409   : > { %v2915_v31 = vmax.f32 %v2883_v37, 0.0  ;;  %5079 = vmatpush3.bf16.msra.mxu0 %v2939_v59  ;;  %5086 = vmatprep.mubr.msk.bf16.mxu1 %vm7699_vm1, %v7680_v9  ;;  %v2920_v6 = vmax.f32 %v2888_v48, 0.0 }
 0x40a   : > { %v2813_v43 = vpop.permute.xlu0 %2812  ;;  %v2787_v47 = vpop.permute.xlu1 %2786  ;;  %5090 = vmatprep.subr.bf16.mxu0 %v7680_v9  ;;  %5164 = vset.pattern.permute.xlu1 %v7683_v1 }
 0x40b   : > { %v2940_v20 = vpack.c.bf16 %v2916_v16, %v2915_v31  ;;  %v2885_v27 = vsub.f32 %v6385_v57, %v2787_v47  ;;  %v2890_v32 = vsub.f32 %v6388_v58, %v2813_v43 }
 0x40c   : > { %5081 = vmatmul.mubr.msk.bf16.vlgmr.msra.gmra.mxu0 %vm7677_vm3, %v6401_v29 }
 0x40d   : > { %v2917_v3 = vmax.f32 %v2885_v27, 0.0  ;;  %5085 = vmatpush3.bf16.msra.mxu1 %v2940_v20  ;;  %5092 = vmatprep.mubr.msk.bf16.mxu0 %vm7699_vm1, %v7680_v9  ;;  %v2922_v55 = vmax.f32 %v2890_v32, 0.0 }
 0x40e   : > { %v2824_v2 = vpop.permute.xlu0 %2823  ;;  %v2798_v41 = vpop.permute.xlu1 %2797  ;;  %5096 = vmatprep.subr.bf16.mxu1 %v7680_v9 }
 0x40f   : > { %v2941_v39 = vpack.c.bf16 %v2918_v25, %v2917_v3  ;;  %v2887_v18 = vsub.f32 %v6385_v57, %v2798_v41  ;;  %v2892_v50 = vsub.f32 %v6388_v58, %v2824_v2 }
 0x410   : > { %5087 = vmatmul.mubr.msk.bf16.vlgmr.msra.gmra.mxu1 %vm7677_vm3, %v6401_v29 }
 0x411   : > { %v2919_v7 = vmax.f32 %v2887_v18, 0.0  ;;  %5091 = vmatpush3.bf16.msra.mxu0 %v2941_v39  ;;  %5098 = vmatprep.mubr.msk.bf16.mxu1 %vm7699_vm1, %v7680_v9  ;;  %v2924_v31 = vmax.f32 %v2892_v50, 0.0 }
 0x412   : > { %v2835_v52 = vpop.permute.xlu0 %2834  ;;  %v2809_v49 = vpop.permute.xlu1 %2808  ;;  %5102 = vmatprep.subr.bf16.mxu0 %v7680_v9 }
 0x413   : > { %v2942_v13 = vpack.c.bf16 %v2920_v6, %v2919_v7  ;;  %v2889_v22 = vsub.f32 %v6385_v57, %v2809_v49  ;;  %v2894_v43 = vsub.f32 %v6388_v58, %v2835_v52 }
 0x414   : > { %5093 = vmatmul.mubr.msk.bf16.vlgmr.msra.gmra.mxu0 %vm7677_vm3, %v6401_v29 }
 0x415   : > { %v2921_v38 = vmax.f32 %v2889_v22, 0.0  ;;  %5097 = vmatpush3.bf16.msra.mxu1 %v2942_v13  ;;  %5104 = vmatprep.mubr.msk.bf16.mxu0 %vm7699_vm1, %v7680_v9  ;;  %v2926_v48 = vmax.f32 %v2894_v43, 0.0 }
 0x416   : > { %v2820_v59 = vpop.permute.xlu1 %2819  ;;  %5108 = vmatprep.subr.bf16.mxu1 %v7680_v9  ;;  %v2846_v42 = vpop.permute.xlu0 %2845 }
 0x417   : > { %v2943_v37 = vpack.c.bf16 %v2922_v55, %v2921_v38  ;;  %v2891_v16 = vsub.f32 %v6385_v57, %v2820_v59  ;;  %v2896_v3 = vsub.f32 %v6388_v58, %v2846_v42 }
 0x418   : > { %5099 = vmatmul.mubr.msk.bf16.vlgmr.msra.gmra.mxu1 %vm7677_vm3, %v6401_v29 }
 0x419   : > { %v2923_v47 = vmax.f32 %v2891_v16, 0.0  ;;  %5103 = vmatpush3.bf16.msra.mxu0 %v2943_v37  ;;  %5110 = vmatprep.mubr.msk.bf16.mxu1 %vm7699_vm1, %v7680_v9  ;;  %v2928_v32 = vmax.f32 %v2896_v3, 0.0 }
 0x41a   : > { %v2831_v20 = vpop.permute.xlu1 %2830  ;;  %5114 = vmatprep.subr.bf16.mxu0 %v7680_v9  ;;  %v2857_v41 = vpop.permute.xlu0 %2856 }
 0x41b   : > { %v2944_v27 = vpack.c.bf16 %v2924_v31, %v2923_v47  ;;  %v2893_v25 = vsub.f32 %v6385_v57, %v2831_v20  ;;  %v2898_v7 = vsub.f32 %v6388_v58, %v2857_v41 }
 0x41c   : > { %5105 = vmatmul.mubr.msk.bf16.vlgmr.msra.gmra.mxu0 %vm7677_vm3, %v6401_v29 }
 0x41d   : > { %v2925_v2 = vmax.f32 %v2893_v25, 0.0  ;;  %5109 = vmatpush3.bf16.msra.mxu1 %v2944_v27  ;;  %5116 = vmatprep.mubr.msk.bf16.mxu0 %vm7699_vm1, %v7680_v9  ;;  %v2930_v55 = vmax.f32 %v2898_v7, 0.0 }
 0x41e   : > { %v2842_v39 = vpop.permute.xlu1 %2841  ;;  %5120 = vmatprep.subr.bf16.mxu1 %v7680_v9 }
 0x41f   : > { %v2945_v18 = vpack.c.bf16 %v2926_v48, %v2925_v2  ;;  %v2895_v6 = vsub.f32 %v6385_v57, %v2842_v39 }
 0x420   : > { %5111 = vmatmul.mubr.msk.bf16.vlgmr.msra.gmra.mxu1 %vm7677_vm3, %v6401_v29 }
 0x421   : > { %v2927_v52 = vmax.f32 %v2895_v6, 0.0  ;;  %5115 = vmatpush3.bf16.msra.mxu0 %v2945_v18  ;;  %5122 = vmatprep.mubr.msk.bf16.mxu1 %vm7699_vm1, %v7680_v9 }
 0x422   : > { %v2853_v49 = vpop.permute.xlu1 %2852  ;;  %5126 = vmatprep.subr.bf16.mxu0 %v7680_v9 }
 0x423   : > { %v2946_v13 = vpack.c.bf16 %v2928_v32, %v2927_v52  ;;  %v2897_v22 = vsub.f32 %v6385_v57, %v2853_v49 }
 0x424   : > { %5117 = vmatmul.mubr.msk.bf16.vlgmr.msra.gmra.mxu0 %vm7677_vm3, %v6401_v29 }
 0x425   : > { %v2929_v50 = vmax.f32 %v2897_v22, 0.0  ;;  %5121 = vmatpush3.bf16.msra.mxu1 %v2946_v13  ;;  %5128 = vmatprep.mubr.msk.bf16.mxu0 %vm7699_vm1, %v7680_v9 }
 0x426   : > { %5132 = vmatprep.subr.bf16.mxu1 %v7680_v9  ;;  %v2864_v16 = vpop.permute.xlu1 %2863 }
 0x427   : > { %v2947_v38 = vpack.c.bf16 %v2930_v55, %v2929_v50  ;;  %v6507_v59 = vpop.permute.xlu0 %4425  ;;  %v2899_v31 = vsub.f32 %v6385_v57, %v2864_v16 }
 0x428   : > { %5123 = vmatmul.mubr.msk.bf16.vlgmr.msra.gmra.mxu1 %vm7677_vm3, %v6401_v29 }
 0x429   : > { %5127 = vmatpush3.bf16.msra.mxu0 %v2947_v38  ;;  %5134 = vmatprep.mubr.msk.bf16.mxu1 %vm7699_vm1, %v7680_v9  ;;  %v2931_v20 = vmax.f32 %v2899_v31, 0.0 }
 0x42b   : > { %v6513_v37 = vpop.permute.xlu0 %4430 }
 0x42c   : > { %5129 = vmatmul.mubr.msk.bf16.vlgmr.msra.gmra.mxu0 %vm7677_vm3, %v6401_v29 }
 0x42f   : > { %v6517_v42 = vpop.permute.xlu0 %4450 }
 0x433   : > { %v2868_v43 = vpop.permute.xlu0 %2867 }
 0x434   : > { %v2900_v47 = vsub.f32 %v6388_v58, %v2868_v43 }
 0x436   : > { %v2932_v27 = vmax.f32 %v2900_v47, 0.0 }
 0x437   : > { %v6523_v9 = vpop.permute.xlu0 %4453 }
 0x438   : > { %v2948_v25 = vpack.c.bf16 %v2932_v27, %v2931_v20 }
 0x43a   : > { %5133 = vmatpush3.bf16.msra.mxu1 %v2948_v25 }
 0x43d   : > { %5135 = vmatmul.mubr.msk.bf16.vlgmr.msra.gmra.mxu1 %vm7677_vm3, %v6401_v29 }
 0x461   : > { %v530_v48 = vpop.xlane.xlu1 %529 }
 0x462   : > { %v6526_v3 = vadd.f32 %v5665_v11, %v530_v48  ;;  %v6529_v2 = vadd.f32 %v6320_v0, %v530_v48  ;;  %v440_v11 = vld [vmem:[%s7651_s5 + $0x8] sm:$0xff]  ;;  %v4459_v0 = vsel %vm4445_vm10, 1, %v7683_v1 }
 0x464   : > { %v533_v57 = vpop.xlane.xlu0 %532  ;;  %2520 = vmin.xlane.f32.xlu0 %v6529_v2  ;;  %668 = vmin.xlane.f32.xlu1 %v6526_v3  ;;  %vm666_vm5 = vcmp.le.f32.partialorder %v6526_v3, 16.0 }
 0x465   : > { %v6534_v58 = vadd.f32 %v5657_v4, %v533_v57  ;;  %v6538_v29 = vadd.f32 %v6318_v54, %v533_v57  ;;  %v4341_v4 = vsel %vm6207_vm15, 1, %v7683_v1  ;;  %v4409_v54 = vsel %vm4393_vm7, 1, %v7683_v1  ;;  %v6577_v13 = vpop.permute.xlu1 %4268 }
 0x466   : > { %vm4286_vm15 = vcmp.eq.s32.totalorder %v6368_v33, 1 }
 0x467   : > { %vm667_vm0 = vcmp.le.f32.partialorder %v6534_v58, 16.0 }
 0x468   : > { %670 = vmin.xlane.f32.xlu0 %v6534_v58 }
 0x469   : > { %v6587_v43 = vpop.permute.xlu1 %4335 }
 0x46c   : > { %2522 = vmin.xlane.f32.xlu0 %v6538_v29 }
 0x475   : > { %999 = vperm.xlu1 %5164, %v440_v11   ;;  %v6593_v11 = vpop.permute.xlu1 %4293 }
 0x482   : > { %4344 = vperm.xlu0 %5163, %v4341_v4  }
 0x486   : > { %4412 = vperm.xlu0 %5163, %v4409_v54  }
 0x48a   : > { %4462 = vperm.xlu0 %5163, %v4459_v0  }
 0x48e   : > { %4465 = vperm.xlu0 %5163, %v4460_v8  }
 0x492   : > { %994 = vperm.xlu0 %5163, %v439_v24  }
 0x496   : > { %2951 = vperm.xlu0 %5163, %v2311_v56  }
 0x49a   : > { %2956 = vperm.xlu0 %5163, %v2312_v34   ;;  %v6603_v34 = vpop.permute.xlu1 %4357 }
 0x4b4   : > { %v6567_v45 = vpop.f32.mrf.mxu0 }
 0x4b5   : > { %7723 = vst [vmem:[#allocation21_spill] sm:$0xff] %v6567_v45 }
 0x4b6   : > { %v5046_v35 = vpop.f32.mrf.mxu0 }
 0x4b8   : > { %v6569_v41 = vpop.f32.mrf.mxu1  ;;  %v6571_v39 = vpop.f32.mrf.mxu0 }
 0x4b9   : > { %7724 = vst [vmem:[#allocation22_spill] sm:$0xff] %v6569_v41 }
 0x4ba   : > { %v5052_v18 = vpop.f32.mrf.mxu1  ;;  %v5047_v6 = vpop.f32.mrf.mxu0 }
 0x4bc   : > { %v6573_v32 = vpop.f32.mrf.mxu1  ;;  %v6575_v7 = vpop.f32.mrf.mxu0 }
 0x4bd   : > { %7725 = vst [vmem:[#allocation23_spill] sm:$0xff] %v6575_v7 }
 0x4be   : > { %v5053_v52 = vpop.f32.mrf.mxu1  ;;  %v5058_v49 = vpop.f32.mrf.mxu0 }
 0x4c0   : > { %v6579_v22 = vpop.f32.mrf.mxu1  ;;  %v6581_v55 = vpop.f32.mrf.mxu0 }
 0x4c1   : > { %7726 = vst [vmem:[#allocation24_spill] sm:$0xff] %v6579_v22 }
 0x4c2   : > { %v5064_v50 = vpop.f32.mrf.mxu1  ;;  %v5059_v38 = vpop.f32.mrf.mxu0 }
 0x4c3   : > { %v6609_v38 = vpop.permute.xlu1 %4362 }
 0x4c4   : > { %v6583_v16 = vpop.f32.mrf.mxu1  ;;  %v6585_v31 = vpop.f32.mrf.mxu0 }
 0x4c5   : > { %7727 = vst [vmem:[#allocation25_spill] sm:$0xff] %v6585_v31 }
 0x4c6   : > { %v5065_v47 = vpop.f32.mrf.mxu1  ;;  %v5070_v20 = vpop.f32.mrf.mxu0 }
 0x4c8   : > { %v6589_v27 = vpop.f32.mrf.mxu1  ;;  %v6591_v25 = vpop.f32.mrf.mxu0 }
 0x4c9   : > { %7728 = vst [vmem:[#allocation26_spill] sm:$0xff] %v6589_v27 }
 0x4ca   : > { %v5076_v48 = vpop.f32.mrf.mxu1  ;;  %v5071_v57 = vpop.f32.mrf.mxu0 }
 0x4cc   : > { %v6595_v4 = vpop.f32.mrf.mxu1  ;;  %v6597_v54 = vpop.f32.mrf.mxu0 }
 0x4cd   : > { %7729 = vst [vmem:[#allocation27_spill] sm:$0xff] %v6597_v54 }
 0x4ce   : > { %v5077_v0 = vpop.f32.mrf.mxu1  ;;  %v5082_v8 = vpop.f32.mrf.mxu0 }
 0x4d0   : > { %v6599_v24 = vpop.f32.mrf.mxu1  ;;  %v6601_v56 = vpop.f32.mrf.mxu0 }
 0x4d1   : > { %7730 = vst [vmem:[#allocation28_spill] sm:$0xff] %v6599_v24  ;;  %7731 = vst [vmem:[#allocation29_spill] sm:$0xff] %v6601_v56 }
 0x4d2   : > { %v5088_v35 = vpop.f32.mrf.mxu1  ;;  %v5083_v18 = vpop.f32.mrf.mxu0 }
 0x4d3   : > { %v6619_v35 = vpop.permute.xlu1 %4403 }
 0x4d4   : > { %v6605_v6 = vpop.f32.mrf.mxu1  ;;  %v6607_v52 = vpop.f32.mrf.mxu0 }
 0x4d5   : > { %7732 = vst [vmem:[#allocation30_spill] sm:$0xff] %v6605_v6  ;;  %7733 = vst [vmem:[#allocation31_spill] sm:$0xff] %v6607_v52 }
 0x4d6   : > { %v5089_v49 = vpop.f32.mrf.mxu1  ;;  %v5094_v50 = vpop.f32.mrf.mxu0 }
 0x4d7   : > { %v6625_v27 = vpop.permute.xlu1 %4475 }
 0x4d8   : > { %v6611_v47 = vpop.f32.mrf.mxu1  ;;  %v6613_v20 = vpop.f32.mrf.mxu0 }
 0x4d9   : > { %7734 = vst [vmem:[#allocation32_spill] sm:$0xff] %v6611_v47  ;;  %7735 = vst [vmem:[#allocation33_spill] sm:$0xff] %v6613_v20 }
 0x4da   : > { %v5100_v48 = vpop.f32.mrf.mxu1  ;;  %v5095_v57 = vpop.f32.mrf.mxu0 }
 0x4db   : > { %v7742_v57 = vlaneseq }
 0x4dc   : > { %v6615_v0 = vpop.f32.mrf.mxu1  ;;  %v6617_v8 = vpop.f32.mrf.mxu0 }
 0x4dd   : > { %7736 = vst [vmem:[#allocation34_spill] sm:$0xff] %v6615_v0  ;;  %7737 = vst [vmem:[#allocation35_spill] sm:$0xff] %v6617_v8  ;;  %v6632_v31 = vand.u32 127, %v7742_v57 }
 0x4de   : > { %v5101_v18 = vpop.f32.mrf.mxu1  ;;  %v5106_v24 = vpop.f32.mrf.mxu0 }
 0x4df   : > { %v5201_v18 = vmov 1966171168   ;;  %vm4275_vm12 = vcmp.eq.s32.totalorder %v6632_v31, %v6364_v10  ;;  %vm7678_vm2 = vcmp.eq.s32.totalorder %v6632_v31, 0  ;;  %vm4339_vm6 = vcmp.eq.s32.totalorder %v6632_v31, %v6587_v43 }
 0x4e0   : > { %v6621_v54 = vpop.f32.mrf.mxu1  ;;  %v6623_v49 = vpop.f32.mrf.mxu0  ;;  %vm6655_vm1 = vmand %vm4275_vm12, %vm4286_vm15 }
 0x4e1   : > { %7738 = vst [vmem:[#allocation36_spill] sm:$0xff] %v6621_v54  ;;  %7739 = vst [vmem:[#allocation37_spill] sm:$0xff] %v6623_v49  ;;  %v1752_v54 = vunpack.c.l.s4 %v5201_v18  ;;  %v4303_v3 = vsel %vm6655_vm1, %v6375_v63, 0.0  ;;  %vm4418_vm1 = vcmp.eq.s32.totalorder %v6377_v17, 1 }
 0x4e2   : > { %v5112_v50 = vpop.f32.mrf.mxu1  ;;  %v5107_v52 = vpop.f32.mrf.mxu0 }
 0x4e3   : > { %v6639_v50 = vadd.s32 128, %v6632_v31  ;;  %v6641_v52 = vpop.permute.xlu1 %4480  ;;  %v1753_v57 = vunpack.c.0.s8 %v1752_v54 }
 0x4e4   : > { %v6627_v47 = vpop.f32.mrf.mxu1  ;;  %v6629_v48 = vpop.f32.mrf.mxu0 }
 0x4e5   : > { %7740 = vst [vmem:[#allocation38_spill] sm:$0xff] %v6627_v47  ;;  %7741 = vst [vmem:[#allocation39_spill] sm:$0xff] %v6629_v48  ;;  %vm4276_vm11 = vcmp.eq.s32.totalorder %v6639_v50, %v6364_v10  ;;  %vm4340_vm12 = vcmp.eq.s32.totalorder %v6639_v50, %v6587_v43  ;;  %vm4456_vm3 = vcmp.eq.s32.totalorder %v6639_v50, %v6517_v42 }
 0x4e6   : > { %v5113_v8 = vpop.f32.mrf.mxu1  ;;  %v5118_v22 = vpop.f32.mrf.mxu0  ;;  %vm6659_vm9 = vmand %vm4276_vm11, %vm4286_vm15 }
 0x4e7   : > { %vm6690_vm11 = vmand %vm4339_vm6, %vm4350_vm13 }
 0x4e8   : > { %v6634_v7 = vpop.f32.mrf.mxu1  ;;  %v6636_v24 = vpop.f32.mrf.mxu0 }
 0x4e9   : > { %7743 = vst [vmem:[#allocation40_spill] sm:$0xff] %v6634_v7  ;;  %7744 = vst [vmem:[#allocation41_spill] sm:$0xff] %v6636_v24 }
 0x4ea   : > { %v5124_v49 = vpop.f32.mrf.mxu1  ;;  %v5119_v47 = vpop.f32.mrf.mxu0 }
 0x4ec   : > { %v6646_v8 = vpop.f32.mrf.mxu1  ;;  %v6648_v22 = vpop.f32.mrf.mxu0 }
 0x4ed   : > { %7745 = vst [vmem:[#allocation42_spill] sm:$0xff] %v6646_v8  ;;  %v6652_v18 = vpop.xlane.xlu0 %2520  ;;  %v669_v7 = vpop.xlane.xlu1 %668  ;;  %v7750_v8 = vld [vmem:[#allocation2_spill] sm:$0xff] }
 0x4ee   : > { %vm672_vm8 = vcmp.gt.f32.partialorder %v669_v7, 16.0  ;;  %v5125_v47 = vpop.f32.mrf.mxu1  ;;  %v5130_v49 = vpop.f32.mrf.mxu0  ;;  %v6666_v10 = vsub.s32 %v1753_v57, %v7750_v8  ;;  %v4304_v57 = vsel %vm6659_vm9, %v6375_v63, 0.0  ;;  %vm4273_vm9 = vcmp.eq.s32.totalorder %v6632_v31, %v6577_v13 }
 0x4ef   : > { %vm681_vm4 = vmand %vm7678_vm2, %vm672_vm8  ;;  %vm4285_vm8 = vcmp.eq.s32.totalorder %v6361_v44, 1  ;;  %v4367_v63 = vsel %vm6690_vm11, %v6609_v38, 0.0  ;;  %vm4338_vm11 = vcmp.eq.s32.totalorder %v6639_v50, %v6370_v19 }
 0x4f0   : > { %v6663_v54 = vpop.f32.mrf.mxu0  ;;  %vm683_vm14 = vmor %vm666_vm5, %vm681_vm4  ;;  %vm4407_vm4 = vcmp.eq.s32.totalorder %v6632_v31, %v6619_v35  ;;  %v4371_v41 = vadd.f32 %v4367_v63, %v4303_v3 }
 0x4f1   : > { %v671_v7 = vpop.xlane.xlu0 %670  ;;  %v6674_v49 = vsel %vm683_vm14, 1, %v7683_v1  ;;  %vm6712_vm5 = vmand %vm4340_vm12, %vm4350_vm13  ;;  %vm4274_vm14 = vcmp.eq.s32.totalorder %v6639_v50, %v6577_v13  ;;  %vm4408_vm13 = vcmp.eq.s32.totalorder %v6639_v50, %v6619_v35 }
 0x4f2   : > { %vm673_vm7 = vcmp.gt.f32.partialorder %v671_v7, 16.0  ;;  %v5131_v47 = vpop.f32.mrf.mxu0  ;;  %v1757_v7 = vrot.slane %v6674_v49, %v6666_v10 }
 0x4f3   : > { %vm682_vm10 = vmand %vm7678_vm2, %vm673_vm7  ;;  %v6699_v47 = vpop.permute.xlu1 %999  ;;  %vm2519_vm7 = vcmp.le.f32.partialorder %v6538_v29, 64.0 }
 0x4f4   : > { %vm684_vm15 = vmor %vm667_vm0, %vm682_vm10  ;;  %v1765_v24 = vcombine.high %v1757_v7, %v1757_v7  ;;  %v1773_v0 = vrot.slane %v1757_v7, %v6666_v10  ;;  %v1053_v53 = vadd.f32 %v6236_v60, %v6699_v47  ;;  %vm4337_vm10 = vcmp.eq.s32.totalorder %v6632_v31, %v6370_v19 }
 0x4f5   : > { %v6697_v43 = vsel %vm684_vm15, 1, %v7683_v1  ;;  %v2523_v48 = vpop.xlane.xlu0 %2522  ;;  %v4368_v60 = vsel %vm6712_vm5, %v6609_v38, 0.0  ;;  %v1141_v38 = vadd.f32 %v6257_v21, %v6699_v47  ;;  %v1449_v19 = vadd.f32 %v6308_v28, %v6699_v47 }
 0x4f6   : > { %v1806_v33 = vrot.slane %v6697_v43, %v6666_v10  ;;  %vm2525_vm6 = vcmp.gt.f32.partialorder %v2523_v48, 64.0  ;;  %vm1848_vm15 = vcmp.ne.s32.totalorder %v1773_v0, 0  ;;  %v1795_v29 = vcombine.high %v1773_v0, %v1773_v0 }
 0x4f7   : > { %vm2531_vm0 = vmand %vm7678_vm2, %vm2525_vm6  ;;  %v6740_v48 = vrot.slane %v1765_v24, %v6666_v10  ;;  %v1864_v45 = vsel %vm1848_vm15, 1, %v7683_v1  ;;  %v1750_v0 = vcombine.high %v6674_v49, %v6674_v49  ;;  %v1717_v49 = vmax.f32 %v1053_v53, 0.0 }
 0x4f8   : > { %v6722_v58 = vrot.slane %v1806_v33, %v6666_v10  ;;  %vm6733_vm12 = vmor %vm2519_vm7, %vm2531_vm0  ;;  %v1883_v24 = vrot.slane %v1864_v45, %v5660_v5  ;;  %vm1850_vm5 = vcmp.ne.s32.totalorder %v1795_v29, 0  ;;  %vm4405_vm0 = vcmp.eq.s32.totalorder %v6632_v31, %v6379_v46 }
 0x4f9   : > { %vm6750_vm6 = vmand %vm4407_vm4, %vm4418_vm1  ;;  %v1814_v3 = vcombine.high %v1806_v33, %v1806_v33  ;;  %v1866_v45 = vsel %vm1850_vm5, 1, %v7683_v1  ;;  %v1797_v21 = vcombine.high %v6740_v48, %v6740_v48  ;;  %v4372_v63 = vadd.f32 %v4368_v60, %v4304_v57 }
 0x4fa   : > { %vm1856_vm7 = vcmp.ne.s32.totalorder %v6722_v58, 0  ;;  %vm6768_vm4 = vmand %vm4408_vm13, %vm4418_vm1  ;;  %v4435_v29 = vsel %vm6750_vm6, %v6513_v37, 0.0  ;;  %vm6778_vm15 = vcmp.eq.s32.totalorder %v1883_v24, 1  ;;  %vm4406_vm1 = vcmp.eq.s32.totalorder %v6639_v50, %v6379_v46 }
 0x4fb   : > { %v1872_v33 = vsel %vm1856_vm7, 1, %v7683_v1  ;;  %vm4455_vm13 = vcmp.eq.s32.totalorder %v6632_v31, %v6517_v42  ;;  %v1961_v20 = vsel %vm6778_vm15, %v1717_v49, -1e+30  ;;  %v1891_v57 = vrot.slane %v1866_v45, %v5660_v5  ;;  %vm6801_vm7 = vmand %vm4273_vm9, %vm4285_vm8 }
 0x4fc   : > { %vm1851_vm5 = vcmp.ne.s32.totalorder %v1797_v21, 0  ;;  %v4436_v24 = vsel %vm6768_vm4, %v6513_v37, 0.0  ;;  %v6809_v49 = vrot.slane %v1750_v0, %v6666_v10  ;;  %1994 = vmax.xlane.f32.xlu1 %v1961_v20  ;;  %v1185_v45 = vadd.f32 %v6282_v26, %v6699_v47  ;;  %vm6819_vm9 = vmand %vm4274_vm14, %vm4285_vm8 }
 0x4fd   : > { %v4345_v35 = vpop.permute.xlu0 %4344  ;;  %v6787_v53 = vpop.f32.mrf.mxu1  ;;  %v1867_v21 = vsel %vm1851_vm5, 1, %v7683_v1  ;;  %v1721_v37 = vmax.f32 %v1141_v38, 0.0  ;;  %vm6823_vm4 = vcmp.eq.s32.totalorder %v1891_v57, 1  ;;  %v6829_v26 = vrot.slane %v1814_v3, %v6666_v10 }
 0x4fe   : > { %vm4349_vm6 = vcmp.eq.s32.totalorder %v4345_v35, 1  ;;  %v1895_v8 = vrot.slane %v1867_v21, %v5660_v5  ;;  %v4301_v44 = vsel %vm6801_vm7, %v6593_v11, 0.0  ;;  %v4302_v13 = vsel %vm6819_vm9, %v6593_v11, 0.0 }
 0x4ff   : > { %v5136_v6 = vpop.f32.mrf.mxu1  ;;  %vm6843_vm8 = vmand %vm4337_vm10, %vm4349_vm6  ;;  %v1915_v20 = vrot.slane %v1872_v33, %v5660_v5  ;;  %vm4457_vm14 = vcmp.eq.s32.totalorder %v6632_v31, %v6523_v9  ;;  %v6852_v56 = vadd.f32 %v4436_v24, %v4372_v63  ;;  %v1965_v11 = vsel %vm6823_vm4, %v1721_v37, -1e+30 }
 0x500   : > { %v6837_v6 = vadd.f32 %v4435_v29, %v4371_v41  ;;  %vm6858_vm5 = vmand %vm4338_vm11, %vm4349_vm6  ;;  %v1405_v29 = vadd.f32 %v6284_v61, %v6699_v47  ;;  %vm4458_vm7 = vcmp.eq.s32.totalorder %v6639_v50, %v6523_v9  ;;  %2002 = vmax.xlane.f32.xlu1 %v1965_v11  ;;  %vm6868_vm9 = vcmp.eq.s32.totalorder %v1895_v8, 1 }
 0x501   : > { %v4413_v3 = vpop.permute.xlu0 %4412  ;;  %v6848_v57 = vpop.f32.mrf.mxu1  ;;  %vm1857_vm11 = vcmp.ne.s32.totalorder %v6829_v26, 0  ;;  %v6877_v35 = vrot.slane %v6809_v49, %v6666_v10  ;;  %v1799_v61 = vcombine.high %v6697_v43, %v6697_v43  ;;  %v1723_v24 = vmax.f32 %v1185_v45, 0.0 }
 0x502   : > { %vm4417_vm10 = vcmp.eq.s32.totalorder %v4413_v3, 1  ;;  %v1873_v28 = vsel %vm1857_vm11, 1, %v7683_v1  ;;  %v1844_v21 = vcombine.high %v6722_v58, %v6722_v58  ;;  %v4365_v37 = vsel %vm6843_vm8, %v6603_v34, 0.0 }
 0x503   : > { %v5137_v33 = vpop.f32.mrf.mxu1  ;;  %vm6885_vm6 = vmand %vm4405_vm0, %vm4417_vm10  ;;  %v4366_v8 = vsel %vm6858_vm5, %v6603_v34, 0.0  ;;  %vm6898_vm2 = vcmp.eq.s32.totalorder %v1915_v20, 1  ;;  %v1919_v45 = vrot.slane %v1873_v28, %v5660_v5  ;;  %v1967_v38 = vsel %vm6868_vm9, %v1723_v24, -1e+30 }
 0x504   : > { %vm6907_vm0 = vmand %vm4406_vm1, %vm4417_vm10  ;;  %v1733_v34 = vmax.f32 %v1405_v29, 0.0  ;;  %vm1852_vm5 = vcmp.ne.s32.totalorder %v6877_v35, 0  ;;  %v1766_v20 = vcombine.high %v6809_v49, %v6809_v49  ;;  %v4433_v3 = vsel %vm6885_vm6, %v6507_v59, 0.0  ;;  %2006 = vmax.xlane.f32.xlu1 %v1967_v38 }
 0x505   : > { %v4463_v11 = vpop.permute.xlu0 %4462  ;;  %v1735_v41 = vmax.f32 %v1449_v19, 0.0  ;;  %vm1858_vm10 = vcmp.ne.s32.totalorder %v1844_v21, 0  ;;  %v4369_v29 = vadd.f32 %v4365_v37, %v4301_v44  ;;  %v4370_v24 = vadd.f32 %v4366_v8, %v4302_v13 }
 0x506   : > { %vm4467_vm8 = vcmp.eq.s32.totalorder %v4463_v11, 1  ;;  %v1977_v60 = vsel %vm6898_vm2, %v1733_v34, -1e+30  ;;  %v1868_v28 = vsel %vm1852_vm5, 1, %v7683_v1  ;;  %v4434_v11 = vsel %vm6907_vm0, %v6507_v59, 0.0 }
 0x507   : > { %vm6922_vm1 = vmand %vm4455_vm13, %vm4467_vm8  ;;  %vm6942_vm13 = vcmp.eq.s32.totalorder %v1919_v45, 1  ;;  %v1229_v19 = vadd.f32 %v6264_v14, %v6699_v47  ;;  %v4437_v21 = vadd.f32 %v4433_v3, %v4369_v29  ;;  %v1493_v37 = vadd.f32 %v6292_v15, %v6699_v47 }
 0x508   : > { %vm6929_vm11 = vmand %vm4456_vm3, %vm4467_vm8  ;;  %v4483_v44 = vsel %vm6922_vm1, %v6625_v27, 0.0  ;;  %v1874_v8 = vsel %vm1858_vm10, 1, %v7683_v1  ;;  %2026 = vmax.xlane.f32.xlu1 %v1977_v60  ;;  %v1899_v45 = vrot.slane %v1868_v28, %v5660_v5  ;;  %vm1849_vm0 = vcmp.ne.s32.totalorder %v6740_v48, 0 }
 0x509   : > { %v4466_v13 = vpop.permute.xlu0 %4465  ;;  %v4484_v59 = vsel %vm6929_vm11, %v6625_v27, 0.0  ;;  %v6960_v14 = vrot.slane %v1766_v20, %v6666_v10  ;;  %v4438_v58 = vadd.f32 %v4434_v11, %v4370_v24  ;;  %v4487_v15 = vadd.f32 %v4483_v44, %v4437_v21 }
 0x50a   : > { %vm4468_vm3 = vcmp.eq.s32.totalorder %v4466_v13, 1  ;;  %v1979_v38 = vsel %vm6942_vm13, %v1735_v41, -1e+30  ;;  %v1923_v48 = vrot.slane %v1874_v8, %v5660_v5  ;;  %v1865_v50 = vsel %vm1849_vm0, 1, %v7683_v1 }
 0x50b   : > { %vm4471_vm6 = vmand %vm4457_vm14, %vm4468_vm3  ;;  %vm1853_vm14 = vcmp.ne.s32.totalorder %v6960_v14, 0  ;;  %v4488_v20 = vadd.f32 %v4484_v59, %v4438_v58  ;;  %v1725_v49 = vmax.f32 %v1229_v19, 0.0  ;;  %v1887_v44 = vrot.slane %v1865_v50, %v5660_v5 }
 0x50c   : > { %vm4472_vm8 = vmand %vm4458_vm7, %vm4468_vm3  ;;  %v4485_v27 = vsel %vm4471_vm6, %v6641_v52, 0.0  ;;  %2030 = vmax.xlane.f32.xlu1 %v1979_v38  ;;  %vm6978_vm7 = vcmp.eq.s32.totalorder %v1899_v45, 1  ;;  %v1869_v41 = vsel %vm1853_vm14, 1, %v7683_v1  ;;  %vm6997_vm5 = vcmp.eq.s32.totalorder %v1923_v48, 1 }
 0x50d   : > { %v4486_v34 = vsel %vm4472_vm8, %v6641_v52, 0.0  ;;  %v4489_v3 = vadd.f32 %v4485_v27, %v6837_v6  ;;  %v6970_v46 = vpop.permute.xlu0 %994  ;;  %v1903_v13 = vrot.slane %v1869_v41, %v5660_v5  ;;  %v1737_v17 = vmax.f32 %v1493_v37, 0.0 }
 0x50e   : > { %v4490_v29 = vadd.f32 %v4486_v34, %v6852_v56  ;;  %v1050_v9 = vadd.f32 %v6219_v62, %v6970_v46  ;;  %v1094_v6 = vadd.f32 %v6266_v23, %v6970_v46  ;;  %v1846_v56 = vcombine.high %v6829_v26, %v6829_v26 }
 0x50f   : > { %v4491_v24 = vpack.c.bf16 %v4489_v3, %v4487_v15  ;;  %v1969_v62 = vsel %vm6978_vm7, %v1725_v49, -1e+30  ;;  %v1813_v23 = vrot.slane %v1799_v61, %v6666_v10  ;;  %v1273_v21 = vadd.f32 %v6290_v12, %v6699_v47 }
 0x510   : > { %v4492_v60 = vpack.c.bf16 %v4490_v29, %v4488_v20  ;;  %v1716_v28 = vmax.f32 %v1050_v9, 0.0  ;;  %2010 = vmax.xlane.f32.xlu1 %v1969_v62  ;;  %v1718_v19 = vmax.f32 %v1094_v6, 0.0  ;;  %vm1859_vm1 = vcmp.ne.s32.totalorder %v1846_v56, 0  ;;  %v7801_v62 = vld [vmem:[#allocation6_spill] sm:$0xff] }
 0x511   : > { %v1875_v8 = vsel %vm1859_vm1, 1, %v7683_v1  ;;  %v1796_v59 = vcombine.high %v6877_v35, %v6877_v35  ;;  %v1097_v43 = vadd.f32 %v6274_v40, %v6699_v47  ;;  %v1981_v61 = vsel %vm6997_vm5, %v1737_v17, -1e+30 }
 0x512   : > { %4517 = vmatprep.subr.bf16.mxu0 %v4492_v60  ;;  %v1960_v11 = vsel %vm6778_vm15, %v1716_v28, -1e+30  ;;  %vm7010_vm15 = vcmp.eq.s32.totalorder %v1887_v44, 1  ;;  %vm7014_vm10 = vcmp.eq.s32.totalorder %v1903_v13, 1  ;;  %v1927_v35 = vrot.slane %v1875_v8, %v5660_v5  ;;  %v7802_v44 = vld [vmem:[#allocation12_spill] sm:$0xff] }
 0x513   : > { %4518 = vmatpush1.bf16.xpose.msra.mxu0 %v4491_v24  ;;  %1992 = vmax.xlane.f32.xlu0 %v1960_v11  ;;  %vm1854_vm11 = vcmp.ne.s32.totalorder %v1796_v59, 0  ;;  %v1962_v12 = vsel %vm7010_vm15, %v1718_v19, -1e+30  ;;  %v1138_v40 = vadd.f32 %v6248_v36, %v6970_v46  ;;  %v1829_v58 = vrot.slane %v1813_v23, %v6666_v10 }
 0x514   : > { %2034 = vmax.xlane.f32.xlu1 %v1981_v61  ;;  %v1727_v15 = vmax.f32 %v1273_v21, 0.0  ;;  %v1537_v27 = vadd.f32 %v6312_v30, %v6699_v47  ;;  %v1870_v38 = vsel %vm1854_vm11, 1, %v7683_v1  ;;  %vm2524_vm3 = vcmp.gt.f32.partialorder %v6652_v18, 64.0  ;;  %v7805_v61 = vld [vmem:[#allocation15_spill] sm:$0xff] }
 0x515   : > { %v1815_v34 = vcombine.high %v1813_v23, %v1813_v23  ;;  %v1719_v3 = vmax.f32 %v1097_v43, 0.0  ;;  %vm1860_vm6 = vcmp.ne.s32.totalorder %v1829_v58, 0  ;;  %v1182_v36 = vadd.f32 %v6278_v51, %v6970_v46  ;;  %v7798_v51 = vld [vmem:[#allocation5_spill] sm:$0xff] }
 0x516   : > { %v1971_v48 = vsel %vm7014_vm10, %v1727_v15, -1e+30  ;;  %v1798_v20 = vcombine.high %v6960_v14, %v6960_v14  ;;  %vm7036_vm0 = vcmp.eq.s32.totalorder %v1927_v35, 1  ;;  %v1720_v18 = vmax.f32 %v1138_v40, 0.0  ;;  %v7806_v35 = vld [vmem:[#allocation11_spill] sm:$0xff] }
 0x517   : > { %1996 = vmax.xlane.f32.xlu0 %v1962_v12  ;;  %v1963_v30 = vsel %vm7010_vm15, %v1719_v3, -1e+30  ;;  %v1907_v9 = vrot.slane %v1870_v38, %v5660_v5  ;;  %vm7797_vm8 = vcmp.eq.s32.totalorder %v6632_v31, 0  ;;  %v1739_v50 = vmax.f32 %v1537_v27, 0.0  ;;  %v7807_v38 = vld [vmem:[#allocation3_spill] sm:$0xff] }
 0x518   : > { %2014 = vmax.xlane.f32.xlu1 %v1971_v48  ;;  %vm2530_vm14 = vmand %vm7797_vm8, %vm2524_vm3  ;;  %v1317_v24 = vadd.f32 %v7798_v51, %v6699_v47  ;;  %v1876_v14 = vsel %vm1860_vm6, 1, %v7683_v1  ;;  %vm1855_vm1 = vcmp.ne.s32.totalorder %v1798_v20, 0  ;;  %v1843_v6 = vrot.slane %v1815_v34, %v6666_v10 }
 0x519   : > { %vm2518_vm15 = vcmp.le.f32.partialorder %v6529_v2, 64.0  ;;  %v1983_v41 = vsel %vm7036_vm0, %v1739_v50, -1e+30  ;;  %v1722_v49 = vmax.f32 %v1182_v36, 0.0  ;;  %v1964_v60 = vsel %vm6823_vm4, %v1720_v18, -1e+30 }
 0x51a   : > { %vm2532_vm11 = vmor %vm2518_vm15, %vm2530_vm14  ;;  %vm7052_vm3 = vcmp.eq.s32.totalorder %v1907_v9, 1  ;;  %v1931_v56 = vrot.slane %v1876_v14, %v5660_v5  ;;  %v1402_v11 = vadd.f32 %v7801_v62, %v6970_v46  ;;  %v1729_v2 = vmax.f32 %v1317_v24, 0.0  ;;  %v7810_v9 = vld [vmem:[#allocation18_spill] sm:$0xff] }
 0x51b   : > { %1998 = vmax.xlane.f32.xlu0 %v1963_v30  ;;  %v1581_v13 = vadd.f32 %v7802_v44, %v6699_v47  ;;  %v1871_v23 = vsel %vm1855_vm1, 1, %v7683_v1  ;;  %vm1861_vm6 = vcmp.ne.s32.totalorder %v1843_v6, 0  ;;  %v1845_v19 = vcombine.high %v1829_v58, %v1829_v58  ;;  %v7092_v30 = vpop.permute.xlu0 %2951 }
 0x51c   : > { %2038 = vmax.xlane.f32.xlu1 %v1983_v41  ;;  %v7063_v0 = vsel %vm2532_vm11, 1, %v7683_v1  ;;  %v1973_v17 = vsel %vm7052_vm3, %v1729_v2, -1e+30  ;;  %v1966_v21 = vsel %vm6868_vm9, %v1722_v49, -1e+30  ;;  %vm7069_vm4 = vcmp.eq.s32.totalorder %v1931_v56, 1 }
 0x51d   : > { %v1732_v59 = vmax.f32 %v1402_v11, 0.0  ;;  %v1911_v43 = vrot.slane %v1871_v23, %v5660_v5  ;;  %v1446_v45 = vadd.f32 %v7805_v61, %v6970_v46  ;;  %v1741_v12 = vmax.f32 %v1581_v13, 0.0  ;;  %v7814_v2 = vld [vmem:[#allocation14_spill] sm:$0xff]  ;;  %v7842_v56 = vld [vmem:[#allocation21_spill] sm:$0xff] }
 0x51e   : > { %v1361_v40 = vadd.f32 %v7806_v35, %v6699_v47  ;;  %v1877_v58 = vsel %vm1861_vm6, 1, %v7683_v1  ;;  %vm1862_vm8 = vcmp.ne.s32.totalorder %v1845_v19, 0  ;;  %v1847_v63 = vcombine.high %v1843_v6, %v1843_v6  ;;  %v7811_v6 = vld [vmem:[#allocation8_spill] sm:$0xff] }
 0x51f   : > { %2000 = vmax.xlane.f32.xlu0 %v1964_v60  ;;  %v3665_v15 = vrot.slane %v7063_v0, %v6666_v10  ;;  %v1985_v27 = vsel %vm7069_vm4, %v1741_v12, -1e+30  ;;  %v1226_v34 = vadd.f32 %v7807_v38, %v6970_v46  ;;  %v1976_v3 = vsel %vm6898_vm2, %v1732_v59, -1e+30  ;;  %v7112_v23 = vpop.permute.xlu0 %2956  ;;  %v7818_v35 = vld [vmem:[#allocation20_spill] sm:$0xff] }
 0x520   : > { %2018 = vmax.xlane.f32.xlu1 %v1973_v17  ;;  %vm7087_vm9 = vcmp.eq.s32.totalorder %v1911_v43, 1  ;;  %v1734_v36 = vmax.f32 %v1446_v45, 0.0  ;;  %v1935_v20 = vrot.slane %v1877_v58, %v5660_v5  ;;  %v1731_v18 = vmax.f32 %v1361_v40, 0.0  ;;  %v7817_v43 = vld [vmem:[#allocation7_spill] sm:$0xff] }
 0x521   : > { %v1625_v50 = vadd.f32 %v7810_v9, %v6699_v47  ;;  %v1878_v51 = vsel %vm1862_vm8, 1, %v7683_v1  ;;  %vm1863_vm14 = vcmp.ne.s32.totalorder %v1847_v63, 0  ;;  %v3681_v33 = vrot.slane %v3665_v15, %v6666_v10 }
 0x522   : > { %v1975_v24 = vsel %vm7087_vm9, %v1731_v18, -1e+30  ;;  %v1724_v14 = vmax.f32 %v1226_v34, 0.0  ;;  %v1490_v41 = vadd.f32 %v7811_v6, %v6970_v46  ;;  %v3673_v49 = vcombine.high %v3665_v15, %v3665_v15  ;;  %v7819_v15 = vld [vmem:[#allocation16_spill] sm:$0xff]  ;;  %v7823_v6 = vld [vmem:[#allocation19_spill] sm:$0xff] }
 0x523   : > { %2004 = vmax.xlane.f32.xlu0 %v1966_v21  ;;  %v1978_v60 = vsel %vm6942_vm13, %v1734_v36, -1e+30  ;;  %vm7104_vm2 = vcmp.eq.s32.totalorder %v1935_v20, 1  ;;  %v1939_v62 = vrot.slane %v1878_v51, %v5660_v5  ;;  %v1743_v11 = vmax.f32 %v1625_v50, 0.0 }
 0x524   : > { %2042 = vmax.xlane.f32.xlu1 %v1985_v27  ;;  %v1669_v44 = vadd.f32 %v7814_v2, %v6699_v47  ;;  %v1879_v13 = vsel %vm1863_vm14, 1, %v7683_v1  ;;  %v1968_v42 = vsel %vm6978_vm7, %v1724_v14, -1e+30  ;;  %v1736_v17 = vmax.f32 %v1490_v41, 0.0 }
 0x525   : > { %v1987_v19 = vsel %vm7104_vm2, %v1743_v11, -1e+30  ;;  %vm3756_vm13 = vcmp.ne.s32.totalorder %v3681_v33, 0  ;;  %vm7118_vm1 = vcmp.eq.s32.totalorder %v1939_v62, 1  ;;  %v1943_v59 = vrot.slane %v1879_v13, %v5660_v5 }
 0x526   : > { %v1270_v61 = vadd.f32 %v7817_v43, %v6970_v46  ;;  %v3695_v45 = vrot.slane %v3673_v49, %v6666_v10  ;;  %v3658_v12 = vcombine.high %v7063_v0, %v7063_v0  ;;  %v1745_v52 = vmax.f32 %v1669_v44, 0.0 }
 0x527   : > { %2024 = vmax.xlane.f32.xlu0 %v1976_v3  ;;  %v1713_v40 = vadd.f32 %v7818_v35, %v6699_v47  ;;  %v3006_v58 = vadd.f32 %v6571_v39, %v7112_v23  ;;  %v3772_v63 = vsel %vm3756_vm13, 1, %v7683_v1  ;;  %v1534_v27 = vadd.f32 %v7819_v15, %v6970_v46  ;;  %v7829_v35 = vld [vmem:[#allocation9_spill] sm:$0xff] }
 0x528   : > { %2022 = vmax.xlane.f32.xlu1 %v1975_v24  ;;  %v1989_v38 = vsel %vm7118_vm1, %v1745_v52, -1e+30  ;;  %v1980_v34 = vsel %vm6997_vm5, %v1736_v17, -1e+30  ;;  %vm7139_vm7 = vcmp.eq.s32.totalorder %v1943_v59, 1  ;;  %v1726_v47 = vmax.f32 %v1270_v61, 0.0 }
 0x529   : > { %vm3757_vm15 = vcmp.ne.s32.totalorder %v3695_v45, 0  ;;  %v3703_v3 = vcombine.high %v3681_v33, %v3681_v33  ;;  %v3672_v39 = vrot.slane %v3658_v12, %v6666_v10  ;;  %v1747_v36 = vmax.f32 %v1713_v40, 0.0  ;;  %v7822_v24 = vld [vmem:[#allocation4_spill] sm:$0xff]  ;;  %v7826_v59 = vld [vmem:[#allocation10_spill] sm:$0xff] }
 0x52a   : > { %v3791_v20 = vrot.slane %v3772_v63, %v5660_v5  ;;  %v3657_v18 = vsel %vm6733_vm12, 1, %v7683_v1  ;;  %v3625_v26 = vmax.f32 %v3006_v58, 0.0  ;;  %v1738_v9 = vmax.f32 %v1534_v27, 0.0 }
 0x52b   : > { %2028 = vmax.xlane.f32.xlu0 %v1978_v60  ;;  %v3047_v50 = vadd.f32 %v6573_v32, %v7112_v23  ;;  %v1991_v51 = vsel %vm7139_vm7, %v1747_v36, -1e+30  ;;  %v3773_v33 = vsel %vm3757_vm15, 1, %v7683_v1  ;;  %v1314_v14 = vadd.f32 %v7822_v24, %v6970_v46 }
 0x52c   : > { %2046 = vmax.xlane.f32.xlu1 %v1987_v19  ;;  %v1710_v41 = vadd.f32 %v7823_v6, %v6970_v46  ;;  %v1970_v7 = vsel %vm7014_vm10, %v1726_v47, -1e+30  ;;  %vm3758_vm12 = vcmp.ne.s32.totalorder %v3703_v3, 0  ;;  %v3705_v49 = vcombine.high %v3695_v45, %v3695_v45  ;;  %v7861_v3 = vld [vmem:[#allocation41_spill] sm:$0xff]  ;;  %v7865_v6 = vld [vmem:[#allocation42_spill] sm:$0xff] }
 0x52d   : > { %v3674_v60 = vcombine.high %v3672_v39, %v3672_v39  ;;  %v3707_v62 = vcombine.high %v3657_v18, %v3657_v18  ;;  %vm7159_vm5 = vcmp.eq.s32.totalorder %v3791_v20, 1  ;;  %v1982_v2 = vsel %vm7036_vm0, %v1738_v9, -1e+30 }
 0x52e   : > { %v3869_v11 = vsel %vm7159_vm5, %v3625_v26, -1e+30  ;;  %v3795_v44 = vrot.slane %v3773_v33, %v5660_v5  ;;  %v1746_v13 = vmax.f32 %v1710_v41, 0.0  ;;  %v3627_v37 = vmax.f32 %v3047_v50, 0.0 }
 0x52f   : > { %2008 = vmax.xlane.f32.xlu0 %v1968_v42  ;;  %v1728_v19 = vmax.f32 %v1314_v14, 0.0  ;;  %v3088_v42 = vadd.f32 %v6581_v55, %v7112_v23  ;;  %v3774_v17 = vsel %vm3758_vm12, 1, %v7683_v1  ;;  %v1578_v43 = vadd.f32 %v7826_v59, %v6970_v46 }
 0x530   : > { %2050 = vmax.xlane.f32.xlu1 %v1989_v38  ;;  %vm3759_vm10 = vcmp.ne.s32.totalorder %v3705_v49, 0  ;;  %v3688_v61 = vrot.slane %v3672_v39, %v6666_v10  ;;  %v7176_v29 = vsel %vm7139_vm7, %v1746_v13, -1e+30  ;;  %v7179_v45 = vrot.slane %v3657_v18, %v6666_v10 }
 0x531   : > { %v3721_v12 = vrot.slane %v3707_v62, %v6666_v10  ;;  %vm7182_vm0 = vcmp.eq.s32.totalorder %v3795_v44, 1  ;;  %v3799_v52 = vrot.slane %v3774_v17, %v5660_v5  ;;  %v1358_v40 = vadd.f32 %v7829_v35, %v6970_v46 }
 0x532   : > { %v3871_v58 = vsel %vm7182_vm0, %v3627_v37, -1e+30  ;;  %v3629_v63 = vmax.f32 %v3088_v42, 0.0  ;;  %v3129_v15 = vadd.f32 %v6583_v16, %v7112_v23  ;;  %v3775_v27 = vsel %vm3759_vm10, 1, %v7683_v1  ;;  %v7836_v37 = vld [vmem:[#allocation29_spill] sm:$0xff] }
 0x533   : > { %2032 = vmax.xlane.f32.xlu0 %v1980_v34  ;;  %v1972_v38 = vsel %vm7052_vm3, %v1728_v19, -1e+30  ;;  %v1740_v34 = vmax.f32 %v1578_v43, 0.0  ;;  %vm3760_vm11 = vcmp.ne.s32.totalorder %v3688_v61, 0  ;;  %v3702_v0 = vrot.slane %v3674_v60, %v6666_v10  ;;  %v7835_v60 = vld [vmem:[#allocation13_spill] sm:$0xff] }
 0x534   : > { %2054 = vmax.xlane.f32.xlu1 %v1991_v51  ;;  %v3722_v47 = vcombine.high %v7179_v45, %v7179_v45  ;;  %vm7199_vm6 = vcmp.eq.s32.totalorder %v3799_v52, 1  ;;  %v3803_v16 = vrot.slane %v3775_v27, %v5660_v5  ;;  %v1730_v39 = vmax.f32 %v1358_v40, 0.0  ;;  %v7832_v51 = vld [vmem:[#allocation17_spill] sm:$0xff] }
 0x535   : > { %v3170_v36 = vadd.f32 %v6591_v25, %v7112_v23  ;;  %v3873_v28 = vsel %vm7199_vm6, %v3629_v63, -1e+30  ;;  %v3631_v20 = vmax.f32 %v3129_v15, 0.0  ;;  %v3776_v18 = vsel %vm3760_vm11, 1, %v7683_v1  ;;  %v7839_v15 = vld [vmem:[#allocation30_spill] sm:$0xff] }
 0x536   : > { %v3704_v26 = vcombine.high %v3688_v61, %v3688_v61  ;;  %v3723_v9 = vcombine.high %v3721_v12, %v3721_v12  ;;  %v1984_v50 = vsel %vm7069_vm4, %v1740_v34, -1e+30  ;;  %v1622_v33 = vadd.f32 %v7832_v51, %v6970_v46 }
 0x537   : > { %2012 = vmax.xlane.f32.xlu0 %v1970_v7  ;;  %vm3761_vm3 = vcmp.ne.s32.totalorder %v3702_v0, 0  ;;  %v7215_v24 = vadd.f32 %v6648_v22, %v7092_v30  ;;  %v3580_v25 = vadd.f32 %v6663_v54, %v7112_v23  ;;  %v7221_v14 = vadd.f32 %v6848_v57, %v7112_v23 }
 0x538   : > { %3902 = vmax.xlane.f32.xlu1 %v3869_v11  ;;  %v3211_v8 = vadd.f32 %v6595_v4, %v7112_v23  ;;  %vm7225_vm4 = vcmp.eq.s32.totalorder %v3803_v16, 1  ;;  %v1974_v41 = vsel %vm7087_vm9, %v1730_v39, -1e+30  ;;  %v3633_v22 = vmax.f32 %v3170_v36, 0.0 }
 0x539   : > { %v3807_v7 = vrot.slane %v3776_v18, %v5660_v5  ;;  %v3875_v54 = vsel %vm7225_vm4, %v3631_v20, -1e+30  ;;  %v3777_v57 = vsel %vm3761_vm3, 1, %v7683_v1  ;;  %vm3762_vm8 = vcmp.ne.s32.totalorder %v3704_v26, 0 }
 0x53a   : > { %v7236_v49 = vrot.slane %v3721_v12, %v6666_v10  ;;  %v1742_v4 = vmax.f32 %v1622_v33, 0.0  ;;  %v1666_v62 = vadd.f32 %v7835_v60, %v6970_v46  ;;  %v3706_v11 = vcombine.high %v3702_v0, %v3702_v0 }
 0x53b   : > { %2036 = vmax.xlane.f32.xlu0 %v1982_v2  ;;  %v7241_v48 = vrot.slane %v3723_v9, %v6666_v10  ;;  %v7245_v2 = vrot.slane %v7179_v45, %v6666_v10  ;;  %v3652_v44 = vmax.f32 %v7215_v24, 0.0  ;;  %v3618_v13 = vadd.f32 %v6787_v53, %v7092_v30 }
 0x53c   : > { %3906 = vmax.xlane.f32.xlu1 %v3871_v58  ;;  %v3252_v19 = vadd.f32 %v7836_v37, %v7112_v23  ;;  %v3653_v42 = vmax.f32 %v3580_v25, 0.0  ;;  %vm7252_vm9 = vcmp.eq.s32.totalorder %v3807_v7, 1  ;;  %v3811_v17 = vrot.slane %v3777_v57, %v5660_v5  ;;  %v7850_v37 = vld [vmem:[#allocation23_spill] sm:$0xff] }
 0x53d   : > { %v3778_v59 = vsel %vm3762_vm8, 1, %v7683_v1  ;;  %v3655_v43 = vmax.f32 %v7221_v14, 0.0  ;;  %v3877_v61 = vsel %vm7252_vm9, %v3633_v22, -1e+30  ;;  %v3635_v12 = vmax.f32 %v3211_v8, 0.0  ;;  %v7846_v8 = vld [vmem:[#allocation22_spill] sm:$0xff] }
 0x53e   : > { %v3753_v53 = vcombine.high %v7236_v49, %v7236_v49  ;;  %v1986_v52 = vsel %vm7104_vm2, %v1742_v4, -1e+30  ;;  %v1744_v35 = vmax.f32 %v1666_v62, 0.0  ;;  %vm3763_vm14 = vcmp.ne.s32.totalorder %v3706_v11, 0 }
 0x53f   : > { %2016 = vmax.xlane.f32.xlu0 %v1972_v38  ;;  %v3755_v40 = vcombine.high %v7241_v48, %v7241_v48  ;;  %v3637_v58 = vmax.f32 %v3252_v19, 0.0  ;;  %v3815_v63 = vrot.slane %v3778_v59, %v5660_v5  ;;  %v3293_v27 = vadd.f32 %v7839_v15, %v7112_v23  ;;  %v7872_v38 = vld [vmem:[#allocation31_spill] sm:$0xff] }
 0x540   : > { %3910 = vmax.xlane.f32.xlu1 %v3873_v28  ;;  %vm3770_vm13 = vcmp.ne.s32.totalorder %v3753_v53, 0  ;;  %vm7270_vm7 = vcmp.eq.s32.totalorder %v3811_v17, 1  ;;  %v3003_v34 = vadd.f32 %v7842_v56, %v7092_v30  ;;  %v3779_v39 = vsel %vm3763_vm14, 1, %v7683_v1  ;;  %v5171_v17 = vld [vmem:[%s7657_s11 + $0x4] ss:$8 sps:$4 sm:$0xff]   ;;  %v7853_v53 = vld [vmem:[#allocation37_spill] sm:$0xff] }
 0x541   : > { %v3786_v0 = vsel %vm3770_vm13, 1, %v7683_v1  ;;  %vm3771_vm2 = vcmp.ne.s32.totalorder %v3755_v40, 0  ;;  %v3879_v16 = vsel %vm7270_vm7, %v3635_v12, -1e+30  ;;  %v1988_v20 = vsel %vm7118_vm1, %v1744_v35, -1e+30  ;;  %4535 = vmatprep.mubr.bf16.mxu0 %v5171_v17 }
 0x542   : > { %v3847_v36 = vrot.slane %v3786_v0, %v5660_v5  ;;  %v3787_v28 = vsel %vm3771_vm2, 1, %v7683_v1  ;;  %vm3764_vm15 = vcmp.ne.s32.totalorder %v7245_v2, 0  ;;  %v3744_v18 = vrot.slane %v3722_v47, %v6666_v10  ;;  %v7845_v10 = vld [vmem:[#allocation33_spill] sm:$0xff]  ;;  %v7876_v59 = vld [vmem:[#allocation39_spill] sm:$0xff] }
 0x543   : > { %2040 = vmax.xlane.f32.xlu0 %v1984_v50  ;;  %v3851_v26 = vrot.slane %v3787_v28, %v5660_v5  ;;  %v3654_v9 = vmax.f32 %v3618_v13, 0.0  ;;  %vm7290_vm12 = vcmp.eq.s32.totalorder %v3815_v63, 1  ;;  %v3639_v51 = vmax.f32 %v3293_v27, 0.0  ;;  %v5169_v13 = vld [vmem:[%s7657_s11] ss:$8 sps:$4 sm:$0xff]   ;;  %v7854_v63 = vld [vmem:[#allocation24_spill] sm:$0xff] }
 0x544   : > { %3914 = vmax.xlane.f32.xlu1 %v3875_v54  ;;  %vm3866_vm10 = vcmp.eq.s32.totalorder %v3847_v36, 1  ;;  %v3819_v21 = vrot.slane %v3779_v39, %v5660_v5  ;;  %v3624_v33 = vmax.f32 %v3003_v34, 0.0  ;;  %v3881_v45 = vsel %vm7290_vm12, %v3637_v58, -1e+30  ;;  %4536 = vmatmul.mubr.bf16.vlgmr.msra.gmra.mxu0 %v5169_v13  ;;  %v7877_v27 = vld [vmem:[#allocation40_spill] sm:$0xff] }
 0x545   : > { %v7295_v24 = vsel %vm3866_vm10, %v3653_v42, -1e+30  ;;  %vm3867_vm1 = vcmp.eq.s32.totalorder %v3851_v26, 1  ;;  %v3334_v47 = vadd.f32 %v7845_v10, %v7112_v23  ;;  %v3780_v25 = vsel %vm3764_vm15, 1, %v7683_v1 }
 0x546   : > { %v7302_v14 = vsel %vm3867_vm1, %v3655_v43, -1e+30  ;;  %vm3765_vm11 = vcmp.ne.s32.totalorder %v3744_v18, 0  ;;  %v3752_v22 = vcombine.high %v7245_v2, %v7245_v2  ;;  %v7308_v7 = vsel %vm3866_vm10, %v3652_v44, -1e+30  ;;  %v7849_v2 = vld [vmem:[#allocation34_spill] sm:$0xff] }
 0x547   : > { %2020 = vmax.xlane.f32.xlu0 %v1974_v41  ;;  %v3044_v41 = vadd.f32 %v7846_v8, %v7092_v30  ;;  %vm7311_vm3 = vcmp.eq.s32.totalorder %v3819_v21, 1  ;;  %v3868_v57 = vsel %vm7159_vm5, %v3624_v33, -1e+30  ;;  %v3823_v4 = vrot.slane %v3780_v25, %v5660_v5 }
 0x548   : > { %3918 = vmax.xlane.f32.xlu1 %v3877_v61  ;;  %v7318_v60 = vsel %vm3867_vm1, %v3654_v9, -1e+30  ;;  %v3883_v62 = vsel %vm7311_vm3, %v3639_v51, -1e+30  ;;  %v3641_v11 = vmax.f32 %v3334_v47, 0.0  ;;  %v3375_v44 = vadd.f32 %v7849_v2, %v7112_v23  ;;  %v7862_v47 = vld [vmem:[#allocation26_spill] sm:$0xff] }
 0x549   : > { %v3626_v32 = vmax.f32 %v3044_v41, 0.0  ;;  %v3085_v19 = vadd.f32 %v7850_v37, %v7092_v30  ;;  %vm3766_vm5 = vcmp.ne.s32.totalorder %v3752_v22, 0  ;;  %v3754_v42 = vcombine.high %v3744_v18, %v3744_v18  ;;  %v7866_v2 = vld [vmem:[#allocation27_spill] sm:$0xff]  ;;  %v7869_v37 = vld [vmem:[#allocation28_spill] sm:$0xff] }
 0x54a   : > { %vm7333_vm8 = vcmp.eq.s32.totalorder %v3823_v4, 1  ;;  %v3643_v12 = vmax.f32 %v3375_v44, 0.0  ;;  %v3782_v35 = vsel %vm3766_vm5, 1, %v7683_v1  ;;  %v3126_v15 = vadd.f32 %v7854_v63, %v7092_v30 }
 0x54b   : > { %2044 = vmax.xlane.f32.xlu0 %v1986_v52  ;;  %v3885_v61 = vsel %vm7333_vm8, %v3641_v11, -1e+30  ;;  %v3416_v52 = vadd.f32 %v7853_v53, %v7112_v23  ;;  %v3870_v40 = vsel %vm7182_vm0, %v3626_v32, -1e+30  ;;  %v3628_v58 = vmax.f32 %v3085_v19, 0.0 }
 0x54c   : > { %3922 = vmax.xlane.f32.xlu1 %v3879_v16  ;;  %vm3767_vm14 = vcmp.ne.s32.totalorder %v3754_v42, 0  ;;  %v3831_v56 = vrot.slane %v3782_v35, %v5660_v5  ;;  %v7857_v16 = vld [vmem:[#allocation38_spill] sm:$0xff]  ;;  %v3630_v28 = vmax.f32 %v3126_v15, 0.0  ;;  %vm3768_vm0 = vcmp.ne.s32.totalorder %v7236_v49, 0  ;;  %v7875_v15 = vld [vmem:[#allocation36_spill] sm:$0xff] }
 0x54d   : > { %v3645_v0 = vmax.f32 %v3416_v52, 0.0  ;;  %v3457_v55 = vadd.f32 %v7857_v16, %v7112_v23  ;;  %v3783_v39 = vsel %vm3767_vm14, 1, %v7683_v1  ;;  %v3872_v36 = vsel %vm7199_vm6, %v3628_v58, -1e+30  ;;  %v7873_v52 = vld [vmem:[#allocation32_spill] sm:$0xff]  ;;  %v7874_v58 = vld [vmem:[#allocation35_spill] sm:$0xff] }
 0x54e   : > { %vm7362_vm2 = vcmp.eq.s32.totalorder %v3831_v56, 1  ;;  %v3835_v9 = vrot.slane %v3783_v39, %v5660_v5  ;;  %v3498_v33 = vadd.f32 %v7861_v3, %v7112_v23  ;;  %v3874_v49 = vsel %vm7225_vm4, %v3630_v28, -1e+30 }
 0x54f   : > { %2048 = vmax.xlane.f32.xlu0 %v1988_v20  ;;  %v7858_v20 = vld [vmem:[#allocation25_spill] sm:$0xff]  ;;  %v3889_v51 = vsel %vm7362_vm2, %v3645_v0, -1e+30  ;;  %v3647_v21 = vmax.f32 %v3457_v55, 0.0  ;;  %v3208_v25 = vadd.f32 %v7862_v47, %v7092_v30  ;;  %vm3769_vm6 = vcmp.ne.s32.totalorder %v7241_v48, 0 }
 0x550   : > { %3926 = vmax.xlane.f32.xlu1 %v3881_v45  ;;  %v3167_v18 = vadd.f32 %v7858_v20, %v7092_v30  ;;  %v3784_v45 = vsel %vm3768_vm0, 1, %v7683_v1  ;;  %vm7377_vm15 = vcmp.eq.s32.totalorder %v3835_v9, 1  ;;  %v3539_v4 = vadd.f32 %v7865_v6, %v7112_v23 }
 0x551   : > { %v3839_v41 = vrot.slane %v3784_v45, %v5660_v5  ;;  %v3891_v22 = vsel %vm7377_vm15, %v3647_v21, -1e+30  ;;  %v3634_v11 = vmax.f32 %v3208_v25, 0.0  ;;  %v3249_v44 = vadd.f32 %v7866_v2, %v7092_v30 }
 0x552   : > { %v3632_v10 = vmax.f32 %v3167_v18, 0.0  ;;  %v3651_v32 = vmax.f32 %v3539_v4, 0.0  ;;  %v3290_v19 = vadd.f32 %v7869_v37, %v7092_v30  ;;  %v3372_v35 = vadd.f32 %v7873_v52, %v7092_v30 }
 0x553   : > { %2052 = vmax.xlane.f32.xlu0 %v7176_v29  ;;  %v3781_v29 = vsel %vm3765_vm11, 1, %v7683_v1  ;;  %vm7391_vm4 = vcmp.eq.s32.totalorder %v3839_v41, 1  ;;  %v3636_v46 = vmax.f32 %v3249_v44, 0.0  ;;  %v3413_v63 = vadd.f32 %v7874_v58, %v7092_v30 }
 0x554   : > { %3930 = vmax.xlane.f32.xlu1 %v3883_v62  ;;  %v3827_v43 = vrot.slane %v3781_v29, %v5660_v5  ;;  %v3785_v62 = vsel %vm3769_vm6, 1, %v7683_v1  ;;  %v3876_v48 = vsel %vm7252_vm9, %v3632_v10, -1e+30  ;;  %v3878_v1 = vsel %vm7270_vm7, %v3634_v11, -1e+30 }
 0x555   : > { %v3843_v13 = vrot.slane %v3785_v62, %v5660_v5  ;;  %v3880_v17 = vsel %vm7290_vm12, %v3636_v46, -1e+30  ;;  %v3644_v54 = vmax.f32 %v3413_v63, 0.0  ;;  %v3454_v56 = vadd.f32 %v7875_v15, %v7092_v30 }
 0x556   : > { %vm7347_vm13 = vcmp.eq.s32.totalorder %v3827_v43, 1  ;;  %v3638_v43 = vmax.f32 %v3290_v19, 0.0  ;;  %v3495_v0 = vadd.f32 %v7876_v59, %v7092_v30  ;;  %v3536_v39 = vadd.f32 %v7877_v27, %v7092_v30 }
 0x557   : > { %3900 = vmax.xlane.f32.xlu0 %v3868_v57  ;;  %v3887_v34 = vsel %vm7347_vm13, %v3643_v12, -1e+30  ;;  %v3649_v57 = vmax.f32 %v3498_v33, 0.0  ;;  %vm7402_vm9 = vcmp.eq.s32.totalorder %v3843_v13, 1  ;;  %v2092_v44 = vadd.s32 4294967288, %v6632_v31 }
 0x558   : > { %3934 = vmax.xlane.f32.xlu1 %v3885_v61  ;;  %v3895_v5 = vsel %vm7402_vm9, %v3651_v32, -1e+30  ;;  %v3331_v61 = vadd.f32 %v7872_v38, %v7092_v30  ;;  %v3882_v12 = vsel %vm7311_vm3, %v3638_v43, -1e+30  ;;  %v3648_v55 = vmax.f32 %v3495_v0, 0.0 }
 0x559   : > { %v3893_v23 = vsel %vm7391_vm4, %v3649_v57, -1e+30  ;;  %v3650_v28 = vmax.f32 %v3536_v39, 0.0  ;;  %vm2097_vm7 = vcmask 130112   ;;  %vm2234_vm12 = vcmask 1041409  }
 0x55a   : > { %v3640_v53 = vmax.f32 %v3331_v61, 0.0  ;;  %vm2236_vm10 = vcmask 1042434   ;;  %vm2238_vm1 = vcmask 1043459   ;;  %vm2240_vm11 = vcmask 1044484  }
 0x55b   : > { %3904 = vmax.xlane.f32.xlu0 %v3870_v40  ;;  %v3642_v40 = vmax.f32 %v3372_v35, 0.0  ;;  %v3894_v18 = vsel %vm7402_vm9, %v3650_v28, -1e+30  ;;  %vm2242_vm3 = vcmask 1045509   ;;  %vm2244_vm5 = vcmask 1046534  }
 0x55c   : > { %3938 = vmax.xlane.f32.xlu1 %v3887_v34  ;;  %v3884_v50 = vsel %vm7333_vm8, %v3640_v53, -1e+30  ;;  %v3888_v34 = vsel %vm7362_vm2, %v3644_v54, -1e+30  ;;  %vm2246_vm8 = vcmask 1047559   ;;  %vm7880_vm14 = vcmask 130048  }
 0x55f   : > { %3908 = vmax.xlane.f32.xlu0 %v3872_v36  ;;  %v3892_v36 = vsel %vm7391_vm4, %v3648_v55, -1e+30 }
 0x560   : > { %3942 = vmax.xlane.f32.xlu1 %v3889_v51 }
 0x563   : > { %3912 = vmax.xlane.f32.xlu0 %v3874_v49 }
 0x564   : > { %3946 = vmax.xlane.f32.xlu1 %v3891_v22 }
 0x567   : > { %3916 = vmax.xlane.f32.xlu0 %v3876_v48 }
 0x568   : > { %3950 = vmax.xlane.f32.xlu1 %v3893_v23  ;;  %v7878_v23 = vld [vmem:[#allocation2_spill] sm:$0xff] }
 0x569   : > { %v7469_v32 = vsub.s32 %v6632_v31, %v7878_v23 }
 0x56b   : > { %3920 = vmax.xlane.f32.xlu0 %v3878_v1  ;;  %v7472_v1 = vsub.s32 %v2092_v44, %v7878_v23 }
 0x56c   : > { %3954 = vmax.xlane.f32.xlu1 %v3895_v5 }
 0x56f   : > { %3924 = vmax.xlane.f32.xlu0 %v3880_v17 }
 0x570   : > { %3958 = vmax.xlane.f32.xlu1 %v7295_v24  ;;  %v3886_v24 = vsel %vm7347_vm13, %v3642_v40, -1e+30  ;;  %vm7881_vm13 = vmmov %vm7880_vm14 }
 0x571   : > { %vm7882_vm0 = vmmov %vm7881_vm13 }
 0x572   : > { %vm7883_vm2 = vmmov %vm7882_vm0 }
 0x573   : > { %3928 = vmax.xlane.f32.xlu0 %v3882_v12  ;;  %vm7884_vm6 = vmmov %vm7882_vm0 }
 0x574   : > { %3962 = vmax.xlane.f32.xlu1 %v7302_v14  ;;  %v3646_v14 = vmax.f32 %v3454_v56, 0.0 }
 0x576   : > { %v3890_v16 = vsel %vm7377_vm15, %v3646_v14, -1e+30  ;;  %vm7885_vm15 = vmmov %vm7882_vm0 }
 0x577   : > { %3932 = vmax.xlane.f32.xlu0 %v3884_v50 }
 0x57b   : > { %3936 = vmax.xlane.f32.xlu0 %v3886_v24 }
 0x57f   : > { %3940 = vmax.xlane.f32.xlu0 %v3888_v34 }
 0x583   : > { %3944 = vmax.xlane.f32.xlu0 %v3890_v16 }
 0x585   : > { %v1995_v20 = vpop.xlane.xlu1 %1994 }
 0x586   : > { %v2096_v61 = vrot.slane %v1995_v20, %v7472_v1 }
 0x587   : > { %3948 = vmax.xlane.f32.xlu0 %v3892_v36 }
 0x589   : > { %v2003_v26 = vpop.xlane.xlu1 %2002 }
 0x58a   : > { %v2115_v38 = vrot.slane %v2003_v26, %v7472_v1 }
 0x58b   : > { %3952 = vmax.xlane.f32.xlu0 %v3894_v18 }
 0x58d   : > { %v2007_v9 = vpop.xlane.xlu1 %2006 }
 0x58e   : > { %v2124_v12 = vrot.slane %v2007_v9, %v7472_v1 }
 0x58f   : > { %3956 = vmax.xlane.f32.xlu0 %v7308_v7 }
 0x591   : > { %v7439_v51 = vpop.xlane.xlu1 %2026 }
 0x593   : > { %3960 = vmax.xlane.f32.xlu0 %v7318_v60 }
 0x595   : > { %v7442_v30 = vpop.xlane.xlu1 %2030 }
 0x599   : > { %v2011_v21 = vpop.xlane.xlu1 %2010 }
 0x59a   : > { %v2133_v35 = vrot.slane %v2011_v21, %v7472_v1 }
 0x59c   : > { %v1993_v3 = vpop.xlane.xlu0 %1992 }
 0x59d   : > { %v7444_v33 = vpop.xlane.xlu1 %2034  ;;  %v2091_v5 = vrot.slane %v1993_v3, %v7469_v32 }
 0x59f   : > { %v2098_v24 = vsel %vm2097_vm7, %v2096_v61, %v2091_v5 }
 0x5a0   : > { %v1997_v45 = vpop.xlane.xlu0 %1996 }
 0x5a1   : > { %v2015_v49 = vpop.xlane.xlu1 %2014  ;;  %v2102_v17 = vrot.slane %v1997_v45, %v7469_v32 }
 0x5a2   : > { %v2142_v54 = vrot.slane %v2015_v49, %v7472_v1 }
 0x5a4   : > { %v1999_v10 = vpop.xlane.xlu0 %1998 }
 0x5a5   : > { %v7446_v47 = vpop.xlane.xlu1 %2038  ;;  %v2106_v46 = vrot.slane %v1999_v10, %v7472_v1  ;;  %v2178_v10 = vrot.slane %v7442_v30, %v7472_v1 }
 0x5a7   : > { %v2107_v53 = vsel %vm2097_vm7, %v2106_v46, %v2102_v17 }
 0x5a8   : > { %v2001_v25 = vpop.xlane.xlu0 %2000  ;;  %v2235_v56 = vsel %vm2234_vm12, %v2107_v53, %v2098_v24 }
 0x5a9   : > { %v2019_v8 = vpop.xlane.xlu1 %2018  ;;  %v2111_v19 = vrot.slane %v2001_v25, %v7469_v32 }
 0x5aa   : > { %v2151_v34 = vrot.slane %v2019_v8, %v7472_v1 }
 0x5ab   : > { %v2116_v50 = vsel %vm2097_vm7, %v2115_v38, %v2111_v19 }
 0x5ac   : > { %v2005_v41 = vpop.xlane.xlu0 %2004  ;;  %v2237_v59 = vsel %vm2236_vm10, %v2116_v50, %v2235_v56 }
 0x5ad   : > { %v7448_v22 = vpop.xlane.xlu1 %2042  ;;  %v2120_v43 = vrot.slane %v2005_v41, %v7469_v32  ;;  %v2187_v41 = vrot.slane %v7444_v33, %v7472_v1 }
 0x5af   : > { %v2125_v15 = vsel %vm2097_vm7, %v2124_v12, %v2120_v43 }
 0x5b0   : > { %v7450_v7 = vpop.xlane.xlu0 %2024  ;;  %v2239_v16 = vsel %vm2238_vm1, %v2125_v15, %v2237_v59 }
 0x5b1   : > { %v2023_v57 = vpop.xlane.xlu1 %2022  ;;  %v2165_v25 = vrot.slane %v7450_v7, %v7469_v32  ;;  %v2205_v7 = vrot.slane %v7448_v22, %v7472_v1 }
 0x5b2   : > { %v2160_v39 = vrot.slane %v2023_v57, %v7472_v1 }
 0x5b4   : > { %v7452_v60 = vpop.xlane.xlu0 %2028 }
 0x5b5   : > { %v7454_v6 = vpop.xlane.xlu1 %2046  ;;  %v2174_v26 = vrot.slane %v7452_v60, %v7469_v32  ;;  %v2169_v60 = vrot.slane %v7439_v51, %v7472_v1 }
 0x5b6   : > { %v2214_v23 = vrot.slane %v7454_v6, %v7472_v1 }
 0x5b7   : > { %v2179_v30 = vsel %vm2097_vm7, %v2178_v10, %v2174_v26  ;;  %v2170_v33 = vsel %vm2097_vm7, %v2169_v60, %v2165_v25 }
 0x5b8   : > { %v2009_v4 = vpop.xlane.xlu0 %2008  ;;  %v2248_v46 = vsel %vm2234_vm12, %v2179_v30, %v2170_v33 }
 0x5b9   : > { %v7456_v62 = vpop.xlane.xlu1 %2050  ;;  %v2129_v31 = vrot.slane %v2009_v4, %v7469_v32  ;;  %v2196_v4 = vrot.slane %v7446_v47, %v7472_v1 }
 0x5ba   : > { %v2223_v19 = vrot.slane %v7456_v62, %v7472_v1 }
 0x5bb   : > { %v2134_v14 = vsel %vm2097_vm7, %v2133_v35, %v2129_v31 }
 0x5bc   : > { %v7458_v48 = vpop.xlane.xlu0 %2032  ;;  %v2241_v36 = vsel %vm2240_vm11, %v2134_v14, %v2239_v16 }
 0x5bd   : > { %v7460_v11 = vpop.xlane.xlu1 %2054  ;;  %v2183_v3 = vrot.slane %v7458_v48, %v7469_v32 }
 0x5be   : > { %v2232_v38 = vrot.slane %v7460_v11, %v7472_v1 }
 0x5c0   : > { %v2013_v2 = vpop.xlane.xlu0 %2012 }
 0x5c1   : > { %v7463_v29 = vpop.xlane.xlu1 %3902  ;;  %v2138_v52 = vrot.slane %v2013_v2, %v7469_v32  ;;  %v2188_v2 = vsel %vm2097_vm7, %v2187_v41, %v2183_v3 }
 0x5c3   : > { %v2143_v0 = vsel %vm2097_vm7, %v2142_v54, %v2138_v52 }
 0x5c4   : > { %v7465_v13 = vpop.xlane.xlu0 %2036  ;;  %v2243_v20 = vsel %vm2242_vm3, %v2143_v0, %v2241_v36 }
 0x5c5   : > { %v7475_v37 = vpop.xlane.xlu1 %3906  ;;  %v2192_v8 = vrot.slane %v7465_v13, %v7469_v32 }
 0x5c6   : > { %v4012_v0 = vrot.slane %v7475_v37, %v7472_v1 }
 0x5c7   : > { %v2197_v51 = vsel %vm2097_vm7, %v2196_v4, %v2192_v8 }
 0x5c8   : > { %v2017_v42 = vpop.xlane.xlu0 %2016 }
 0x5c9   : > { %v2147_v40 = vrot.slane %v2017_v42, %v7469_v32  ;;  %v7490_v58 = vpop.xlane.xlu1 %3910  ;;  %v2249_v42 = vsel %vm2236_vm10, %v2188_v2, %v2248_v46 }
 0x5ca   : > { %v2250_v17 = vsel %vm2238_vm1, %v2197_v51, %v2249_v42  ;;  %v7879_v42 = vmov 1  }
 0x5cb   : > { %v2152_v55 = vsel %vm2097_vm7, %v2151_v34, %v2147_v40 }
 0x5cc   : > { %v2041_v63 = vpop.xlane.xlu0 %2040  ;;  %v2245_v9 = vsel %vm2244_vm5, %v2152_v55, %v2243_v20 }
 0x5cd   : > { %v7506_v18 = vpop.xlane.xlu1 %3914  ;;  %v2201_v57 = vrot.slane %v2041_v63, %v7469_v32 }
 0x5ce   : > { %v4030_v20 = vrot.slane %v7506_v18, %v7472_v1 }
 0x5cf   : > { %v2206_v22 = vsel %vm2097_vm7, %v2205_v7, %v2201_v57 }
 0x5d0   : > { %v2021_v27 = vpop.xlane.xlu0 %2020  ;;  %v2251_v31 = vsel %vm2240_vm11, %v2206_v22, %v2250_v17 }
 0x5d1   : > { %v2156_v28 = vrot.slane %v2021_v27, %v7469_v32  ;;  %v3919_v44 = vpop.xlane.xlu1 %3918  ;;  %v4021_v27 = vrot.slane %v7490_v58, %v7472_v1 }
 0x5d3   : > { %v2161_v21 = vsel %vm2097_vm7, %v2160_v39, %v2156_v28  ;;  %v4003_v28 = vrot.slane %v7463_v29, %v7472_v1 }
 0x5d4   : > { %v2045_v45 = vpop.xlane.xlu0 %2044  ;;  %v2247_v49 = vsel %vm2246_vm8, %v2161_v21, %v2245_v9  ;;  %v4039_v9 = vrot.slane %v3919_v44, %v7472_v1 }
 0x5d5   : > { %2257 = vxpose.xlu0.b32.start [1/2] (short) (narrow) %v2247_v49, 16  ;;  %v2210_v48 = vrot.slane %v2045_v45, %v7469_v32  ;;  %v3923_v12 = vpop.xlane.xlu1 %3922 }
 0x5d6   : > { %v4048_v58 = vrot.slane %v3923_v12, %v7472_v1 }
 0x5d7   : > { %v2215_v5 = vsel %vm2097_vm7, %v2214_v23, %v2210_v48 }
 0x5d8   : > { %v2049_v13 = vpop.xlane.xlu0 %2048  ;;  %v2252_v62 = vsel %vm2242_vm3, %v2215_v5, %v2251_v31 }
 0x5d9   : > { %v2219_v47 = vrot.slane %v2049_v13, %v7469_v32  ;;  %v3927_v40 = vpop.xlane.xlu1 %3926 }
 0x5da   : > { %v4057_v10 = vrot.slane %v3927_v40, %v7472_v1 }
 0x5db   : > { %v2224_v43 = vsel %vm2097_vm7, %v2223_v19, %v2219_v47 }
 0x5dc   : > { %v2053_v6 = vpop.xlane.xlu0 %2052  ;;  %v2253_v53 = vsel %vm2244_vm5, %v2224_v43, %v2252_v62 }
 0x5dd   : > { %v2228_v61 = vrot.slane %v2053_v6, %v7469_v32  ;;  %v3931_v54 = vpop.xlane.xlu1 %3930 }
 0x5de   : > { %v4066_v48 = vrot.slane %v3931_v54, %v7472_v1 }
 0x5df   : > { %v2233_v52 = vsel %vm2097_vm7, %v2232_v38, %v2228_v61 }
 0x5e0   : > { %v3901_v35 = vpop.xlane.xlu0 %3900  ;;  %v2254_v50 = vsel %vm2246_vm8, %v2233_v52, %v2253_v53 }
 0x5e1   : > { %2258 = vxpose.xlu0.b32.end [2/2] (short) (narrow) %v2254_v50, 16  ;;  %v7554_v15 = vpop.xlane.xlu1 %3934  ;;  %v3999_v16 = vrot.slane %v3901_v35, %v7469_v32 }
 0x5e2   : > { %v4075_v50 = vrot.slane %v7554_v15, %v7472_v1 }
 0x5e3   : > { %v4004_v45 = vsel %vm2097_vm7, %v4003_v28, %v3999_v16 }
 0x5e4   : > { %v3905_v63 = vpop.xlane.xlu0 %3904 }
 0x5e5   : > { %v4008_v34 = vrot.slane %v3905_v63, %v7469_v32  ;;  %v3939_v39 = vpop.xlane.xlu1 %3938 }
 0x5e6   : > { %v4084_v62 = vrot.slane %v3939_v39, %v7472_v1 }
 0x5e7   : > { %v4013_v26 = vsel %vm2097_vm7, %v4012_v0, %v4008_v34 }
 0x5e8   : > { %v3909_v24 = vpop.xlane.xlu0 %3908  ;;  %v4140_v18 = vsel %vm2234_vm12, %v4013_v26, %v4004_v45 }
 0x5e9   : > { %v4017_v14 = vrot.slane %v3909_v24, %v7469_v32  ;;  %v3943_v57 = vpop.xlane.xlu1 %3942 }
 0x5ea   : > { %v4093_v52 = vrot.slane %v3943_v57, %v7472_v1 }
 0x5eb   : > { %v4022_v21 = vsel %vm2097_vm7, %v4021_v27, %v4017_v14 }
 0x5ec   : > { %v3913_v11 = vpop.xlane.xlu0 %3912  ;;  %v4141_v8 = vsel %vm2236_vm10, %v4022_v21, %v4140_v18 }
 0x5ed   : > { %v4026_v55 = vrot.slane %v3913_v11, %v7469_v32  ;;  %v3947_v47 = vpop.xlane.xlu1 %3946 }
 0x5ee   : > { %v4102_v40 = vrot.slane %v3947_v47, %v7472_v1 }
 0x5ef   : > { %v4031_v49 = vsel %vm2097_vm7, %v4030_v20, %v4026_v55 }
 0x5f0   : > { %v3917_v56 = vpop.xlane.xlu0 %3916  ;;  %v4142_v60 = vsel %vm2238_vm1, %v4031_v49, %v4141_v8 }
 0x5f1   : > { %v4035_v36 = vrot.slane %v3917_v56, %v7469_v32  ;;  %v3951_v19 = vpop.xlane.xlu1 %3950 }
 0x5f2   : > { %v4111_v54 = vrot.slane %v3951_v19, %v7472_v1 }
 0x5f3   : > { %v4040_v25 = vsel %vm2097_vm7, %v4039_v9, %v4035_v36 }
 0x5f4   : > { %v3921_v59 = vpop.xlane.xlu0 %3920  ;;  %v4143_v7 = vsel %vm2240_vm11, %v4040_v25, %v4142_v60 }
 0x5f5   : > { %v4044_v37 = vrot.slane %v3921_v59, %v7469_v32  ;;  %v3955_v17 = vpop.xlane.xlu1 %3954 }
 0x5f6   : > { %v4120_v34 = vrot.slane %v3955_v17, %v7472_v1 }
 0x5f7   : > { %v4049_v41 = vsel %vm2097_vm7, %v4048_v58, %v4044_v37 }
 0x5f8   : > { %v3925_v3 = vpop.xlane.xlu0 %3924  ;;  %v4144_v44 = vsel %vm2242_vm3, %v4049_v41, %v4143_v7 }
 0x5f9   : > { %v4053_v29 = vrot.slane %v3925_v3, %v7469_v32  ;;  %v3959_v38 = vpop.xlane.xlu1 %3958 }
 0x5fa   : > { %v4129_v16 = vrot.slane %v3959_v38, %v7472_v1 }
 0x5fb   : > { %v4058_v4 = vsel %vm2097_vm7, %v4057_v10, %v4053_v29 }
 0x5fc   : > { %v3929_v30 = vpop.xlane.xlu0 %3928  ;;  %v4145_v13 = vsel %vm2244_vm5, %v4058_v4, %v4144_v44 }
 0x5fd   : > { %v4062_v2 = vrot.slane %v3929_v30, %v7469_v32  ;;  %v3963_v55 = vpop.xlane.xlu1 %3962 }
 0x5fe   : > { %v4138_v3 = vrot.slane %v3963_v55, %v7472_v1 }
 0x5ff   : > { %v4067_v33 = vsel %vm2097_vm7, %v4066_v48, %v4062_v2 }
 0x600   : > { %v3933_v23 = vpop.xlane.xlu0 %3932  ;;  %v4146_v51 = vsel %vm2246_vm8, %v4067_v33, %v4145_v13 }
 0x601   : > { %4156 = vxpose.xlu1.b32.start [1/2] (short) (narrow) %v4146_v51, 16  ;;  %v4071_v12 = vrot.slane %v3933_v23, %v7469_v32 }
 0x603   : > { %v4076_v15 = vsel %vm2097_vm7, %v4075_v50, %v4071_v12 }
 0x604   : > { %v3937_v46 = vpop.xlane.xlu0 %3936  ;;  %v4537_v0 = vpop.f32.mrf.mxu0 }
 0x605   : > { %v4080_v6 = vrot.slane %v3937_v46, %v7469_v32  ;;  %v4548_v36 = vsel %vm7880_vm14, %v4537_v0, 0.0 }
 0x606   : > { %4554 = vst [vmem:[%s7611_s27 + $0x20] sm:$0xff] %v4548_v36  ;;  %v4539_v26 = vpop.f32.mrf.mxu0 }
 0x607   : > { %v4085_v63 = vsel %vm2097_vm7, %v4084_v62, %v4080_v6 }
 0x608   : > { %v3941_v22 = vpop.xlane.xlu0 %3940  ;;  %v4147_v27 = vsel %vm2234_vm12, %v4085_v63, %v4076_v15  ;;  %v4540_v49 = vpop.f32.mrf.mxu0 }
 0x609   : > { %v4089_v31 = vrot.slane %v3941_v22, %v7469_v32  ;;  %v4549_v10 = vsel %vm7881_vm13, %v4540_v49, 0.0 }
 0x60a   : > { %5165 = vset.pattern.permute.xlu0 %v7879_v42  ;;  %4555 = vst [vmem:[%s7611_s27 + $0x28] sm:$0xff] %v4549_v10  ;;  %v4542_v8 = vpop.f32.mrf.mxu0 }
 0x60b   : > { %v4094_v11 = vsel %vm2097_vm7, %v4093_v52, %v4089_v31 }
 0x60c   : > { %v3945_v5 = vpop.xlane.xlu0 %3944  ;;  %v4148_v28 = vsel %vm2236_vm10, %v4094_v11, %v4147_v27 }
 0x60d   : > { %v4098_v53 = vrot.slane %v3945_v5, %v7469_v32 }
 0x60f   : > { %v4103_v14 = vsel %vm2097_vm7, %v4102_v40, %v4098_v53 }
 0x610   : > { %v3949_v43 = vpop.xlane.xlu0 %3948  ;;  %v4149_v37 = vsel %vm2238_vm1, %v4103_v14, %v4148_v28 }
 0x611   : > { %v4107_v35 = vrot.slane %v3949_v43, %v7469_v32 }
 0x613   : > { %v4112_v39 = vsel %vm2097_vm7, %v4111_v54, %v4107_v35 }
 0x614   : > { %v3953_v61 = vpop.xlane.xlu0 %3952  ;;  %v4150_v58 = vsel %vm2240_vm11, %v4112_v39, %v4149_v37 }
 0x615   : > { %v4116_v24 = vrot.slane %v3953_v61, %v7469_v32 }
 0x617   : > { %v4121_v20 = vsel %vm2097_vm7, %v4120_v34, %v4116_v24 }
 0x618   : > { %v3957_v56 = vpop.xlane.xlu0 %3956  ;;  %v4151_v29 = vsel %vm2242_vm3, %v4121_v20, %v4150_v58 }
 0x619   : > { %v4125_v59 = vrot.slane %v3957_v56, %v7469_v32 }
 0x61b   : > { %v4130_v9 = vsel %vm2097_vm7, %v4129_v16, %v4125_v59 }
 0x61c   : > { %v3961_v21 = vpop.xlane.xlu0 %3960  ;;  %v4152_v18 = vsel %vm2244_vm5, %v4130_v9, %v4151_v29 }
 0x61d   : > { %v4134_v45 = vrot.slane %v3961_v21, %v7469_v32 }
 0x61f   : > { %v4139_v25 = vsel %vm2097_vm7, %v4138_v3, %v4134_v45 }
 0x620   : > { %v4153_v1 = vsel %vm2246_vm8, %v4139_v25, %v4152_v18 }
 0x621   : > { %4157 = vxpose.xlu1.b32.end [2/2] (short) (narrow) %v4153_v1, 16 }
 0x659   : > { %v2273_v41 = vpop.trf.xlu0 }
 0x65a   : > { %v4544_v57 = vsel %vm7882_vm0, %v2273_v41, 0.0 }
 0x65b   : > { %4550 = vst [vmem:[%s7611_s27] sm:$0xff] %v4544_v57 }
 0x65d   : > { %v2274_v32 = vpop.trf.xlu0 }
 0x65e   : > { %v4545_v60 = vsel %vm7883_vm2, %v2274_v32, 0.0 }
 0x65f   : > { %4551 = vst [vmem:[%s7611_s27 + $0x8] sm:$0xff] %v4545_v60 }
 0x699   : > { %v4172_v4 = vpop.trf.xlu1 }
 0x69a   : > { %v4546_v30 = vsel %vm7884_vm6, %v4172_v4, 0.0 }
 0x69b   : > { %4552 = vst [vmem:[%s7611_s27 + $0x10] sm:$0xff] %v4546_v30 }
 0x69d   : > { %v4173_v48 = vpop.trf.xlu1 }
 0x69e   : > { %v4547_v7 = vsel %vm7885_vm15, %v4173_v48, 0.0 }
 0x69f   : > { %4553 = vst [vmem:[%s7611_s27 + $0x18] sm:$0xff] %v4547_v7 }
 0x6a0 PF: > { %s22_s21 = sadd.s32 1, %s5192_s21  }
 0x6a1   : > { %p19_p5 = scmp.ge.s32.totalorder %s22_s21, 4  }
 0x6a3   :  { %21 = sbr.rel (!%p19_p5) target bundleno = 1 (0x1), region = 98 }

</bundles_post_ra>
